<compile_context>
chip_gen: v5e
topology: v5e:2x2
jax: 0.10.0
libtpu: 0.0.40
codegen_flags: <defaults>
</compile_context>

<pallas_src>
import functools

import jax
import jax.numpy as jnp
from jax import lax
from jax.experimental import pallas as pl
from jax.experimental.pallas import tpu as pltpu


# ---------------------------------------------------------------------------
# Pallas kernels
# ---------------------------------------------------------------------------

def _matmul_affine_kernel(x_ref, w_ref, scale_ref, bias_ref, o_ref, acc_ref, *, relu):
    """acc += x @ w ; on last K step: o = maybe_relu(acc * scale + bias)."""
    @pl.when(pl.program_id(2) == 0)
    def _init():
        acc_ref[...] = jnp.zeros_like(acc_ref)

    acc_ref[...] += jnp.dot(x_ref[...], w_ref[...],
                            preferred_element_type=jnp.float32)

    @pl.when(pl.program_id(2) == pl.num_programs(2) - 1)
    def _store():
        acc = acc_ref[...] * scale_ref[...] + bias_ref[...]
        if relu:
            acc = jnp.maximum(acc, 0.0)
        o_ref[...] = acc.astype(o_ref.dtype)


def _matmul_bias_kernel(x_ref, w_ref, bias_ref, o_ref, acc_ref, *, relu):
    """Same as above but with no per-column scale (plain conv bias)."""
    @pl.when(pl.program_id(2) == 0)
    def _init():
        acc_ref[...] = jnp.zeros_like(acc_ref)

    acc_ref[...] += jnp.dot(x_ref[...], w_ref[...],
                            preferred_element_type=jnp.float32)

    @pl.when(pl.program_id(2) == pl.num_programs(2) - 1)
    def _store():
        acc = acc_ref[...] + bias_ref[...]
        if relu:
            acc = jnp.maximum(acc, 0.0)
        o_ref[...] = acc.astype(o_ref.dtype)


def _max4_kernel(x_ref, o_ref):
    """Max over the leading (4-tap) axis; purely elementwise on the VPU."""
    o_ref[...] = jnp.max(x_ref[...], axis=0)


# ---------------------------------------------------------------------------
# Fused matmul wrapper (im2col hot path)
# ---------------------------------------------------------------------------

def _round_up(v, m):
    return (v + m - 1) // m * m


# Tile caps sized for v7x's 64 MiB physical / 32 MiB scoped VMEM (x tile 256x512 bf16
# = 256 KiB, w tile 512x256 bf16 = 256 KiB, out/acc 256x256 f32 = 256 KiB each;
# double-buffered total well under 2 MiB).  Also fine on v5e/v6e.
_TM_CAP = 256
_TN_CAP = 256
_TK_CAP = 512
_VMEM_LIMIT = 32 * 1024 * 1024


def matmul_fused(x, w, scale=None, bias=None, relu=False, out_dtype=jnp.float32):
    """o = maybe_relu((x @ w) * scale + bias), tiled over an (M, N, K) grid.

    x: [M, K], w: [K, N], scale/bias: [N] (scale may be None -> bias-only kernel).
    bf16 MXU inputs, f32 accumulation/epilogue.  N is padded up to a lane-dense
    multiple of 128; M/K are padded only when they must be split into tiles.
    """
    M, K = x.shape
    K2, N = w.shape
    assert K == K2

    # Tile choice: full dim as a single block when it fits (no padding needed,
    # full-dim blocks are exempt from the (8,128) divisibility rule), else cap.
    tm = M if M <= _TM_CAP else _TM_CAP
    tk = K if K <= _TK_CAP else _TK_CAP
    tn = _round_up(N, 128) if N <= _TN_CAP else _TN_CAP

    Mp = _round_up(M, tm)
    Kp = _round_up(K, tk)
    Np = _round_up(N, tn)

    xb = x.astype(jnp.bfloat16)
    wb = w.astype(jnp.bfloat16)
    if (Mp, Kp) != (M, K):
        xb = jnp.pad(xb, ((0, Mp - M), (0, Kp - K)))
    if (Kp, Np) != (K, N):
        wb = jnp.pad(wb, ((0, Kp - K), (0, Np - N)))

    def _pad_vec(v):
        v = v.astype(jnp.float32).reshape(1, N)
        if Np != N:
            v = jnp.pad(v, ((0, 0), (0, Np - N)))
        return v

    inputs = [xb, wb]
    in_specs = [
        pl.BlockSpec((tm, tk), lambda i, j, k: (i, k)),
        pl.BlockSpec((tk, tn), lambda i, j, k: (k, j)),
    ]
    if scale is not None:
        inputs.append(_pad_vec(scale))
        in_specs.append(pl.BlockSpec((1, tn), lambda i, j, k: (0, j)))
        kernel = functools.partial(_matmul_affine_kernel, relu=relu)
    else:
        kernel = functools.partial(_matmul_bias_kernel, relu=relu)
    inputs.append(_pad_vec(bias))
    in_specs.append(pl.BlockSpec((1, tn), lambda i, j, k: (0, j)))

    grid = (Mp // tm, Np // tn, Kp // tk)
    flops = 2 * Mp * Np * Kp
    bytes_accessed = xb.size * 2 + wb.size * 2 + Mp * Np * 4 + 2 * Np * 4

    out = pl.pallas_call(
        kernel,
        out_shape=jax.ShapeDtypeStruct((Mp, Np), out_dtype),
        grid_spec=pltpu.PrefetchScalarGridSpec(
            num_scalar_prefetch=0,
            grid=grid,
            in_specs=in_specs,
            out_specs=pl.BlockSpec((tm, tn), lambda i, j, k: (i, j)),
            scratch_shapes=[pltpu.VMEM((tm, tn), jnp.float32)],
        ),
        compiler_params=pltpu.CompilerParams(
            dimension_semantics=("parallel", "parallel", "arbitrary"),
            vmem_limit_bytes=_VMEM_LIMIT,
        ),
        cost_estimate=pl.CostEstimate(flops=flops, transcendentals=0,
                                      bytes_accessed=bytes_accessed),
    )(*inputs)

    if (Mp, Np) != (M, N):
        out = out[:M, :N]
    return out


# ---------------------------------------------------------------------------
# Max pool (exact 2x2 / stride 2), lane-dense Pallas reduction
# ---------------------------------------------------------------------------

def maxpool2x2(x_nhwc):
    N, H, W, C = x_nhwc.shape
    assert H % 2 == 0 and W % 2 == 0
    Hh, Wh = H // 2, W // 2
    total = N * Hh * Wh * C

    views = []
    for dy in range(2):
        for dx in range(2):
            v = lax.slice(x_nhwc, (0, dy, dx, 0), (N, H, W, C), (1, 2, 2, 1))
            views.append(v.reshape(-1))
    stacked = jnp.stack(views, axis=0)          # [4, total]

    # Reshape so the last dim is 128 lanes wide (max over axis 0 is elementwise,
    # so the trailing layout is irrelevant) -> unmasked, lane-dense vst.
    lanes = 128 if total % 128 == 0 else C
    R = total // lanes
    stacked = stacked.reshape(4, R, lanes)

    tr = R if R <= 2048 else 512
    if R % tr != 0:
        tr = R  # fall back to a single block rather than handle ragged edges

    out = pl.pallas_call(
        _max4_kernel,
        out_shape=jax.ShapeDtypeStruct((R, lanes), x_nhwc.dtype),
        grid_spec=pltpu.PrefetchScalarGridSpec(
            num_scalar_prefetch=0,
            grid=(R // tr,),
            in_specs=[pl.BlockSpec((4, tr, lanes), lambda i: (0, i, 0))],
            out_specs=pl.BlockSpec((tr, lanes), lambda i: (i, 0)),
        ),
        compiler_params=pltpu.CompilerParams(
            dimension_semantics=("parallel",),
            vmem_limit_bytes=_VMEM_LIMIT,
        ),
    )(stacked)
    return out.reshape(N, Hh, Wh, C)


# ---------------------------------------------------------------------------
# Conv building blocks (im2col glue in JAX, fused matmul in Pallas)
# ---------------------------------------------------------------------------

def _im2col_3x3(x_nhwc, stride):
    # TODO(synk): move the 3x3 tap extraction into the matmul kernel (K/tap grid axis)
    #             to avoid the 9x im2col materialization in HBM.
    N, H, W, C = x_nhwc.shape
    xp = jnp.pad(x_nhwc, ((0, 0), (1, 1), (1, 1), (0, 0)))
    Hp, Wp = H + 2, W + 2
    Ho = (Hp - 3) // stride + 1
    Wo = (Wp - 3) // stride + 1
    cols = []
    for dy in range(3):
        for dx in range(3):
            lim_h = dy + stride * (Ho - 1) + 1
            lim_w = dx + stride * (Wo - 1) + 1
            patch = lax.slice(xp, (0, dy, dx, 0), (N, lim_h, lim_w, C),
                              (1, stride, stride, 1))
            cols.append(patch)
    patches = jnp.stack(cols, axis=3)                     # [N, Ho, Wo, 9, C]
    return patches.reshape(N * Ho * Wo, 9 * C), (N, Ho, Wo)


def conv3x3_bn_relu(x_nhwc, w_oihw, bn, stride, conv_bias=None):
    """Conv2d(k=3, p=1) + BatchNorm(eval) + ReLU (conv bias folded into BN shift)."""
    cols, (N, Ho, Wo) = _im2col_3x3(x_nhwc, stride)
    Cout = w_oihw.shape[0]
    w_mat = jnp.transpose(w_oihw, (2, 3, 1, 0)).reshape(-1, Cout)   # [9*Cin, Cout]
    gamma, beta, mean, var = bn
    scale = gamma / jnp.sqrt(var + 1e-5)
    if conv_bias is None:
        shift = beta - mean * scale
    else:
        shift = beta + (conv_bias - mean) * scale
    y = matmul_fused(cols, w_mat, scale=scale, bias=shift, relu=True)
    return y.reshape(N, Ho, Wo, Cout)


def convtranspose2x2(x_nhwc, w_iohw, b):
    """ConvTranspose2d(k=2, s=2) — one matmul producing all 4 sub-pixel positions."""
    N, H, W, Cin = x_nhwc.shape
    Cout = w_iohw.shape[1]
    w_mat = jnp.transpose(w_iohw, (0, 2, 3, 1)).reshape(Cin, 4 * Cout)  # (ky,kx,cout)
    bias = jnp.tile(b, 4)
    y = matmul_fused(x_nhwc.reshape(-1, Cin), w_mat, scale=None, bias=bias, relu=False)
    # TODO(synk): write the interleaved (2H, 2W) layout directly via the output
    #             BlockSpec index_map instead of this reshape/transpose.
    y = y.reshape(N, H, W, 2, 2, Cout)
    y = jnp.transpose(y, (0, 1, 3, 2, 4, 5)).reshape(N, 2 * H, 2 * W, Cout)
    return y


def conv1x1_bias(x_nhwc, w_oihw, b):
    N, H, W, Cin = x_nhwc.shape
    Cout = w_oihw.shape[0]
    w_mat = jnp.transpose(w_oihw.reshape(Cout, Cin), (1, 0))
    y = matmul_fused(x_nhwc.reshape(-1, Cin), w_mat, scale=None, bias=b, relu=False)
    return y.reshape(N, H, W, Cout)


# ---------------------------------------------------------------------------
# LiFT forward (pre_shape=False, post_shape=False, patch_size=16)
# ---------------------------------------------------------------------------

def lift_forward(params, imgs_nchw, x_nchw):
    imgs = jnp.transpose(imgs_nchw, (0, 2, 3, 1))  # NHWC
    x = jnp.transpose(x_nchw, (0, 2, 3, 1))        # NHWC
    B, Hf, Wf, C = x.shape

    # image_convs_1: two stride-2 conv+BN+ReLU blocks
    h = conv3x3_bn_relu(imgs, params['ic1_w1'], params['ic1_bn1'], stride=2,
                        conv_bias=params['ic1_b1'])
    h = conv3x3_bn_relu(h, params['ic1_w2'], params['ic1_bn2'], stride=2,
                        conv_bias=params['ic1_b2'])

    # adaptive_max_pool2d(h, (2*Hf, 2*Wf))
    # TODO(synk): general adaptive pooling (overlapping windows) not implemented;
    #             shapes used here give an exact non-overlapping 2x2 pool.
    assert h.shape[1] == 2 * (2 * Hf) and h.shape[2] == 2 * (2 * Wf)
    imgs_1 = maxpool2x2(h)                               # [B, 2Hf, 2Wf, 32]

    # image_convs_2: stride-2 conv+BN+ReLU
    imgs_2 = conv3x3_bn_relu(imgs_1, params['ic2_w'], params['ic2_bn'], stride=2,
                             conv_bias=params['ic2_b'])

    # TODO(synk): fold both concats into the consumer matmuls as split-K accumulation
    #             instead of materializing concatenated activations.
    xc = jnp.concatenate([x, imgs_2], axis=-1)           # [B, Hf, Wf, C+32]
    up = convtranspose2x2(xc, params['up_w'], params['up_b'])   # [B, 2Hf, 2Wf, (C+32)//2]
    cat = jnp.concatenate([up, imgs_1], axis=-1)         # [B, 2Hf, 2Wf, (C+32)//2+32]
    d = conv3x3_bn_relu(cat, params['dc_w1'], params['dc_bn1'], stride=1)
    d = conv3x3_bn_relu(d, params['dc_w2'], params['dc_bn2'], stride=1)  # [B,2Hf,2Wf,C//2]

    # outc: 1x1 conv with bias
    out = conv1x1_bias(d, params['outc_w'], params['outc_b'])   # [B, 2Hf, 2Wf, C]
    return jnp.transpose(out, (0, 3, 1, 2))              # back to NCHW


# ---------------------------------------------------------------------------
# Deterministic parameter construction (synthetic, matches __init__ shapes)
# ---------------------------------------------------------------------------

def _bn_params(key, c):
    k1, k2, k3, k4 = jax.random.split(key, 4)
    gamma = 1.0 + 0.1 * jax.random.normal(k1, (c,), jnp.float32)
    beta = 0.1 * jax.random.normal(k2, (c,), jnp.float32)
    mean = 0.1 * jax.random.normal(k3, (c,), jnp.float32)
    var = 1.0 + 0.5 * jax.random.uniform(k4, (c,), jnp.float32)
    return (gamma, beta, mean, var)


def init_params(key, C):
    ks = jax.random.split(key, 20)
    half = (C + 32) // 2
    dc_in = half + 32
    p = {
        'ic1_w1': 0.1 * jax.random.normal(ks[0], (32, 3, 3, 3), jnp.float32),
        'ic1_b1': 0.1 * jax.random.normal(ks[14], (32,), jnp.float32),
        'ic1_bn1': _bn_params(ks[1], 32),
        'ic1_w2': 0.1 * jax.random.normal(ks[2], (32, 32, 3, 3), jnp.float32),
        'ic1_b2': 0.1 * jax.random.normal(ks[15], (32,), jnp.float32),
        'ic1_bn2': _bn_params(ks[3], 32),
        'ic2_w': 0.1 * jax.random.normal(ks[4], (32, 32, 3, 3), jnp.float32),
        'ic2_b': 0.1 * jax.random.normal(ks[16], (32,), jnp.float32),
        'ic2_bn': _bn_params(ks[5], 32),
        'up_w': 0.1 * jax.random.normal(ks[6], (C + 32, half, 2, 2), jnp.float32),
        'up_b': 0.1 * jax.random.normal(ks[7], (half,), jnp.float32),
        'dc_w1': 0.1 * jax.random.normal(ks[8], (C // 2, dc_in, 3, 3), jnp.float32),
        'dc_bn1': _bn_params(ks[9], C // 2),
        'dc_w2': 0.1 * jax.random.normal(ks[10], (C // 2, C // 2, 3, 3), jnp.float32),
        'dc_bn2': _bn_params(ks[11], C // 2),
        'outc_w': 0.1 * jax.random.normal(ks[12], (C, C // 2, 1, 1), jnp.float32),
        'outc_b': 0.1 * jax.random.normal(ks[13], (C,), jnp.float32),
    }
    return p


if __name__ == "__main__":
    key = jax.random.PRNGKey(0)
    k_img, k_feat, k_par = jax.random.split(key, 3)

    B, C, patch = 2, 8, 16
    Hi = Wi = 64                       # image size
    Hf = Wf = Hi // patch              # ViT feature grid (4x4)

    imgs = jax.random.normal(k_img, (B, 3, Hi, Wi), jnp.float32)
    x = jax.random.normal(k_feat, (B, C, Hf, Wf), jnp.float32)
    params = init_params(k_par, C)

    fwd = jax.jit(lift_forward)
    out = fwd(params, imgs, x)
    out = jax.block_until_ready(out)
    assert out.shape == (B, C, 2 * Hf, 2 * Wf), out.shape
    assert jnp.all(jnp.isfinite(out))
    print("KERNEL_OK")
</pallas_src>

<mosaic_0001>
module attributes {stable_mosaic.version = 11 : i64} {
  func.func @_matmul_affine_kernel(%arg0: i32, %arg1: i32, %arg2: i32, %arg3: memref<256x27xbf16, #tpu.memory_space<vmem>>, %arg4: memref<27x128xbf16, #tpu.memory_space<vmem>>, %arg5: memref<1x128xf32, #tpu.memory_space<vmem>>, %arg6: memref<1x128xf32, #tpu.memory_space<vmem>>, %arg7: memref<256x128xf32, #tpu.memory_space<vmem>>, %arg8: memref<256x128xf32, #tpu.memory_space<vmem>>) attributes {dimension_semantics = [#tpu.dimension_semantics<parallel>, #tpu.dimension_semantics<parallel>, #tpu.dimension_semantics<arbitrary>], iteration_bounds = array<i64: 8, 1, 1>, scalar_prefetch = 0 : i64, scratch_operands = 1 : i64, tpu.core_type = #tpu.core_type<tc>, window_params = [{transform_indices = @transform_0, window_bounds = array<i64: 256, 27>}, {transform_indices = @transform_1, window_bounds = array<i64: 27, 128>}, {transform_indices = @transform_2, window_bounds = array<i64: 1, 128>}, {transform_indices = @transform_3, window_bounds = array<i64: 1, 128>}, {transform_indices = @transform_4, window_bounds = array<i64: 256, 128>}]} {
    %c0_i32 = arith.constant 0 : i32
    %0 = arith.cmpi eq, %arg2, %c0_i32 : i32
    %1 = arith.extui %0 : i1 to i32
    %c0_i32_0 = arith.constant 0 : i32
    %2 = arith.cmpi ne, %1, %c0_i32_0 : i32
    scf.if %2 {
      %cst_10 = arith.constant 0.000000e+00 : f32
      %12 = vector.broadcast %cst_10 : f32 to vector<256x128xf32>
      %c0_11 = arith.constant 0 : index
      %c0_12 = arith.constant 0 : index
      %13 = vector.load %arg8[%c0_11, %c0_12] : memref<256x128xf32, #tpu.memory_space<vmem>>, vector<256x128xf32>
      tpu.vector_store %arg8[%c0_11, %c0_12], %12 {strides = array<i32>} : memref<256x128xf32, #tpu.memory_space<vmem>>, vector<256x128xf32>,
    } else {
    }
    %c0 = arith.constant 0 : index
    %c0_1 = arith.constant 0 : index
    %3 = vector.load %arg8[%c0, %c0_1] : memref<256x128xf32, #tpu.memory_space<vmem>>, vector<256x128xf32>
    %c0_2 = arith.constant 0 : index
    %c0_3 = arith.constant 0 : index
    %4 = vector.load %arg3[%c0_2, %c0_3] : memref<256x27xbf16, #tpu.memory_space<vmem>>, vector<256x27xbf16>
    %c0_4 = arith.constant 0 : index
    %c0_5 = arith.constant 0 : index
    %5 = vector.load %arg4[%c0_4, %c0_5] : memref<27x128xbf16, #tpu.memory_space<vmem>>, vector<27x128xbf16>
    %cst = arith.constant dense<0.000000e+00> : vector<256x128xf32>
    %6 = tpu.matmul %4, %5, %cst {dimension_numbers = #tpu.dot_dimension_numbers<[1], [0], [0], [1], [0, 0, 1, 1], [], []>} : vector<256x27xbf16>, vector<27x128xbf16>, vector<256x128xf32> -> vector<256x128xf32>
    %7 = arith.addf %3, %6 : vector<256x128xf32>
    %c0_6 = arith.constant 0 : index
    %c0_7 = arith.constant 0 : index
    %8 = vector.load %arg8[%c0_6, %c0_7] : memref<256x128xf32, #tpu.memory_space<vmem>>, vector<256x128xf32>
    tpu.vector_store %arg8[%c0_6, %c0_7], %7 {strides = array<i32>} : memref<256x128xf32, #tpu.memory_space<vmem>>, vector<256x128xf32>,
    %c0_i32_8 = arith.constant 0 : i32
    %9 = arith.cmpi eq, %arg2, %c0_i32_8 : i32
    %10 = arith.extui %9 : i1 to i32
    %c0_i32_9 = arith.constant 0 : i32
    %11 = arith.cmpi ne, %10, %c0_i32_9 : i32
    scf.if %11 {
      %c0_10 = arith.constant 0 : index
      %c0_11 = arith.constant 0 : index
      %12 = vector.load %arg8[%c0_10, %c0_11] : memref<256x128xf32, #tpu.memory_space<vmem>>, vector<256x128xf32>
      %c0_12 = arith.constant 0 : index
      %c0_13 = arith.constant 0 : index
      %13 = vector.load %arg5[%c0_12, %c0_13] : memref<1x128xf32, #tpu.memory_space<vmem>>, vector<1x128xf32>
      %14 = vector.broadcast %13 : vector<1x128xf32> to vector<256x128xf32>
      %15 = arith.mulf %12, %14 : vector<256x128xf32>
      %c0_14 = arith.constant 0 : index
      %c0_15 = arith.constant 0 : index
      %16 = vector.load %arg6[%c0_14, %c0_15] : memref<1x128xf32, #tpu.memory_space<vmem>>, vector<1x128xf32>
      %17 = vector.broadcast %16 : vector<1x128xf32> to vector<256x128xf32>
      %18 = arith.addf %15, %17 : vector<256x128xf32>
      %cst_16 = arith.constant 0.000000e+00 : f32
      %19 = vector.broadcast %cst_16 : f32 to vector<256x128xf32>
      %20 = arith.maximumf %18, %19 : vector<256x128xf32>
      %c0_17 = arith.constant 0 : index
      %c0_18 = arith.constant 0 : index
      %21 = vector.load %arg7[%c0_17, %c0_18] : memref<256x128xf32, #tpu.memory_space<vmem>>, vector<256x128xf32>
      tpu.vector_store %arg7[%c0_17, %c0_18], %20 {strides = array<i32>} : memref<256x128xf32, #tpu.memory_space<vmem>>, vector<256x128xf32>,
    } else {
    }
    return
  }
  func.func @transform_0(%arg0: i32, %arg1: i32, %arg2: i32) -> (i32, i32) {
    %c0_i32 = arith.constant 0 : i32
    return %arg0, %arg2 : i32, i32
  }
  func.func @transform_1(%arg0: i32, %arg1: i32, %arg2: i32) -> (i32, i32) {
    %c0_i32 = arith.constant 0 : i32
    return %arg2, %arg1 : i32, i32
  }
  func.func @transform_2(%arg0: i32, %arg1: i32, %arg2: i32) -> (i32, i32) {
    %c0_i32 = arith.constant 0 : i32
    %c0_i32_0 = arith.constant 0 : i32
    return %c0_i32, %arg1 : i32, i32
  }
  func.func @transform_3(%arg0: i32, %arg1: i32, %arg2: i32) -> (i32, i32) {
    %c0_i32 = arith.constant 0 : i32
    %c0_i32_0 = arith.constant 0 : i32
    return %c0_i32, %arg1 : i32, i32
  }
  func.func @transform_4(%arg0: i32, %arg1: i32, %arg2: i32) -> (i32, i32) {
    %c0_i32 = arith.constant 0 : i32
    return %arg0, %arg1 : i32, i32
  }
}

module attributes {stable_mosaic.version = 11 : i64} {
  func.func @_matmul_affine_kernel(%arg0: i32, %arg1: i32, %arg2: i32, %arg3: memref<256x288xbf16, #tpu.memory_space<vmem>>, %arg4: memref<288x128xbf16, #tpu.memory_space<vmem>>, %arg5: memref<1x128xf32, #tpu.memory_space<vmem>>, %arg6: memref<1x128xf32, #tpu.memory_space<vmem>>, %arg7: memref<256x128xf32, #tpu.memory_space<vmem>>, %arg8: memref<256x128xf32, #tpu.memory_space<vmem>>) attributes {dimension_semantics = [#tpu.dimension_semantics<parallel>, #tpu.dimension_semantics<parallel>, #tpu.dimension_semantics<arbitrary>], iteration_bounds = array<i64: 2, 1, 1>, scalar_prefetch = 0 : i64, scratch_operands = 1 : i64, tpu.core_type = #tpu.core_type<tc>, window_params = [{transform_indices = @transform_0, window_bounds = array<i64: 256, 288>}, {transform_indices = @transform_1, window_bounds = array<i64: 288, 128>}, {transform_indices = @transform_2, window_bounds = array<i64: 1, 128>}, {transform_indices = @transform_3, window_bounds = array<i64: 1, 128>}, {transform_indices = @transform_4, window_bounds = array<i64: 256, 128>}]} {
    %c0_i32 = arith.constant 0 : i32
    %0 = arith.cmpi eq, %arg2, %c0_i32 : i32
    %1 = arith.extui %0 : i1 to i32
    %c0_i32_0 = arith.constant 0 : i32
    %2 = arith.cmpi ne, %1, %c0_i32_0 : i32
    scf.if %2 {
      %cst_10 = arith.constant 0.000000e+00 : f32
      %12 = vector.broadcast %cst_10 : f32 to vector<256x128xf32>
      %c0_11 = arith.constant 0 : index
      %c0_12 = arith.constant 0 : index
      %13 = vector.load %arg8[%c0_11, %c0_12] : memref<256x128xf32, #tpu.memory_space<vmem>>, vector<256x128xf32>
      tpu.vector_store %arg8[%c0_11, %c0_12], %12 {strides = array<i32>} : memref<256x128xf32, #tpu.memory_space<vmem>>, vector<256x128xf32>,
    } else {
    }
    %c0 = arith.constant 0 : index
    %c0_1 = arith.constant 0 : index
    %3 = vector.load %arg8[%c0, %c0_1] : memref<256x128xf32, #tpu.memory_space<vmem>>, vector<256x128xf32>
    %c0_2 = arith.constant 0 : index
    %c0_3 = arith.constant 0 : index
    %4 = vector.load %arg3[%c0_2, %c0_3] : memref<256x288xbf16, #tpu.memory_space<vmem>>, vector<256x288xbf16>
    %c0_4 = arith.constant 0 : index
    %c0_5 = arith.constant 0 : index
    %5 = vector.load %arg4[%c0_4, %c0_5] : memref<288x128xbf16, #tpu.memory_space<vmem>>, vector<288x128xbf16>
    %cst = arith.constant dense<0.000000e+00> : vector<256x128xf32>
    %6 = tpu.matmul %4, %5, %cst {dimension_numbers = #tpu.dot_dimension_numbers<[1], [0], [0], [1], [0, 0, 1, 1], [], []>} : vector<256x288xbf16>, vector<288x128xbf16>, vector<256x128xf32> -> vector<256x128xf32>
    %7 = arith.addf %3, %6 : vector<256x128xf32>
    %c0_6 = arith.constant 0 : index
    %c0_7 = arith.constant 0 : index
    %8 = vector.load %arg8[%c0_6, %c0_7] : memref<256x128xf32, #tpu.memory_space<vmem>>, vector<256x128xf32>
    tpu.vector_store %arg8[%c0_6, %c0_7], %7 {strides = array<i32>} : memref<256x128xf32, #tpu.memory_space<vmem>>, vector<256x128xf32>,
    %c0_i32_8 = arith.constant 0 : i32
    %9 = arith.cmpi eq, %arg2, %c0_i32_8 : i32
    %10 = arith.extui %9 : i1 to i32
    %c0_i32_9 = arith.constant 0 : i32
    %11 = arith.cmpi ne, %10, %c0_i32_9 : i32
    scf.if %11 {
      %c0_10 = arith.constant 0 : index
      %c0_11 = arith.constant 0 : index
      %12 = vector.load %arg8[%c0_10, %c0_11] : memref<256x128xf32, #tpu.memory_space<vmem>>, vector<256x128xf32>
      %c0_12 = arith.constant 0 : index
      %c0_13 = arith.constant 0 : index
      %13 = vector.load %arg5[%c0_12, %c0_13] : memref<1x128xf32, #tpu.memory_space<vmem>>, vector<1x128xf32>
      %14 = vector.broadcast %13 : vector<1x128xf32> to vector<256x128xf32>
      %15 = arith.mulf %12, %14 : vector<256x128xf32>
      %c0_14 = arith.constant 0 : index
      %c0_15 = arith.constant 0 : index
      %16 = vector.load %arg6[%c0_14, %c0_15] : memref<1x128xf32, #tpu.memory_space<vmem>>, vector<1x128xf32>
      %17 = vector.broadcast %16 : vector<1x128xf32> to vector<256x128xf32>
      %18 = arith.addf %15, %17 : vector<256x128xf32>
      %cst_16 = arith.constant 0.000000e+00 : f32
      %19 = vector.broadcast %cst_16 : f32 to vector<256x128xf32>
      %20 = arith.maximumf %18, %19 : vector<256x128xf32>
      %c0_17 = arith.constant 0 : index
      %c0_18 = arith.constant 0 : index
      %21 = vector.load %arg7[%c0_17, %c0_18] : memref<256x128xf32, #tpu.memory_space<vmem>>, vector<256x128xf32>
      tpu.vector_store %arg7[%c0_17, %c0_18], %20 {strides = array<i32>} : memref<256x128xf32, #tpu.memory_space<vmem>>, vector<256x128xf32>,
    } else {
    }
    return
  }
  func.func @transform_0(%arg0: i32, %arg1: i32, %arg2: i32) -> (i32, i32) {
    %c0_i32 = arith.constant 0 : i32
    return %arg0, %arg2 : i32, i32
  }
  func.func @transform_1(%arg0: i32, %arg1: i32, %arg2: i32) -> (i32, i32) {
    %c0_i32 = arith.constant 0 : i32
    return %arg2, %arg1 : i32, i32
  }
  func.func @transform_2(%arg0: i32, %arg1: i32, %arg2: i32) -> (i32, i32) {
    %c0_i32 = arith.constant 0 : i32
    %c0_i32_0 = arith.constant 0 : i32
    return %c0_i32, %arg1 : i32, i32
  }
  func.func @transform_3(%arg0: i32, %arg1: i32, %arg2: i32) -> (i32, i32) {
    %c0_i32 = arith.constant 0 : i32
    %c0_i32_0 = arith.constant 0 : i32
    return %c0_i32, %arg1 : i32, i32
  }
  func.func @transform_4(%arg0: i32, %arg1: i32, %arg2: i32) -> (i32, i32) {
    %c0_i32 = arith.constant 0 : i32
    return %arg0, %arg1 : i32, i32
  }
}

module attributes {stable_mosaic.version = 11 : i64} {
  func.func @_max4_kernel(%arg0: i32, %arg1: memref<4x32x128xf32, #tpu.memory_space<vmem>>, %arg2: memref<32x128xf32, #tpu.memory_space<vmem>>) attributes {dimension_semantics = [#tpu.dimension_semantics<parallel>], iteration_bounds = array<i64: 1>, scalar_prefetch = 0 : i64, scratch_operands = 0 : i64, tpu.core_type = #tpu.core_type<tc>, window_params = [{transform_indices = @transform_0, window_bounds = array<i64: 4, 32, 128>}, {transform_indices = @transform_1, window_bounds = array<i64: 32, 128>}]} {
    %c0 = arith.constant 0 : index
    %c0_0 = arith.constant 0 : index
    %c0_1 = arith.constant 0 : index
    %0 = vector.load %arg1[%c0, %c0_0, %c0_1] : memref<4x32x128xf32, #tpu.memory_space<vmem>>, vector<4x32x128xf32>
    %cst = arith.constant dense<0xFF800000> : vector<32x128xf32>
    %1 = vector.multi_reduction <maximumf>, %0, %cst [0] : vector<4x32x128xf32> to vector<32x128xf32>
    %c0_2 = arith.constant 0 : index
    %c0_3 = arith.constant 0 : index
    %2 = vector.load %arg2[%c0_2, %c0_3] : memref<32x128xf32, #tpu.memory_space<vmem>>, vector<32x128xf32>
    tpu.vector_store %arg2[%c0_2, %c0_3], %1 {strides = array<i32>} : memref<32x128xf32, #tpu.memory_space<vmem>>, vector<32x128xf32>,
    return
  }
  func.func @transform_0(%arg0: i32) -> (i32, i32, i32) {
    %c0_i32 = arith.constant 0 : i32
    %c0_i32_0 = arith.constant 0 : i32
    %c0_i32_1 = arith.constant 0 : i32
    return %c0_i32, %arg0, %c0_i32_0 : i32, i32, i32
  }
  func.func @transform_1(%arg0: i32) -> (i32, i32) {
    %c0_i32 = arith.constant 0 : i32
    %c0_i32_0 = arith.constant 0 : i32
    return %arg0, %c0_i32 : i32, i32
  }
}

module attributes {stable_mosaic.version = 11 : i64} {
  func.func @_matmul_affine_kernel(%arg0: i32, %arg1: i32, %arg2: i32, %arg3: memref<32x288xbf16, #tpu.memory_space<vmem>>, %arg4: memref<288x128xbf16, #tpu.memory_space<vmem>>, %arg5: memref<1x128xf32, #tpu.memory_space<vmem>>, %arg6: memref<1x128xf32, #tpu.memory_space<vmem>>, %arg7: memref<32x128xf32, #tpu.memory_space<vmem>>, %arg8: memref<32x128xf32, #tpu.memory_space<vmem>>) attributes {dimension_semantics = [#tpu.dimension_semantics<parallel>, #tpu.dimension_semantics<parallel>, #tpu.dimension_semantics<arbitrary>], iteration_bounds = array<i64: 1, 1, 1>, scalar_prefetch = 0 : i64, scratch_operands = 1 : i64, tpu.core_type = #tpu.core_type<tc>, window_params = [{transform_indices = @transform_0, window_bounds = array<i64: 32, 288>}, {transform_indices = @transform_1, window_bounds = array<i64: 288, 128>}, {transform_indices = @transform_2, window_bounds = array<i64: 1, 128>}, {transform_indices = @transform_3, window_bounds = array<i64: 1, 128>}, {transform_indices = @transform_4, window_bounds = array<i64: 32, 128>}]} {
    %c0_i32 = arith.constant 0 : i32
    %0 = arith.cmpi eq, %arg2, %c0_i32 : i32
    %1 = arith.extui %0 : i1 to i32
    %c0_i32_0 = arith.constant 0 : i32
    %2 = arith.cmpi ne, %1, %c0_i32_0 : i32
    scf.if %2 {
      %cst_10 = arith.constant 0.000000e+00 : f32
      %12 = vector.broadcast %cst_10 : f32 to vector<32x128xf32>
      %c0_11 = arith.constant 0 : index
      %c0_12 = arith.constant 0 : index
      %13 = vector.load %arg8[%c0_11, %c0_12] : memref<32x128xf32, #tpu.memory_space<vmem>>, vector<32x128xf32>
      tpu.vector_store %arg8[%c0_11, %c0_12], %12 {strides = array<i32>} : memref<32x128xf32, #tpu.memory_space<vmem>>, vector<32x128xf32>,
    } else {
    }
    %c0 = arith.constant 0 : index
    %c0_1 = arith.constant 0 : index
    %3 = vector.load %arg8[%c0, %c0_1] : memref<32x128xf32, #tpu.memory_space<vmem>>, vector<32x128xf32>
    %c0_2 = arith.constant 0 : index
    %c0_3 = arith.constant 0 : index
    %4 = vector.load %arg3[%c0_2, %c0_3] : memref<32x288xbf16, #tpu.memory_space<vmem>>, vector<32x288xbf16>
    %c0_4 = arith.constant 0 : index
    %c0_5 = arith.constant 0 : index
    %5 = vector.load %arg4[%c0_4, %c0_5] : memref<288x128xbf16, #tpu.memory_space<vmem>>, vector<288x128xbf16>
    %cst = arith.constant dense<0.000000e+00> : vector<32x128xf32>
    %6 = tpu.matmul %4, %5, %cst {dimension_numbers = #tpu.dot_dimension_numbers<[1], [0], [0], [1], [0, 0, 1, 1], [], []>} : vector<32x288xbf16>, vector<288x128xbf16>, vector<32x128xf32> -> vector<32x128xf32>
    %7 = arith.addf %3, %6 : vector<32x128xf32>
    %c0_6 = arith.constant 0 : index
    %c0_7 = arith.constant 0 : index
    %8 = vector.load %arg8[%c0_6, %c0_7] : memref<32x128xf32, #tpu.memory_space<vmem>>, vector<32x128xf32>
    tpu.vector_store %arg8[%c0_6, %c0_7], %7 {strides = array<i32>} : memref<32x128xf32, #tpu.memory_space<vmem>>, vector<32x128xf32>,
    %c0_i32_8 = arith.constant 0 : i32
    %9 = arith.cmpi eq, %arg2, %c0_i32_8 : i32
    %10 = arith.extui %9 : i1 to i32
    %c0_i32_9 = arith.constant 0 : i32
    %11 = arith.cmpi ne, %10, %c0_i32_9 : i32
    scf.if %11 {
      %c0_10 = arith.constant 0 : index
      %c0_11 = arith.constant 0 : index
      %12 = vector.load %arg8[%c0_10, %c0_11] : memref<32x128xf32, #tpu.memory_space<vmem>>, vector<32x128xf32>
      %c0_12 = arith.constant 0 : index
      %c0_13 = arith.constant 0 : index
      %13 = vector.load %arg5[%c0_12, %c0_13] : memref<1x128xf32, #tpu.memory_space<vmem>>, vector<1x128xf32>
      %14 = vector.broadcast %13 : vector<1x128xf32> to vector<32x128xf32>
      %15 = arith.mulf %12, %14 : vector<32x128xf32>
      %c0_14 = arith.constant 0 : index
      %c0_15 = arith.constant 0 : index
      %16 = vector.load %arg6[%c0_14, %c0_15] : memref<1x128xf32, #tpu.memory_space<vmem>>, vector<1x128xf32>
      %17 = vector.broadcast %16 : vector<1x128xf32> to vector<32x128xf32>
      %18 = arith.addf %15, %17 : vector<32x128xf32>
      %cst_16 = arith.constant 0.000000e+00 : f32
      %19 = vector.broadcast %cst_16 : f32 to vector<32x128xf32>
      %20 = arith.maximumf %18, %19 : vector<32x128xf32>
      %c0_17 = arith.constant 0 : index
      %c0_18 = arith.constant 0 : index
      %21 = vector.load %arg7[%c0_17, %c0_18] : memref<32x128xf32, #tpu.memory_space<vmem>>, vector<32x128xf32>
      tpu.vector_store %arg7[%c0_17, %c0_18], %20 {strides = array<i32>} : memref<32x128xf32, #tpu.memory_space<vmem>>, vector<32x128xf32>,
    } else {
    }
    return
  }
  func.func @transform_0(%arg0: i32, %arg1: i32, %arg2: i32) -> (i32, i32) {
    %c0_i32 = arith.constant 0 : i32
    return %arg0, %arg2 : i32, i32
  }
  func.func @transform_1(%arg0: i32, %arg1: i32, %arg2: i32) -> (i32, i32) {
    %c0_i32 = arith.constant 0 : i32
    return %arg2, %arg1 : i32, i32
  }
  func.func @transform_2(%arg0: i32, %arg1: i32, %arg2: i32) -> (i32, i32) {
    %c0_i32 = arith.constant 0 : i32
    %c0_i32_0 = arith.constant 0 : i32
    return %c0_i32, %arg1 : i32, i32
  }
  func.func @transform_3(%arg0: i32, %arg1: i32, %arg2: i32) -> (i32, i32) {
    %c0_i32 = arith.constant 0 : i32
    %c0_i32_0 = arith.constant 0 : i32
    return %c0_i32, %arg1 : i32, i32
  }
  func.func @transform_4(%arg0: i32, %arg1: i32, %arg2: i32) -> (i32, i32) {
    %c0_i32 = arith.constant 0 : i32
    return %arg0, %arg1 : i32, i32
  }
}

module attributes {stable_mosaic.version = 11 : i64} {
  func.func @_matmul_bias_kernel(%arg0: i32, %arg1: i32, %arg2: i32, %arg3: memref<32x40xbf16, #tpu.memory_space<vmem>>, %arg4: memref<40x128xbf16, #tpu.memory_space<vmem>>, %arg5: memref<1x128xf32, #tpu.memory_space<vmem>>, %arg6: memref<32x128xf32, #tpu.memory_space<vmem>>, %arg7: memref<32x128xf32, #tpu.memory_space<vmem>>) attributes {dimension_semantics = [#tpu.dimension_semantics<parallel>, #tpu.dimension_semantics<parallel>, #tpu.dimension_semantics<arbitrary>], iteration_bounds = array<i64: 1, 1, 1>, scalar_prefetch = 0 : i64, scratch_operands = 1 : i64, tpu.core_type = #tpu.core_type<tc>, window_params = [{transform_indices = @transform_0, window_bounds = array<i64: 32, 40>}, {transform_indices = @transform_1, window_bounds = array<i64: 40, 128>}, {transform_indices = @transform_2, window_bounds = array<i64: 1, 128>}, {transform_indices = @transform_3, window_bounds = array<i64: 32, 128>}]} {
    %c0_i32 = arith.constant 0 : i32
    %0 = arith.cmpi eq, %arg2, %c0_i32 : i32
    %1 = arith.extui %0 : i1 to i32
    %c0_i32_0 = arith.constant 0 : i32
    %2 = arith.cmpi ne, %1, %c0_i32_0 : i32
    scf.if %2 {
      %cst_10 = arith.constant 0.000000e+00 : f32
      %12 = vector.broadcast %cst_10 : f32 to vector<32x128xf32>
      %c0_11 = arith.constant 0 : index
      %c0_12 = arith.constant 0 : index
      %13 = vector.load %arg7[%c0_11, %c0_12] : memref<32x128xf32, #tpu.memory_space<vmem>>, vector<32x128xf32>
      tpu.vector_store %arg7[%c0_11, %c0_12], %12 {strides = array<i32>} : memref<32x128xf32, #tpu.memory_space<vmem>>, vector<32x128xf32>,
    } else {
    }
    %c0 = arith.constant 0 : index
    %c0_1 = arith.constant 0 : index
    %3 = vector.load %arg7[%c0, %c0_1] : memref<32x128xf32, #tpu.memory_space<vmem>>, vector<32x128xf32>
    %c0_2 = arith.constant 0 : index
    %c0_3 = arith.constant 0 : index
    %4 = vector.load %arg3[%c0_2, %c0_3] : memref<32x40xbf16, #tpu.memory_space<vmem>>, vector<32x40xbf16>
    %c0_4 = arith.constant 0 : index
    %c0_5 = arith.constant 0 : index
    %5 = vector.load %arg4[%c0_4, %c0_5] : memref<40x128xbf16, #tpu.memory_space<vmem>>, vector<40x128xbf16>
    %cst = arith.constant dense<0.000000e+00> : vector<32x128xf32>
    %6 = tpu.matmul %4, %5, %cst {dimension_numbers = #tpu.dot_dimension_numbers<[1], [0], [0], [1], [0, 0, 1, 1], [], []>} : vector<32x40xbf16>, vector<40x128xbf16>, vector<32x128xf32> -> vector<32x128xf32>
    %7 = arith.addf %3, %6 : vector<32x128xf32>
    %c0_6 = arith.constant 0 : index
    %c0_7 = arith.constant 0 : index
    %8 = vector.load %arg7[%c0_6, %c0_7] : memref<32x128xf32, #tpu.memory_space<vmem>>, vector<32x128xf32>
    tpu.vector_store %arg7[%c0_6, %c0_7], %7 {strides = array<i32>} : memref<32x128xf32, #tpu.memory_space<vmem>>, vector<32x128xf32>,
    %c0_i32_8 = arith.constant 0 : i32
    %9 = arith.cmpi eq, %arg2, %c0_i32_8 : i32
    %10 = arith.extui %9 : i1 to i32
    %c0_i32_9 = arith.constant 0 : i32
    %11 = arith.cmpi ne, %10, %c0_i32_9 : i32
    scf.if %11 {
      %c0_10 = arith.constant 0 : index
      %c0_11 = arith.constant 0 : index
      %12 = vector.load %arg7[%c0_10, %c0_11] : memref<32x128xf32, #tpu.memory_space<vmem>>, vector<32x128xf32>
      %c0_12 = arith.constant 0 : index
      %c0_13 = arith.constant 0 : index
      %13 = vector.load %arg5[%c0_12, %c0_13] : memref<1x128xf32, #tpu.memory_space<vmem>>, vector<1x128xf32>
      %14 = vector.broadcast %13 : vector<1x128xf32> to vector<32x128xf32>
      %15 = arith.addf %12, %14 : vector<32x128xf32>
      %c0_14 = arith.constant 0 : index
      %c0_15 = arith.constant 0 : index
      %16 = vector.load %arg6[%c0_14, %c0_15] : memref<32x128xf32, #tpu.memory_space<vmem>>, vector<32x128xf32>
      tpu.vector_store %arg6[%c0_14, %c0_15], %15 {strides = array<i32>} : memref<32x128xf32, #tpu.memory_space<vmem>>, vector<32x128xf32>,
    } else {
    }
    return
  }
  func.func @transform_0(%arg0: i32, %arg1: i32, %arg2: i32) -> (i32, i32) {
    %c0_i32 = arith.constant 0 : i32
    return %arg0, %arg2 : i32, i32
  }
  func.func @transform_1(%arg0: i32, %arg1: i32, %arg2: i32) -> (i32, i32) {
    %c0_i32 = arith.constant 0 : i32
    return %arg2, %arg1 : i32, i32
  }
  func.func @transform_2(%arg0: i32, %arg1: i32, %arg2: i32) -> (i32, i32) {
    %c0_i32 = arith.constant 0 : i32
    %c0_i32_0 = arith.constant 0 : i32
    return %c0_i32, %arg1 : i32, i32
  }
  func.func @transform_3(%arg0: i32, %arg1: i32, %arg2: i32) -> (i32, i32) {
    %c0_i32 = arith.constant 0 : i32
    return %arg0, %arg1 : i32, i32
  }
}

module attributes {stable_mosaic.version = 11 : i64} {
  func.func @_matmul_affine_kernel(%arg0: i32, %arg1: i32, %arg2: i32, %arg3: memref<128x468xbf16, #tpu.memory_space<vmem>>, %arg4: memref<468x128xbf16, #tpu.memory_space<vmem>>, %arg5: memref<1x128xf32, #tpu.memory_space<vmem>>, %arg6: memref<1x128xf32, #tpu.memory_space<vmem>>, %arg7: memref<128x128xf32, #tpu.memory_space<vmem>>, %arg8: memref<128x128xf32, #tpu.memory_space<vmem>>) attributes {dimension_semantics = [#tpu.dimension_semantics<parallel>, #tpu.dimension_semantics<parallel>, #tpu.dimension_semantics<arbitrary>], iteration_bounds = array<i64: 1, 1, 1>, scalar_prefetch = 0 : i64, scratch_operands = 1 : i64, tpu.core_type = #tpu.core_type<tc>, window_params = [{transform_indices = @transform_0, window_bounds = array<i64: 128, 468>}, {transform_indices = @transform_1, window_bounds = array<i64: 468, 128>}, {transform_indices = @transform_2, window_bounds = array<i64: 1, 128>}, {transform_indices = @transform_3, window_bounds = array<i64: 1, 128>}, {transform_indices = @transform_4, window_bounds = array<i64: 128, 128>}]} {
    %c0_i32 = arith.constant 0 : i32
    %0 = arith.cmpi eq, %arg2, %c0_i32 : i32
    %1 = arith.extui %0 : i1 to i32
    %c0_i32_0 = arith.constant 0 : i32
    %2 = arith.cmpi ne, %1, %c0_i32_0 : i32
    scf.if %2 {
      %cst_10 = arith.constant 0.000000e+00 : f32
      %12 = vector.broadcast %cst_10 : f32 to vector<128x128xf32>
      %c0_11 = arith.constant 0 : index
      %c0_12 = arith.constant 0 : index
      %13 = vector.load %arg8[%c0_11, %c0_12] : memref<128x128xf32, #tpu.memory_space<vmem>>, vector<128x128xf32>
      tpu.vector_store %arg8[%c0_11, %c0_12], %12 {strides = array<i32>} : memref<128x128xf32, #tpu.memory_space<vmem>>, vector<128x128xf32>,
    } else {
    }
    %c0 = arith.constant 0 : index
    %c0_1 = arith.constant 0 : index
    %3 = vector.load %arg8[%c0, %c0_1] : memref<128x128xf32, #tpu.memory_space<vmem>>, vector<128x128xf32>
    %c0_2 = arith.constant 0 : index
    %c0_3 = arith.constant 0 : index
    %4 = vector.load %arg3[%c0_2, %c0_3] : memref<128x468xbf16, #tpu.memory_space<vmem>>, vector<128x468xbf16>
    %c0_4 = arith.constant 0 : index
    %c0_5 = arith.constant 0 : index
    %5 = vector.load %arg4[%c0_4, %c0_5] : memref<468x128xbf16, #tpu.memory_space<vmem>>, vector<468x128xbf16>
    %cst = arith.constant dense<0.000000e+00> : vector<128x128xf32>
    %6 = tpu.matmul %4, %5, %cst {dimension_numbers = #tpu.dot_dimension_numbers<[1], [0], [0], [1], [0, 0, 1, 1], [], []>} : vector<128x468xbf16>, vector<468x128xbf16>, vector<128x128xf32> -> vector<128x128xf32>
    %7 = arith.addf %3, %6 : vector<128x128xf32>
    %c0_6 = arith.constant 0 : index
    %c0_7 = arith.constant 0 : index
    %8 = vector.load %arg8[%c0_6, %c0_7] : memref<128x128xf32, #tpu.memory_space<vmem>>, vector<128x128xf32>
    tpu.vector_store %arg8[%c0_6, %c0_7], %7 {strides = array<i32>} : memref<128x128xf32, #tpu.memory_space<vmem>>, vector<128x128xf32>,
    %c0_i32_8 = arith.constant 0 : i32
    %9 = arith.cmpi eq, %arg2, %c0_i32_8 : i32
    %10 = arith.extui %9 : i1 to i32
    %c0_i32_9 = arith.constant 0 : i32
    %11 = arith.cmpi ne, %10, %c0_i32_9 : i32
    scf.if %11 {
      %c0_10 = arith.constant 0 : index
      %c0_11 = arith.constant 0 : index
      %12 = vector.load %arg8[%c0_10, %c0_11] : memref<128x128xf32, #tpu.memory_space<vmem>>, vector<128x128xf32>
      %c0_12 = arith.constant 0 : index
      %c0_13 = arith.constant 0 : index
      %13 = vector.load %arg5[%c0_12, %c0_13] : memref<1x128xf32, #tpu.memory_space<vmem>>, vector<1x128xf32>
      %14 = vector.broadcast %13 : vector<1x128xf32> to vector<128x128xf32>
      %15 = arith.mulf %12, %14 : vector<128x128xf32>
      %c0_14 = arith.constant 0 : index
      %c0_15 = arith.constant 0 : index
      %16 = vector.load %arg6[%c0_14, %c0_15] : memref<1x128xf32, #tpu.memory_space<vmem>>, vector<1x128xf32>
      %17 = vector.broadcast %16 : vector<1x128xf32> to vector<128x128xf32>
      %18 = arith.addf %15, %17 : vector<128x128xf32>
      %cst_16 = arith.constant 0.000000e+00 : f32
      %19 = vector.broadcast %cst_16 : f32 to vector<128x128xf32>
      %20 = arith.maximumf %18, %19 : vector<128x128xf32>
      %c0_17 = arith.constant 0 : index
      %c0_18 = arith.constant 0 : index
      %21 = vector.load %arg7[%c0_17, %c0_18] : memref<128x128xf32, #tpu.memory_space<vmem>>, vector<128x128xf32>
      tpu.vector_store %arg7[%c0_17, %c0_18], %20 {strides = array<i32>} : memref<128x128xf32, #tpu.memory_space<vmem>>, vector<128x128xf32>,
    } else {
    }
    return
  }
  func.func @transform_0(%arg0: i32, %arg1: i32, %arg2: i32) -> (i32, i32) {
    %c0_i32 = arith.constant 0 : i32
    return %arg0, %arg2 : i32, i32
  }
  func.func @transform_1(%arg0: i32, %arg1: i32, %arg2: i32) -> (i32, i32) {
    %c0_i32 = arith.constant 0 : i32
    return %arg2, %arg1 : i32, i32
  }
  func.func @transform_2(%arg0: i32, %arg1: i32, %arg2: i32) -> (i32, i32) {
    %c0_i32 = arith.constant 0 : i32
    %c0_i32_0 = arith.constant 0 : i32
    return %c0_i32, %arg1 : i32, i32
  }
  func.func @transform_3(%arg0: i32, %arg1: i32, %arg2: i32) -> (i32, i32) {
    %c0_i32 = arith.constant 0 : i32
    %c0_i32_0 = arith.constant 0 : i32
    return %c0_i32, %arg1 : i32, i32
  }
  func.func @transform_4(%arg0: i32, %arg1: i32, %arg2: i32) -> (i32, i32) {
    %c0_i32 = arith.constant 0 : i32
    return %arg0, %arg1 : i32, i32
  }
}

module attributes {stable_mosaic.version = 11 : i64} {
  func.func @_matmul_affine_kernel(%arg0: i32, %arg1: i32, %arg2: i32, %arg3: memref<128x36xbf16, #tpu.memory_space<vmem>>, %arg4: memref<36x128xbf16, #tpu.memory_space<vmem>>, %arg5: memref<1x128xf32, #tpu.memory_space<vmem>>, %arg6: memref<1x128xf32, #tpu.memory_space<vmem>>, %arg7: memref<128x128xf32, #tpu.memory_space<vmem>>, %arg8: memref<128x128xf32, #tpu.memory_space<vmem>>) attributes {dimension_semantics = [#tpu.dimension_semantics<parallel>, #tpu.dimension_semantics<parallel>, #tpu.dimension_semantics<arbitrary>], iteration_bounds = array<i64: 1, 1, 1>, scalar_prefetch = 0 : i64, scratch_operands = 1 : i64, tpu.core_type = #tpu.core_type<tc>, window_params = [{transform_indices = @transform_0, window_bounds = array<i64: 128, 36>}, {transform_indices = @transform_1, window_bounds = array<i64: 36, 128>}, {transform_indices = @transform_2, window_bounds = array<i64: 1, 128>}, {transform_indices = @transform_3, window_bounds = array<i64: 1, 128>}, {transform_indices = @transform_4, window_bounds = array<i64: 128, 128>}]} {
    %c0_i32 = arith.constant 0 : i32
    %0 = arith.cmpi eq, %arg2, %c0_i32 : i32
    %1 = arith.extui %0 : i1 to i32
    %c0_i32_0 = arith.constant 0 : i32
    %2 = arith.cmpi ne, %1, %c0_i32_0 : i32
    scf.if %2 {
      %cst_10 = arith.constant 0.000000e+00 : f32
      %12 = vector.broadcast %cst_10 : f32 to vector<128x128xf32>
      %c0_11 = arith.constant 0 : index
      %c0_12 = arith.constant 0 : index
      %13 = vector.load %arg8[%c0_11, %c0_12] : memref<128x128xf32, #tpu.memory_space<vmem>>, vector<128x128xf32>
      tpu.vector_store %arg8[%c0_11, %c0_12], %12 {strides = array<i32>} : memref<128x128xf32, #tpu.memory_space<vmem>>, vector<128x128xf32>,
    } else {
    }
    %c0 = arith.constant 0 : index
    %c0_1 = arith.constant 0 : index
    %3 = vector.load %arg8[%c0, %c0_1] : memref<128x128xf32, #tpu.memory_space<vmem>>, vector<128x128xf32>
    %c0_2 = arith.constant 0 : index
    %c0_3 = arith.constant 0 : index
    %4 = vector.load %arg3[%c0_2, %c0_3] : memref<128x36xbf16, #tpu.memory_space<vmem>>, vector<128x36xbf16>
    %c0_4 = arith.constant 0 : index
    %c0_5 = arith.constant 0 : index
    %5 = vector.load %arg4[%c0_4, %c0_5] : memref<36x128xbf16, #tpu.memory_space<vmem>>, vector<36x128xbf16>
    %cst = arith.constant dense<0.000000e+00> : vector<128x128xf32>
    %6 = tpu.matmul %4, %5, %cst {dimension_numbers = #tpu.dot_dimension_numbers<[1], [0], [0], [1], [0, 0, 1, 1], [], []>} : vector<128x36xbf16>, vector<36x128xbf16>, vector<128x128xf32> -> vector<128x128xf32>
    %7 = arith.addf %3, %6 : vector<128x128xf32>
    %c0_6 = arith.constant 0 : index
    %c0_7 = arith.constant 0 : index
    %8 = vector.load %arg8[%c0_6, %c0_7] : memref<128x128xf32, #tpu.memory_space<vmem>>, vector<128x128xf32>
    tpu.vector_store %arg8[%c0_6, %c0_7], %7 {strides = array<i32>} : memref<128x128xf32, #tpu.memory_space<vmem>>, vector<128x128xf32>,
    %c0_i32_8 = arith.constant 0 : i32
    %9 = arith.cmpi eq, %arg2, %c0_i32_8 : i32
    %10 = arith.extui %9 : i1 to i32
    %c0_i32_9 = arith.constant 0 : i32
    %11 = arith.cmpi ne, %10, %c0_i32_9 : i32
    scf.if %11 {
      %c0_10 = arith.constant 0 : index
      %c0_11 = arith.constant 0 : index
      %12 = vector.load %arg8[%c0_10, %c0_11] : memref<128x128xf32, #tpu.memory_space<vmem>>, vector<128x128xf32>
      %c0_12 = arith.constant 0 : index
      %c0_13 = arith.constant 0 : index
      %13 = vector.load %arg5[%c0_12, %c0_13] : memref<1x128xf32, #tpu.memory_space<vmem>>, vector<1x128xf32>
      %14 = vector.broadcast %13 : vector<1x128xf32> to vector<128x128xf32>
      %15 = arith.mulf %12, %14 : vector<128x128xf32>
      %c0_14 = arith.constant 0 : index
      %c0_15 = arith.constant 0 : index
      %16 = vector.load %arg6[%c0_14, %c0_15] : memref<1x128xf32, #tpu.memory_space<vmem>>, vector<1x128xf32>
      %17 = vector.broadcast %16 : vector<1x128xf32> to vector<128x128xf32>
      %18 = arith.addf %15, %17 : vector<128x128xf32>
      %cst_16 = arith.constant 0.000000e+00 : f32
      %19 = vector.broadcast %cst_16 : f32 to vector<128x128xf32>
      %20 = arith.maximumf %18, %19 : vector<128x128xf32>
      %c0_17 = arith.constant 0 : index
      %c0_18 = arith.constant 0 : index
      %21 = vector.load %arg7[%c0_17, %c0_18] : memref<128x128xf32, #tpu.memory_space<vmem>>, vector<128x128xf32>
      tpu.vector_store %arg7[%c0_17, %c0_18], %20 {strides = array<i32>} : memref<128x128xf32, #tpu.memory_space<vmem>>, vector<128x128xf32>,
    } else {
    }
    return
  }
  func.func @transform_0(%arg0: i32, %arg1: i32, %arg2: i32) -> (i32, i32) {
    %c0_i32 = arith.constant 0 : i32
    return %arg0, %arg2 : i32, i32
  }
  func.func @transform_1(%arg0: i32, %arg1: i32, %arg2: i32) -> (i32, i32) {
    %c0_i32 = arith.constant 0 : i32
    return %arg2, %arg1 : i32, i32
  }
  func.func @transform_2(%arg0: i32, %arg1: i32, %arg2: i32) -> (i32, i32) {
    %c0_i32 = arith.constant 0 : i32
    %c0_i32_0 = arith.constant 0 : i32
    return %c0_i32, %arg1 : i32, i32
  }
  func.func @transform_3(%arg0: i32, %arg1: i32, %arg2: i32) -> (i32, i32) {
    %c0_i32 = arith.constant 0 : i32
    %c0_i32_0 = arith.constant 0 : i32
    return %c0_i32, %arg1 : i32, i32
  }
  func.func @transform_4(%arg0: i32, %arg1: i32, %arg2: i32) -> (i32, i32) {
    %c0_i32 = arith.constant 0 : i32
    return %arg0, %arg1 : i32, i32
  }
}

module attributes {stable_mosaic.version = 11 : i64} {
  func.func @_matmul_bias_kernel(%arg0: i32, %arg1: i32, %arg2: i32, %arg3: memref<128x4xbf16, #tpu.memory_space<vmem>>, %arg4: memref<4x128xbf16, #tpu.memory_space<vmem>>, %arg5: memref<1x128xf32, #tpu.memory_space<vmem>>, %arg6: memref<128x128xf32, #tpu.memory_space<vmem>>, %arg7: memref<128x128xf32, #tpu.memory_space<vmem>>) attributes {dimension_semantics = [#tpu.dimension_semantics<parallel>, #tpu.dimension_semantics<parallel>, #tpu.dimension_semantics<arbitrary>], iteration_bounds = array<i64: 1, 1, 1>, scalar_prefetch = 0 : i64, scratch_operands = 1 : i64, tpu.core_type = #tpu.core_type<tc>, window_params = [{transform_indices = @transform_0, window_bounds = array<i64: 128, 4>}, {transform_indices = @transform_1, window_bounds = array<i64: 4, 128>}, {transform_indices = @transform_2, window_bounds = array<i64: 1, 128>}, {transform_indices = @transform_3, window_bounds = array<i64: 128, 128>}]} {
    %c0_i32 = arith.constant 0 : i32
    %0 = arith.cmpi eq, %arg2, %c0_i32 : i32
    %1 = arith.extui %0 : i1 to i32
    %c0_i32_0 = arith.constant 0 : i32
    %2 = arith.cmpi ne, %1, %c0_i32_0 : i32
    scf.if %2 {
      %cst_10 = arith.constant 0.000000e+00 : f32
      %12 = vector.broadcast %cst_10 : f32 to vector<128x128xf32>
      %c0_11 = arith.constant 0 : index
      %c0_12 = arith.constant 0 : index
      %13 = vector.load %arg7[%c0_11, %c0_12] : memref<128x128xf32, #tpu.memory_space<vmem>>, vector<128x128xf32>
      tpu.vector_store %arg7[%c0_11, %c0_12], %12 {strides = array<i32>} : memref<128x128xf32, #tpu.memory_space<vmem>>, vector<128x128xf32>,
    } else {
    }
    %c0 = arith.constant 0 : index
    %c0_1 = arith.constant 0 : index
    %3 = vector.load %arg7[%c0, %c0_1] : memref<128x128xf32, #tpu.memory_space<vmem>>, vector<128x128xf32>
    %c0_2 = arith.constant 0 : index
    %c0_3 = arith.constant 0 : index
    %4 = vector.load %arg3[%c0_2, %c0_3] : memref<128x4xbf16, #tpu.memory_space<vmem>>, vector<128x4xbf16>
    %c0_4 = arith.constant 0 : index
    %c0_5 = arith.constant 0 : index
    %5 = vector.load %arg4[%c0_4, %c0_5] : memref<4x128xbf16, #tpu.memory_space<vmem>>, vector<4x128xbf16>
    %cst = arith.constant dense<0.000000e+00> : vector<128x128xf32>
    %6 = tpu.matmul %4, %5, %cst {dimension_numbers = #tpu.dot_dimension_numbers<[1], [0], [0], [1], [0, 0, 1, 1], [], []>} : vector<128x4xbf16>, vector<4x128xbf16>, vector<128x128xf32> -> vector<128x128xf32>
    %7 = arith.addf %3, %6 : vector<128x128xf32>
    %c0_6 = arith.constant 0 : index
    %c0_7 = arith.constant 0 : index
    %8 = vector.load %arg7[%c0_6, %c0_7] : memref<128x128xf32, #tpu.memory_space<vmem>>, vector<128x128xf32>
    tpu.vector_store %arg7[%c0_6, %c0_7], %7 {strides = array<i32>} : memref<128x128xf32, #tpu.memory_space<vmem>>, vector<128x128xf32>,
    %c0_i32_8 = arith.constant 0 : i32
    %9 = arith.cmpi eq, %arg2, %c0_i32_8 : i32
    %10 = arith.extui %9 : i1 to i32
    %c0_i32_9 = arith.constant 0 : i32
    %11 = arith.cmpi ne, %10, %c0_i32_9 : i32
    scf.if %11 {
      %c0_10 = arith.constant 0 : index
      %c0_11 = arith.constant 0 : index
      %12 = vector.load %arg7[%c0_10, %c0_11] : memref<128x128xf32, #tpu.memory_space<vmem>>, vector<128x128xf32>
      %c0_12 = arith.constant 0 : index
      %c0_13 = arith.constant 0 : index
      %13 = vector.load %arg5[%c0_12, %c0_13] : memref<1x128xf32, #tpu.memory_space<vmem>>, vector<1x128xf32>
      %14 = vector.broadcast %13 : vector<1x128xf32> to vector<128x128xf32>
      %15 = arith.addf %12, %14 : vector<128x128xf32>
      %c0_14 = arith.constant 0 : index
      %c0_15 = arith.constant 0 : index
      %16 = vector.load %arg6[%c0_14, %c0_15] : memref<128x128xf32, #tpu.memory_space<vmem>>, vector<128x128xf32>
      tpu.vector_store %arg6[%c0_14, %c0_15], %15 {strides = array<i32>} : memref<128x128xf32, #tpu.memory_space<vmem>>, vector<128x128xf32>,
    } else {
    }
    return
  }
  func.func @transform_0(%arg0: i32, %arg1: i32, %arg2: i32) -> (i32, i32) {
    %c0_i32 = arith.constant 0 : i32
    return %arg0, %arg2 : i32, i32
  }
  func.func @transform_1(%arg0: i32, %arg1: i32, %arg2: i32) -> (i32, i32) {
    %c0_i32 = arith.constant 0 : i32
    return %arg2, %arg1 : i32, i32
  }
  func.func @transform_2(%arg0: i32, %arg1: i32, %arg2: i32) -> (i32, i32) {
    %c0_i32 = arith.constant 0 : i32
    %c0_i32_0 = arith.constant 0 : i32
    return %c0_i32, %arg1 : i32, i32
  }
  func.func @transform_3(%arg0: i32, %arg1: i32, %arg2: i32) -> (i32, i32) {
    %c0_i32 = arith.constant 0 : i32
    return %arg0, %arg1 : i32, i32
  }
}

</mosaic_0001>

<bundles_post_ra>
// kernel: lift_forward.8
= control target key start
LH: loop header
LB: loop body
LE: loop exit
PB: predicated region body
PF: predicated region fallthrough
CT: control target
= control target key end

     0   :  { %s1202_s15 = smov 0   ;;  %s1204_s16 = smov 0   ;;  %s1390_s0 = inlined_call_operand.vmem [shape: bf16[2048,27], index: 0, kind: input, shape index: {}]   ;;  %s1391_s1 = inlined_call_operand.vmem [shape: bf16[27,128], index: 1, kind: input, shape index: {}]   ;;  %s1392_s2 = inlined_call_operand.vmem [shape: f32[1,128], index: 2, kind: input, shape index: {}]   ;;  %s1393_s3 = inlined_call_operand.vmem [shape: f32[1,128], index: 3, kind: input, shape index: {}]   ;;  %s1394_s4 = inlined_call_operand.vmem [shape: f32[2048,128], index: 4, kind: output, shape index: {}]  }
   0x1   :  { %s1206_s17 = smov 0  }
   0x2 LB: > { %s33_s18 = sadd.s32 1, %s1170_s16  ;;  %p1006_p0 = scmp.ge.s32.totalorder %s1174_s17, 1  ;;  %s1174_s17 = sphi %s1206_s17, %s14_s17   ;;  %s1170_s16 = sphi %s1204_s16, %s1396_s16   ;;  %s1166_s15 = sphi %s1202_s15, %s1395_s15  }
   0x3   : > { %p35_p1 = scmp.ge.s32.totalorder %s33_s18, 8  ;;  %p221_p2 = scmp.lt.s32.totalorder %s1174_s17, 9 }
   0x5   : > { %s1398_s18 = smov (%p35_p1, %s33_s18), 0  ;;  %p222_p3 = pnand %p1006_p0, %p221_p2 }
   0x6   : > { %s1007_s23 = sshll.u32 (!%p222_p3), %s1166_s15, 5 }
   0x7   : > { %225 = sbr.rel (%p222_p3) target bundleno = 222 (0xde), region = 36  ;;  %p268_p4 = scmp.lt.s32.totalorder (!%p222_p3), %s1007_s23, 255 }
   0xc   : > { %v1081_v0 = vld [vmem:[%s1391_s1 + $0x8] sm:$0xf]  ;;  %v1118_v1 = vld [vmem:[%s1391_s1 + $0x8] sm:$0x30]  ;;  %vm545_vm0 = vcmask 1044480   ;;  %vm546_vm1 = vcmask 1045504  }
   0xd   : > { %v1082_v2 = vor.u32 %v1118_v1, %v1081_v0  ;;  %v1176_v3 = vmov 65535   ;;  %s1400_s23 = smov (!%p268_p4, %s1007_s23), 255  ;;  %v1117_v7 = vld [vmem:[%s1391_s1] sm:$0xff]  ;;  %vm496_vm2 = vcmask 220160  }
   0xe   : > { %v547_v4 = vsel %vm545_vm0, 4294967295, %v1176_v3  ;;  %s1008_s26 = sshll.u32 %s1400_s23, 2  ;;  %v1272_v24 = vld [vmem:[%s1392_s2] ss:$0 sm:$0xff]  ;;  %s1010_s8 = sshll.u32 %s1400_s23, 3 }
   0xf   : > { %v548_v5 = vsel %vm546_vm1, %v547_v4, 0  ;;  %s1235_s29 = scalar_lea.vmem %s1390_s0, %s1008_s26  ;;  %v1277_v25 = vld [vmem:[%s1393_s3] ss:$0 sm:$0xff]  ;;  %s1287_s11 = scalar_lea.vmem %s1394_s4, %s1010_s8 }
  0x10   : > { %v550_v6 = vand.u32 %v1082_v2, %v548_v5  ;;  %v1101_v8 = vld [vmem:[%s1235_s29] sm:$0xff]  ;;  %v1102_v12 = vld [vmem:[%s1235_s29 + $0x8] sm:$0xff]  ;;  %v1103_v16 = vld [vmem:[%s1235_s29 + $0x10] sm:$0xff] }
  0x11   : > { %v1105_v9 = vld [vmem:[%s1235_s29 + $0x20] sm:$0xff]  ;;  %v1106_v13 = vld [vmem:[%s1235_s29 + $0x28] sm:$0xff]  ;;  %v1107_v17 = vld [vmem:[%s1235_s29 + $0x30] sm:$0xff] }
  0x12   : > { %558 = vmatpush.bf16.msra.mxu0 %v550_v6  ;;  %1119 = vmatpush.bf16.msra.mxu1 %v550_v6  ;;  %v1109_v10 = vld [vmem:[%s1235_s29 + $0x40] sm:$0xff]  ;;  %v1110_v14 = vld [vmem:[%s1235_s29 + $0x48] sm:$0xff]  ;;  %v1111_v18 = vld [vmem:[%s1235_s29 + $0x50] sm:$0xff] }
  0x13   : > { %1120 = vmatpush.bf16.msra.mxu2 %v550_v6  ;;  %1121 = vmatpush.bf16.msra.mxu3 %v550_v6  ;;  %v1113_v11 = vld [vmem:[%s1235_s29 + $0x60] sm:$0xff]  ;;  %v1114_v15 = vld [vmem:[%s1235_s29 + $0x68] sm:$0xff]  ;;  %v1115_v19 = vld [vmem:[%s1235_s29 + $0x70] sm:$0xff] }
  0x14   : > { %v1104_v20 = vld [vmem:[%s1235_s29 + $0x18] sm:$0xff] }
  0x15   : > { %v1108_v21 = vld [vmem:[%s1235_s29 + $0x38] sm:$0xff] }
  0x16   : > { %559 = vmatpush.bf16.msra.mxu0 %v1117_v7  ;;  %1122 = vmatpush.bf16.msra.mxu1 %v1117_v7  ;;  %v1112_v22 = vld [vmem:[%s1235_s29 + $0x58] sm:$0xff] }
  0x17   : > { %1123 = vmatpush.bf16.msra.mxu2 %v1117_v7  ;;  %1124 = vmatpush.bf16.msra.mxu3 %v1117_v7  ;;  %v1116_v23 = vld [vmem:[%s1235_s29 + $0x78] sm:$0xff] }
  0x19   : > { %1083 = vmatmul.msk.bf16.vlgmr.msra.gmra.mxu0 %vm496_vm2, %v1101_v8  ;;  %1087 = vmatmul.msk.bf16.vlgmr.msra.gmra.mxu1 %vm496_vm2, %v1105_v9 }
  0x1a   : > { %1091 = vmatmul.msk.bf16.vlgmr.msra.gmra.mxu2 %vm496_vm2, %v1109_v10  ;;  %1095 = vmatmul.msk.bf16.vlgmr.msra.gmra.mxu3 %vm496_vm2, %v1113_v11 }
  0x29   : > { %1084 = vmatmul.msk.bf16.gmra.mxu0 %vm496_vm2, %v1102_v12  ;;  %1088 = vmatmul.msk.bf16.gmra.mxu1 %vm496_vm2, %v1106_v13 }
  0x2a   : > { %1092 = vmatmul.msk.bf16.gmra.mxu2 %vm496_vm2, %v1110_v14  ;;  %1096 = vmatmul.msk.bf16.gmra.mxu3 %vm496_vm2, %v1114_v15 }
  0x39   : > { %1085 = vmatmul.msk.bf16.gmra.mxu0 %vm496_vm2, %v1103_v16  ;;  %1089 = vmatmul.msk.bf16.gmra.mxu1 %vm496_vm2, %v1107_v17 }
  0x3a   : > { %1093 = vmatmul.msk.bf16.gmra.mxu2 %vm496_vm2, %v1111_v18  ;;  %1097 = vmatmul.msk.bf16.gmra.mxu3 %vm496_vm2, %v1115_v19 }
  0x49   : > { %1086 = vmatmul.msk.bf16.gmra.mxu0 %vm496_vm2, %v1104_v20  ;;  %1090 = vmatmul.msk.bf16.gmra.mxu1 %vm496_vm2, %v1108_v21 }
  0x4a   : > { %1094 = vmatmul.msk.bf16.gmra.mxu2 %vm496_vm2, %v1112_v22  ;;  %1098 = vmatmul.msk.bf16.gmra.mxu3 %vm496_vm2, %v1116_v23 }
  0x96   : > { %v561_v26 = vpop.f32.mrf.mxu0  ;;  %v581_v27 = vpop.f32.mrf.mxu1 }
  0x97   : > { %v744_v28 = vmul.f32 %v1272_v24, %v561_v26  ;;  %v752_v29 = vmul.f32 %v1272_v24, %v581_v27 }
  0x99   : > { %v780_v30 = vadd.f32 %v1277_v25, %v744_v28  ;;  %v788_v31 = vadd.f32 %v1277_v25, %v752_v29 }
  0x9b   : > { %v812_v32 = vmax.f32 %v780_v30, 0.0  ;;  %v820_v33 = vmax.f32 %v788_v31, 0.0 }
  0x9d   : > { %844 = vst [vmem:[%s1287_s11] sm:$0xff] %v812_v32  ;;  %v601_v34 = vpop.f32.mrf.mxu2  ;;  %v621_v35 = vpop.f32.mrf.mxu3 }
  0x9e   : > { %852 = vst [vmem:[%s1287_s11 + $0x40] sm:$0xff] %v820_v33  ;;  %v760_v36 = vmul.f32 %v1272_v24, %v601_v34  ;;  %v768_v37 = vmul.f32 %v1272_v24, %v621_v35  ;;  %v563_v38 = vpop.f32.mrf.mxu0  ;;  %v583_v39 = vpop.f32.mrf.mxu1 }
  0x9f   : > { %v745_v40 = vmul.f32 %v1272_v24, %v563_v38  ;;  %v753_v41 = vmul.f32 %v1272_v24, %v583_v39 }
  0xa0   : > { %v796_v42 = vadd.f32 %v1277_v25, %v760_v36  ;;  %v804_v43 = vadd.f32 %v1277_v25, %v768_v37 }
  0xa1   : > { %v781_v44 = vadd.f32 %v1277_v25, %v745_v40  ;;  %v789_v45 = vadd.f32 %v1277_v25, %v753_v41 }
  0xa2   : > { %v828_v46 = vmax.f32 %v796_v42, 0.0  ;;  %v836_v47 = vmax.f32 %v804_v43, 0.0 }
  0xa3   : > { %v813_v48 = vmax.f32 %v781_v44, 0.0  ;;  %v821_v49 = vmax.f32 %v789_v45, 0.0 }
  0xa4   : > { %860 = vst [vmem:[%s1287_s11 + $0x80] sm:$0xff] %v828_v46 }
  0xa5   : > { %868 = vst [vmem:[%s1287_s11 + $0xc0] sm:$0xff] %v836_v47  ;;  %v603_v50 = vpop.f32.mrf.mxu2  ;;  %v623_v51 = vpop.f32.mrf.mxu3 }
  0xa6   : > { %845 = vst [vmem:[%s1287_s11 + $0x8] sm:$0xff] %v813_v48  ;;  %v761_v52 = vmul.f32 %v1272_v24, %v603_v50  ;;  %v769_v53 = vmul.f32 %v1272_v24, %v623_v51  ;;  %v566_v54 = vpop.f32.mrf.mxu0  ;;  %v586_v55 = vpop.f32.mrf.mxu1 }
  0xa7   : > { %853 = vst [vmem:[%s1287_s11 + $0x48] sm:$0xff] %v821_v49  ;;  %v746_v56 = vmul.f32 %v1272_v24, %v566_v54  ;;  %v754_v57 = vmul.f32 %v1272_v24, %v586_v55 }
  0xa8   : > { %v797_v58 = vadd.f32 %v1277_v25, %v761_v52  ;;  %v805_v59 = vadd.f32 %v1277_v25, %v769_v53 }
  0xa9   : > { %v782_v60 = vadd.f32 %v1277_v25, %v746_v56  ;;  %v790_v61 = vadd.f32 %v1277_v25, %v754_v57 }
  0xaa   : > { %v829_v62 = vmax.f32 %v797_v58, 0.0  ;;  %v837_v63 = vmax.f32 %v805_v59, 0.0 }
  0xab   : > { %v814_v0 = vmax.f32 %v782_v60, 0.0  ;;  %v822_v1 = vmax.f32 %v790_v61, 0.0 }
  0xac   : > { %861 = vst [vmem:[%s1287_s11 + $0x88] sm:$0xff] %v829_v62 }
  0xad   : > { %869 = vst [vmem:[%s1287_s11 + $0xc8] sm:$0xff] %v837_v63  ;;  %v606_v2 = vpop.f32.mrf.mxu2  ;;  %v626_v3 = vpop.f32.mrf.mxu3 }
  0xae   : > { %846 = vst [vmem:[%s1287_s11 + $0x10] sm:$0xff] %v814_v0  ;;  %v762_v4 = vmul.f32 %v1272_v24, %v606_v2  ;;  %v770_v5 = vmul.f32 %v1272_v24, %v626_v3  ;;  %v568_v6 = vpop.f32.mrf.mxu0  ;;  %v588_v7 = vpop.f32.mrf.mxu1 }
  0xaf   : > { %854 = vst [vmem:[%s1287_s11 + $0x50] sm:$0xff] %v822_v1  ;;  %v747_v8 = vmul.f32 %v1272_v24, %v568_v6  ;;  %v755_v9 = vmul.f32 %v1272_v24, %v588_v7 }
  0xb0   : > { %v798_v10 = vadd.f32 %v1277_v25, %v762_v4  ;;  %v806_v11 = vadd.f32 %v1277_v25, %v770_v5 }
  0xb1   : > { %v783_v12 = vadd.f32 %v1277_v25, %v747_v8  ;;  %v791_v13 = vadd.f32 %v1277_v25, %v755_v9 }
  0xb2   : > { %v830_v14 = vmax.f32 %v798_v10, 0.0  ;;  %v838_v15 = vmax.f32 %v806_v11, 0.0 }
  0xb3   : > { %v815_v16 = vmax.f32 %v783_v12, 0.0  ;;  %v823_v17 = vmax.f32 %v791_v13, 0.0 }
  0xb4   : > { %862 = vst [vmem:[%s1287_s11 + $0x90] sm:$0xff] %v830_v14 }
  0xb5   : > { %870 = vst [vmem:[%s1287_s11 + $0xd0] sm:$0xff] %v838_v15  ;;  %v608_v18 = vpop.f32.mrf.mxu2  ;;  %v628_v19 = vpop.f32.mrf.mxu3 }
  0xb6   : > { %847 = vst [vmem:[%s1287_s11 + $0x18] sm:$0xff] %v815_v16  ;;  %v763_v20 = vmul.f32 %v1272_v24, %v608_v18  ;;  %v771_v21 = vmul.f32 %v1272_v24, %v628_v19  ;;  %v571_v22 = vpop.f32.mrf.mxu0  ;;  %v591_v23 = vpop.f32.mrf.mxu1 }
  0xb7   : > { %855 = vst [vmem:[%s1287_s11 + $0x58] sm:$0xff] %v823_v17  ;;  %v748_v26 = vmul.f32 %v1272_v24, %v571_v22  ;;  %v756_v27 = vmul.f32 %v1272_v24, %v591_v23 }
  0xb8   : > { %v799_v28 = vadd.f32 %v1277_v25, %v763_v20  ;;  %v807_v29 = vadd.f32 %v1277_v25, %v771_v21 }
  0xb9   : > { %v784_v30 = vadd.f32 %v1277_v25, %v748_v26  ;;  %v792_v31 = vadd.f32 %v1277_v25, %v756_v27 }
  0xba   : > { %v831_v32 = vmax.f32 %v799_v28, 0.0  ;;  %v839_v33 = vmax.f32 %v807_v29, 0.0 }
  0xbb   : > { %v816_v34 = vmax.f32 %v784_v30, 0.0  ;;  %v824_v35 = vmax.f32 %v792_v31, 0.0 }
  0xbc   : > { %863 = vst [vmem:[%s1287_s11 + $0x98] sm:$0xff] %v831_v32 }
  0xbd   : > { %871 = vst [vmem:[%s1287_s11 + $0xd8] sm:$0xff] %v839_v33  ;;  %v611_v36 = vpop.f32.mrf.mxu2  ;;  %v631_v37 = vpop.f32.mrf.mxu3 }
  0xbe   : > { %848 = vst [vmem:[%s1287_s11 + $0x20] sm:$0xff] %v816_v34  ;;  %v764_v38 = vmul.f32 %v1272_v24, %v611_v36  ;;  %v772_v39 = vmul.f32 %v1272_v24, %v631_v37  ;;  %v573_v40 = vpop.f32.mrf.mxu0  ;;  %v593_v41 = vpop.f32.mrf.mxu1 }
  0xbf   : > { %856 = vst [vmem:[%s1287_s11 + $0x60] sm:$0xff] %v824_v35  ;;  %v749_v42 = vmul.f32 %v1272_v24, %v573_v40  ;;  %v757_v43 = vmul.f32 %v1272_v24, %v593_v41 }
  0xc0   : > { %v800_v44 = vadd.f32 %v1277_v25, %v764_v38  ;;  %v808_v45 = vadd.f32 %v1277_v25, %v772_v39 }
  0xc1   : > { %v785_v46 = vadd.f32 %v1277_v25, %v749_v42  ;;  %v793_v47 = vadd.f32 %v1277_v25, %v757_v43 }
  0xc2   : > { %v832_v48 = vmax.f32 %v800_v44, 0.0  ;;  %v840_v49 = vmax.f32 %v808_v45, 0.0 }
  0xc3   : > { %v817_v50 = vmax.f32 %v785_v46, 0.0  ;;  %v825_v51 = vmax.f32 %v793_v47, 0.0 }
  0xc4   : > { %864 = vst [vmem:[%s1287_s11 + $0xa0] sm:$0xff] %v832_v48 }
  0xc5   : > { %872 = vst [vmem:[%s1287_s11 + $0xe0] sm:$0xff] %v840_v49  ;;  %v613_v52 = vpop.f32.mrf.mxu2  ;;  %v633_v53 = vpop.f32.mrf.mxu3 }
  0xc6   : > { %849 = vst [vmem:[%s1287_s11 + $0x28] sm:$0xff] %v817_v50  ;;  %v765_v54 = vmul.f32 %v1272_v24, %v613_v52  ;;  %v773_v55 = vmul.f32 %v1272_v24, %v633_v53  ;;  %v576_v56 = vpop.f32.mrf.mxu0  ;;  %v596_v57 = vpop.f32.mrf.mxu1 }
  0xc7   : > { %857 = vst [vmem:[%s1287_s11 + $0x68] sm:$0xff] %v825_v51  ;;  %v750_v58 = vmul.f32 %v1272_v24, %v576_v56  ;;  %v758_v59 = vmul.f32 %v1272_v24, %v596_v57 }
  0xc8   : > { %v801_v60 = vadd.f32 %v1277_v25, %v765_v54  ;;  %v809_v61 = vadd.f32 %v1277_v25, %v773_v55 }
  0xc9   : > { %v786_v62 = vadd.f32 %v1277_v25, %v750_v58  ;;  %v794_v63 = vadd.f32 %v1277_v25, %v758_v59 }
  0xca   : > { %v833_v0 = vmax.f32 %v801_v60, 0.0  ;;  %v841_v1 = vmax.f32 %v809_v61, 0.0 }
  0xcb   : > { %v818_v2 = vmax.f32 %v786_v62, 0.0  ;;  %v826_v3 = vmax.f32 %v794_v63, 0.0 }
  0xcc   : > { %865 = vst [vmem:[%s1287_s11 + $0xa8] sm:$0xff] %v833_v0 }
  0xcd   : > { %873 = vst [vmem:[%s1287_s11 + $0xe8] sm:$0xff] %v841_v1  ;;  %v616_v4 = vpop.f32.mrf.mxu2  ;;  %v636_v5 = vpop.f32.mrf.mxu3 }
  0xce   : > { %850 = vst [vmem:[%s1287_s11 + $0x30] sm:$0xff] %v818_v2  ;;  %v766_v6 = vmul.f32 %v1272_v24, %v616_v4  ;;  %v774_v7 = vmul.f32 %v1272_v24, %v636_v5  ;;  %v578_v8 = vpop.f32.mrf.mxu0  ;;  %v598_v9 = vpop.f32.mrf.mxu1 }
  0xcf   : > { %858 = vst [vmem:[%s1287_s11 + $0x70] sm:$0xff] %v826_v3  ;;  %v751_v10 = vmul.f32 %v1272_v24, %v578_v8  ;;  %v759_v11 = vmul.f32 %v1272_v24, %v598_v9 }
  0xd0   : > { %v802_v12 = vadd.f32 %v1277_v25, %v766_v6  ;;  %v810_v13 = vadd.f32 %v1277_v25, %v774_v7 }
  0xd1   : > { %v787_v14 = vadd.f32 %v1277_v25, %v751_v10  ;;  %v795_v15 = vadd.f32 %v1277_v25, %v759_v11 }
  0xd2   : > { %v834_v16 = vmax.f32 %v802_v12, 0.0  ;;  %v842_v17 = vmax.f32 %v810_v13, 0.0 }
  0xd3   : > { %v819_v18 = vmax.f32 %v787_v14, 0.0  ;;  %v827_v19 = vmax.f32 %v795_v15, 0.0 }
  0xd4   : > { %866 = vst [vmem:[%s1287_s11 + $0xb0] sm:$0xff] %v834_v16 }
  0xd5   : > { %874 = vst [vmem:[%s1287_s11 + $0xf0] sm:$0xff] %v842_v17  ;;  %v618_v20 = vpop.f32.mrf.mxu2  ;;  %v638_v21 = vpop.f32.mrf.mxu3 }
  0xd6   : > { %851 = vst [vmem:[%s1287_s11 + $0x38] sm:$0xff] %v819_v18  ;;  %v767_v22 = vmul.f32 %v1272_v24, %v618_v20  ;;  %v775_v23 = vmul.f32 %v1272_v24, %v638_v21 }
  0xd7   : > { %859 = vst [vmem:[%s1287_s11 + $0x78] sm:$0xff] %v827_v19 }
  0xd8   : > { %v803_v26 = vadd.f32 %v1277_v25, %v767_v22  ;;  %v811_v27 = vadd.f32 %v1277_v25, %v775_v23 }
  0xda   : > { %v835_v28 = vmax.f32 %v803_v26, 0.0  ;;  %v843_v29 = vmax.f32 %v811_v27, 0.0 }
  0xdc   : > { %867 = vst [vmem:[%s1287_s11 + $0xb8] sm:$0xff] %v835_v28 }
  0xdd   : > { %875 = vst [vmem:[%s1287_s11 + $0xf8] sm:$0xff] %v843_v29 }
  0xde PF: > { %s14_s17 = sadd.s32 1, %s1174_s17   ;;  %s1395_s15 = smov %s1170_s16 }
  0xdf   : > { %p11_p5 = scmp.ge.s32.totalorder %s14_s17, 10   ;;  %s1396_s16 = smov %s1398_s18 }
  0xe1   :  { %13 = sbr.rel (!%p11_p5) target bundleno = 2 (0x2), region = 83 }

// kernel: lift_forward.10
= control target key start
LH: loop header
LB: loop body
LE: loop exit
PB: predicated region body
PF: predicated region fallthrough
CT: control target
= control target key end

     0   :  { %s114_s0 = inlined_call_operand.vmem [shape: f32[4,32,128], index: 0, kind: input, shape index: {}]   ;;  %s115_s1 = inlined_call_operand.vmem [shape: f32[32,128], index: 1, kind: output, shape index: {}]  }
   0x1   :  { %v8_v0 = vld [vmem:[%s114_s0] sm:$0xff]  ;;  %v9_v4 = vld [vmem:[%s114_s0 + $0x8] sm:$0xff]  ;;  %v10_v9 = vld [vmem:[%s114_s0 + $0x10] sm:$0xff] }
   0x2   :  { %v12_v1 = vld [vmem:[%s114_s0 + $0x20] sm:$0xff]  ;;  %v13_v5 = vld [vmem:[%s114_s0 + $0x28] sm:$0xff]  ;;  %v14_v12 = vld [vmem:[%s114_s0 + $0x30] sm:$0xff] }
   0x3   :  { %v16_v2 = vld [vmem:[%s114_s0 + $0x40] sm:$0xff]  ;;  %v24_v3 = vmax.f32 %v8_v0, %v12_v1  ;;  %v17_v7 = vld [vmem:[%s114_s0 + $0x48] sm:$0xff]  ;;  %v27_v8 = vmax.f32 %v9_v4, %v13_v5  ;;  %v18_v13 = vld [vmem:[%s114_s0 + $0x50] sm:$0xff]  ;;  %v30_v15 = vmax.f32 %v10_v9, %v14_v12 }
   0x4   :  { %v20_v6 = vld [vmem:[%s114_s0 + $0x60] sm:$0xff]  ;;  %v21_v11 = vld [vmem:[%s114_s0 + $0x68] sm:$0xff]  ;;  %v11_v16 = vld [vmem:[%s114_s0 + $0x18] sm:$0xff] }
   0x5   :  { %v25_v10 = vmax.f32 %v24_v3, %v16_v2  ;;  %v28_v14 = vmax.f32 %v27_v8, %v17_v7  ;;  %v15_v17 = vld [vmem:[%s114_s0 + $0x38] sm:$0xff]  ;;  %v22_v20 = vld [vmem:[%s114_s0 + $0x70] sm:$0xff]  ;;  %v31_v23 = vmax.f32 %v30_v15, %v18_v13 }
   0x6   :  { %v19_v18 = vld [vmem:[%s114_s0 + $0x58] sm:$0xff]  ;;  %v33_v21 = vmax.f32 %v11_v16, %v15_v17 }
   0x7   :  { %v26_v19 = vmax.f32 %v25_v10, %v20_v6  ;;  %v29_v22 = vmax.f32 %v28_v14, %v21_v11  ;;  %v23_v24 = vld [vmem:[%s114_s0 + $0x78] sm:$0xff]  ;;  %v32_v26 = vmax.f32 %v31_v23, %v22_v20 }
   0x8   :  { %v34_v25 = vmax.f32 %v33_v21, %v19_v18 }
   0x9   :  { %36 = vst [vmem:[%s115_s1] sm:$0xff] %v26_v19 }
   0xa   :  { %37 = vst [vmem:[%s115_s1 + $0x8] sm:$0xff] %v29_v22  ;;  %v35_v27 = vmax.f32 %v34_v25, %v23_v24 }
   0xb   :  { %38 = vst [vmem:[%s115_s1 + $0x10] sm:$0xff] %v32_v26 }
   0xc   :  { %39 = vst [vmem:[%s115_s1 + $0x18] sm:$0xff] %v35_v27 }

// kernel: lift_forward.9
= control target key start
LH: loop header
LB: loop body
LE: loop exit
PB: predicated region body
PF: predicated region fallthrough
CT: control target
= control target key end

     0   :  { %s1956_s15 = smov 0   ;;  %s1958_s16 = smov 0   ;;  %s2317_s0 = inlined_call_operand.vmem [shape: bf16[512,288], index: 0, kind: input, shape index: {}]   ;;  %s2318_s1 = inlined_call_operand.vmem [shape: bf16[288,128], index: 1, kind: input, shape index: {}]   ;;  %s2319_s2 = inlined_call_operand.vmem [shape: f32[1,128], index: 2, kind: input, shape index: {}]   ;;  %s2320_s3 = inlined_call_operand.vmem [shape: f32[1,128], index: 3, kind: input, shape index: {}]   ;;  %s2321_s4 = inlined_call_operand.vmem [shape: f32[512,128], index: 4, kind: output, shape index: {}]  }
   0x1   :  { %s1960_s17 = smov 0  }
   0x2 LB: > { %s33_s18 = sadd.s32 1, %s1925_s16  ;;  %p1509_p0 = scmp.ge.s32.totalorder %s1929_s17, 1  ;;  %s1929_s17 = sphi %s1960_s17, %s14_s17   ;;  %s1925_s16 = sphi %s1958_s16, %s2323_s16   ;;  %s1921_s15 = sphi %s1956_s15, %s2322_s15  }
   0x3   : > { %p35_p1 = scmp.ge.s32.totalorder %s33_s18, 2  ;;  %p224_p2 = scmp.lt.s32.totalorder %s1929_s17, 3 }
   0x5   : > { %s2325_s18 = smov (%p35_p1, %s33_s18), 0  ;;  %p225_p3 = pnand %p1509_p0, %p224_p2 }
   0x6   : > { %s1510_s25 = sshll.u32 (!%p225_p3), %s1921_s15, 5 }
   0x7   : > { %228 = sbr.rel (%p225_p3) target bundleno = 379 (0x17b), region = 36  ;;  %p274_p4 = scmp.lt.s32.totalorder (!%p225_p3), %s1510_s25, 63 }
   0xc   : > { %v1851_v0 = vld [vmem:[%s2318_s1 + $0x38] sm:$0xff]  ;;  %v1985_v2 = vld [vmem:[%s2318_s1 + $0x88] sm:$0xff]  ;;  %v1850_v3 = vld [vmem:[%s2318_s1 + $0x30] sm:$0xff]  ;;  %s2327_s25 = smov (!%p274_p4, %s1510_s25), 63  ;;  %vm825_vm0 = vcmask 261120  }
   0xd   : > { %v1980_v1 = vld [vmem:[%s2318_s1 + $0x78] sm:$0xff]  ;;  %874 = vmatpush.bf16.msra.mxu0 %v1851_v0  ;;  %1862 = vmatpush.bf16.msra.mxu3 %v1851_v0  ;;  %v1858_v4 = vld [vmem:[%s2318_s1 + $0x70] sm:$0xff]  ;;  %v1998_v5 = vld [vmem:[%s2318_s1 + $0x80] sm:$0xff]  ;;  %s1880_s6 = smul.u32 12, %s2327_s25  ;;  %s1513_s20 = sshll.u32 %s2327_s25, 3 }
   0xe   : > { %963 = vmatpush.bf16.msra.mxu1 %v1980_v1  ;;  %1058 = vmatpush.bf16.msra.mxu2 %v1985_v2  ;;  %v1849_v6 = vld [vmem:[%s2318_s1 + $0x28] sm:$0xff]  ;;  %v1848_v11 = vld [vmem:[%s2318_s1 + $0x20] sm:$0xff]  ;;  %v1847_v13 = vld [vmem:[%s2318_s1 + $0x18] sm:$0xff]  ;;  %s2153_s23 = scalar_lea.vmem %s2321_s4, %s1513_s20 }
   0xf   : > { %v1857_v7 = vld [vmem:[%s2318_s1 + $0x68] sm:$0xff]  ;;  %s2013_s13 = scalar_lea.vmem %s2317_s0, %s1880_s6  ;;  %v1856_v12 = vld [vmem:[%s2318_s1 + $0x60] sm:$0xff]  ;;  %v1855_v14 = vld [vmem:[%s2318_s1 + $0x58] sm:$0xff] }
  0x10   : > { %v1524_v8 = vld [vmem:[%s2013_s13 + $0x8] sm:$0xf]  ;;  %v1798_v9 = vld [vmem:[%s2013_s13 + $0x10] sm:$0xf0]  ;;  %v1536_v17 = vld [vmem:[%s2013_s13 + $0x20] sm:$0xf] }
  0x11   : > { %875 = vmatpush.bf16.msra.mxu0 %v1850_v3  ;;  %1863 = vmatpush.bf16.msra.mxu3 %v1850_v3  ;;  %v1525_v10 = vor.u32 %v1798_v9, %v1524_v8  ;;  %v1846_v15 = vld [vmem:[%s2318_s1 + $0x10] sm:$0xff]  ;;  %v1801_v18 = vld [vmem:[%s2013_s13 + $0x28] sm:$0xf0]  ;;  %v1844_v22 = vld [vmem:[%s2318_s1] sm:$0xff] }
  0x12   : > { %964 = vmatpush.bf16.msra.mxu1 %v1858_v4  ;;  %1059 = vmatpush.bf16.msra.mxu2 %v1998_v5  ;;  %v1854_v16 = vld [vmem:[%s2318_s1 + $0x50] sm:$0xff]  ;;  %v1845_v19 = vld [vmem:[%s2318_s1 + $0x8] sm:$0xff]  ;;  %v1537_v21 = vor.u32 %v1801_v18, %v1536_v17  ;;  %v1516_v23 = vld [vmem:[%s2013_s13] sm:$0xf] }
  0x13   : > { %v1853_v20 = vld [vmem:[%s2318_s1 + $0x48] sm:$0xff]  ;;  %v1660_v25 = vld [vmem:[%s2013_s13 + $0x120] sm:$0xf]  ;;  %v1796_v28 = vld [vmem:[%s2013_s13 + $0x4] sm:$0xf] }
  0x14   : > { %v1797_v24 = vld [vmem:[%s2013_s13 + $0x8] sm:$0xf0]  ;;  %v1852_v27 = vld [vmem:[%s2318_s1 + $0x40] sm:$0xff]  ;;  %v1518_v29 = vld [vmem:[%s2013_s13 + $0xc] sm:$0xf0] }
  0x15   : > { %876 = vmatpush.bf16.msra.mxu0 %v1849_v6  ;;  %1864 = vmatpush.bf16.msra.mxu3 %v1849_v6  ;;  %v1833_v26 = vld [vmem:[%s2013_s13 + $0x128] sm:$0xf0]  ;;  %v1517_v30 = vor.u32 %v1797_v24, %v1516_v23  ;;  %v1521_v32 = vor.u32 %v1796_v28, %v1518_v29  ;;  %v1548_v33 = vld [vmem:[%s2013_s13 + $0x38] sm:$0xf]  ;;  %v1804_v34 = vld [vmem:[%s2013_s13 + $0x40] sm:$0xf0] }
  0x16   : > { %965 = vmatpush.bf16.msra.mxu1 %v1857_v7  ;;  %1778 = vmatmul.msk.bf16.vlgmr.msra.gmra.mxu2 %vm825_vm0, %v1525_v10  ;;  %v1661_v31 = vor.u32 %v1833_v26, %v1660_v25  ;;  %v1549_v35 = vor.u32 %v1804_v34, %v1548_v33  ;;  %v1528_v36 = vld [vmem:[%s2013_s13 + $0x18] sm:$0xf]  ;;  %v1800_v37 = vld [vmem:[%s2013_s13 + $0x20] sm:$0xf0]  ;;  %v1799_v40 = vld [vmem:[%s2013_s13 + $0x1c] sm:$0xf] }
  0x17   : > { %v1672_v38 = vld [vmem:[%s2013_s13 + $0x138] sm:$0xf]  ;;  %v1836_v39 = vld [vmem:[%s2013_s13 + $0x140] sm:$0xf0]  ;;  %v1530_v41 = vld [vmem:[%s2013_s13 + $0x24] sm:$0xf0]  ;;  %v1529_v42 = vor.u32 %v1800_v37, %v1528_v36 }
  0x18   : > { %v1673_v43 = vor.u32 %v1836_v39, %v1672_v38  ;;  %v1533_v44 = vor.u32 %v1799_v40, %v1530_v41  ;;  %v1560_v45 = vld [vmem:[%s2013_s13 + $0x50] sm:$0xf]  ;;  %v1807_v46 = vld [vmem:[%s2013_s13 + $0x58] sm:$0xf0]  ;;  %v1802_v52 = vld [vmem:[%s2013_s13 + $0x34] sm:$0xf] }
  0x19   : > { %877 = vmatpush.bf16.msra.mxu0 %v1848_v11  ;;  %1865 = vmatpush.bf16.msra.mxu3 %v1848_v11  ;;  %v1561_v47 = vor.u32 %v1807_v46, %v1560_v45  ;;  %v1540_v48 = vld [vmem:[%s2013_s13 + $0x30] sm:$0xf]  ;;  %v1803_v49 = vld [vmem:[%s2013_s13 + $0x38] sm:$0xf0]  ;;  %v1542_v53 = vld [vmem:[%s2013_s13 + $0x3c] sm:$0xf0] }
  0x1a   : > { %966 = vmatpush.bf16.msra.mxu1 %v1856_v12  ;;  %v1684_v50 = vld [vmem:[%s2013_s13 + $0x150] sm:$0xf]  ;;  %v1839_v51 = vld [vmem:[%s2013_s13 + $0x158] sm:$0xf0]  ;;  %v1541_v54 = vor.u32 %v1803_v49, %v1540_v48  ;;  %v1545_v56 = vor.u32 %v1802_v52, %v1542_v53  ;;  %v1572_v57 = vld [vmem:[%s2013_s13 + $0x68] sm:$0xf] }
  0x1b   : > { %v1685_v55 = vor.u32 %v1839_v51, %v1684_v50  ;;  %v1810_v58 = vld [vmem:[%s2013_s13 + $0x70] sm:$0xf0]  ;;  %v1552_v60 = vld [vmem:[%s2013_s13 + $0x48] sm:$0xf]  ;;  %v1805_v0 = vld [vmem:[%s2013_s13 + $0x4c] sm:$0xf] }
  0x1c   : > { %v1573_v59 = vor.u32 %v1810_v58, %v1572_v57  ;;  %v1806_v61 = vld [vmem:[%s2013_s13 + $0x50] sm:$0xf0]  ;;  %v1696_v62 = vld [vmem:[%s2013_s13 + $0x168] sm:$0xf]  ;;  %v1813_v6 = vld [vmem:[%s2013_s13 + $0x88] sm:$0xf0] }
  0x1d   : > { %878 = vmatpush.bf16.msra.mxu0 %v1847_v13  ;;  %1866 = vmatpush.bf16.msra.mxu3 %v1847_v13  ;;  %v1842_v63 = vld [vmem:[%s2013_s13 + $0x170] sm:$0xf0]  ;;  %v1564_v8 = vld [vmem:[%s2013_s13 + $0x60] sm:$0xf]  ;;  %v1809_v9 = vld [vmem:[%s2013_s13 + $0x68] sm:$0xf0] }
  0x1e   : > { %967 = vmatpush.bf16.msra.mxu1 %v1855_v14  ;;  %v1697_v3 = vor.u32 %v1842_v63, %v1696_v62  ;;  %v1832_v10 = vld [vmem:[%s2013_s13 + $0x124] sm:$0xf]  ;;  %v1662_v11 = vld [vmem:[%s2013_s13 + $0x12c] sm:$0xf0]  ;;  %v1596_v17 = vld [vmem:[%s2013_s13 + $0x98] sm:$0xf] }
  0x1f   : > { %v1566_v13 = vld [vmem:[%s2013_s13 + $0x6c] sm:$0xf0]  ;;  %v1816_v18 = vld [vmem:[%s2013_s13 + $0xa0] sm:$0xf0]  ;;  %v1674_v23 = vld [vmem:[%s2013_s13 + $0x144] sm:$0xf0] }
  0x20   : > { %v1811_v24 = vld [vmem:[%s2013_s13 + $0x7c] sm:$0xf]  ;;  %v1578_v25 = vld [vmem:[%s2013_s13 + $0x84] sm:$0xf0]  ;;  %v1608_v29 = vld [vmem:[%s2013_s13 + $0xb0] sm:$0xf] }
  0x21   : > { %879 = vmatpush.bf16.msra.mxu0 %v1846_v15  ;;  %1867 = vmatpush.bf16.msra.mxu3 %v1846_v15  ;;  %v1665_v15 = vor.u32 %v1832_v10, %v1662_v11  ;;  %v1581_v28 = vor.u32 %v1811_v24, %v1578_v25  ;;  %v1815_v33 = vld [vmem:[%s2013_s13 + $0x98] sm:$0xf0]  ;;  %v1838_v34 = vld [vmem:[%s2013_s13 + $0x154] sm:$0xf]  ;;  %v1590_v37 = vld [vmem:[%s2013_s13 + $0x9c] sm:$0xf0] }
  0x22   : > { %968 = vmatpush.bf16.msra.mxu1 %v1854_v16  ;;  %v1814_v36 = vld [vmem:[%s2013_s13 + $0x94] sm:$0xf]  ;;  %v1620_v41 = vld [vmem:[%s2013_s13 + $0xc8] sm:$0xf]  ;;  %v1841_v46 = vld [vmem:[%s2013_s13 + $0x16c] sm:$0xf] }
  0x23   : > { %v1593_v40 = vor.u32 %v1814_v36, %v1590_v37  ;;  %v1818_v45 = vld [vmem:[%s2013_s13 + $0xb0] sm:$0xf0]  ;;  %v1817_v48 = vld [vmem:[%s2013_s13 + $0xac] sm:$0xf]  ;;  %v1602_v49 = vld [vmem:[%s2013_s13 + $0xb4] sm:$0xf0] }
  0x24   : > { %v1605_v53 = vor.u32 %v1817_v48, %v1602_v49  ;;  %v1612_v58 = vld [vmem:[%s2013_s13 + $0xc0] sm:$0xf]  ;;  %v1820_v62 = vld [vmem:[%s2013_s13 + $0xc4] sm:$0xf]  ;;  %v1614_v63 = vld [vmem:[%s2013_s13 + $0xcc] sm:$0xf0] }
  0x25   : > { %880 = vmatpush.bf16.msra.mxu0 %v1845_v19  ;;  %1868 = vmatpush.bf16.msra.mxu3 %v1845_v19  ;;  %v1597_v19 = vor.u32 %v1816_v18, %v1596_v17  ;;  %v1704_v24 = vld [vmem:[%s2013_s13 + $0x170] sm:$0xf]  ;;  %v1843_v25 = vld [vmem:[%s2013_s13 + $0x178] sm:$0xf0] }
  0x26   : > { %969 = vmatpush.bf16.msra.mxu1 %v1853_v20  ;;  %1779 = vmatmul.msk.bf16.gmra.mxu2 %vm825_vm0, %v1537_v21  ;;  %v1812_v21 = vld [vmem:[%s2013_s13 + $0x80] sm:$0xf0] }
  0x29   : > { %881 = vmatpush.bf16.msra.mxu0 %v1844_v22  ;;  %1869 = vmatpush.bf16.msra.mxu3 %v1844_v22  ;;  %v1835_v22 = vld [vmem:[%s2013_s13 + $0x13c] sm:$0xf] }
  0x2a   : > { %970 = vmatpush.bf16.msra.mxu1 %v1852_v27 }
  0x2c   : > { %882 = vmatmul.bf16.vlgmr.msra.gmra.mxu0 %v1517_v30  ;;  %942 = vmatmul.bf16.vlgmr.msra.gmra.mxu3 %v1661_v31  ;;  %v1819_v30 = vld [vmem:[%s2013_s13 + $0xb8] sm:$0xf0] }
  0x2d   : > { %1870 = vmatpush.bf16.msrb.mxu3 %v1980_v1  ;;  %971 = vmatmul.bf16.vlgmr.msra.gmra.mxu1 %v1521_v32  ;;  %v1554_v1 = vld [vmem:[%s2013_s13 + $0x54] sm:$0xf0]  ;;  %v1609_v31 = vor.u32 %v1819_v30, %v1608_v29  ;;  %v1588_v32 = vld [vmem:[%s2013_s13 + $0x90] sm:$0xf] }
  0x2e   : > { %v1589_v38 = vor.u32 %v1815_v33, %v1588_v32 }
  0x31   : > { %1871 = vmatpush.bf16.msrb.mxu3 %v1858_v4  ;;  %v1557_v4 = vor.u32 %v1805_v0, %v1554_v1 }
  0x35   : > { %1872 = vmatpush.bf16.msrb.mxu3 %v1857_v7 }
  0x36   : > { %1780 = vmatmul.msk.bf16.gmra.mxu2 %vm825_vm0, %v1549_v35  ;;  %v1686_v35 = vld [vmem:[%s2013_s13 + $0x15c] sm:$0xf0] }
  0x37   : > { %v1689_v39 = vor.u32 %v1838_v34, %v1686_v35 }
  0x39   : > { %1873 = vmatpush.bf16.msrb.mxu3 %v1856_v12  ;;  %v1808_v12 = vld [vmem:[%s2013_s13 + $0x64] sm:$0xf] }
  0x3c   : > { %887 = vmatmul.bf16.gmra.mxu0 %v1529_v42  ;;  %947 = vmatmul.bf16.gmra.mxu3 %v1673_v43  ;;  %v1822_v42 = vld [vmem:[%s2013_s13 + $0xd0] sm:$0xf0] }
  0x3d   : > { %1874 = vmatpush.bf16.msrb.mxu3 %v1855_v14  ;;  %976 = vmatmul.bf16.gmra.mxu1 %v1533_v44  ;;  %v1565_v14 = vor.u32 %v1809_v9, %v1564_v8  ;;  %v1621_v43 = vor.u32 %v1822_v42, %v1620_v41  ;;  %v1600_v44 = vld [vmem:[%s2013_s13 + $0xa8] sm:$0xf]  ;;  %v2141_v9 = vld [vmem:[%s2320_s3] ss:$0 sm:$0xff]  ;;  %v1656_v42 = vld [vmem:[%s2013_s13 + $0x110] sm:$0xf] }
  0x3e   : > { %v1601_v50 = vor.u32 %v1818_v45, %v1600_v44 }
  0x41   : > { %1875 = vmatpush.bf16.msrb.mxu3 %v1854_v16  ;;  %v1569_v16 = vor.u32 %v1808_v12, %v1566_v13  ;;  %v1644_v12 = vld [vmem:[%s2013_s13 + $0xf8] sm:$0xf]  ;;  %v1828_v13 = vld [vmem:[%s2013_s13 + $0x100] sm:$0xf0] }
  0x42   : > { %v1645_v18 = vor.u32 %v1828_v13, %v1644_v12 }
  0x45   : > { %1876 = vmatpush.bf16.msrb.mxu3 %v1853_v20  ;;  %v1576_v20 = vld [vmem:[%s2013_s13 + $0x78] sm:$0xf] }
  0x46   : > { %1781 = vmatmul.msk.bf16.gmra.mxu2 %vm825_vm0, %v1561_v47  ;;  %v1577_v26 = vor.u32 %v1812_v21, %v1576_v20  ;;  %v1698_v47 = vld [vmem:[%s2013_s13 + $0x174] sm:$0xf0] }
  0x47   : > { %v1701_v51 = vor.u32 %v1841_v46, %v1698_v47  ;;  %v1624_v21 = vld [vmem:[%s2013_s13 + $0xd8] sm:$0xf] }
  0x49   : > { %1877 = vmatpush.bf16.msrb.mxu3 %v1852_v27  ;;  %v1677_v27 = vor.u32 %v1835_v22, %v1674_v23  ;;  %v1824_v23 = vld [vmem:[%s2013_s13 + $0xe0] sm:$0xf0] }
  0x4a   : > { %v1625_v30 = vor.u32 %v1824_v23, %v1624_v21  ;;  %v1650_v21 = vld [vmem:[%s2013_s13 + $0x114] sm:$0xf0] }
  0x4c   : > { %892 = vmatmul.bf16.gmra.mxu0 %v1541_v54  ;;  %952 = vmatmul.bf16.gmra.mxu3 %v1685_v55  ;;  %v1632_v54 = vld [vmem:[%s2013_s13 + $0xe0] sm:$0xf]  ;;  %v1825_v55 = vld [vmem:[%s2013_s13 + $0xe8] sm:$0xf0] }
  0x4d   : > { %1878 = vmatpush.bf16.msra.mxu3 %v1985_v2  ;;  %981 = vmatmul.bf16.gmra.mxu1 %v1545_v56  ;;  %v1553_v2 = vor.u32 %v1806_v61, %v1552_v60  ;;  %v1633_v57 = vor.u32 %v1825_v55, %v1632_v54  ;;  %v1692_v60 = vld [vmem:[%s2013_s13 + $0x158] sm:$0xf]  ;;  %v1840_v61 = vld [vmem:[%s2013_s13 + $0x160] sm:$0xf0]  ;;  %v1826_v54 = vld [vmem:[%s2013_s13 + $0xf4] sm:$0xf] }
  0x4e   : > { %v1693_v1 = vor.u32 %v1840_v61, %v1692_v60  ;;  %v1638_v55 = vld [vmem:[%s2013_s13 + $0xfc] sm:$0xf0] }
  0x51   : > { %1879 = vmatpush.bf16.msra.mxu3 %v1998_v5  ;;  %v1584_v5 = vld [vmem:[%s2013_s13 + $0x80] sm:$0xf] }
  0x52   : > { %v1585_v7 = vor.u32 %v1813_v6, %v1584_v5 }
  0x56   : > { %1782 = vmatmul.msk.bf16.gmra.mxu2 %vm825_vm0, %v1573_v59  ;;  %v1821_v59 = vld [vmem:[%s2013_s13 + $0xc8] sm:$0xf0] }
  0x57   : > { %v1613_v0 = vor.u32 %v1821_v59, %v1612_v58 }
  0x5c   : > { %897 = vmatmul.bf16.gmra.mxu0 %v1553_v2  ;;  %957 = vmatmul.bf16.gmra.mxu3 %v1697_v3 }
  0x5d   : > { %986 = vmatmul.bf16.gmra.mxu1 %v1557_v4  ;;  %v1617_v4 = vor.u32 %v1820_v62, %v1614_v63  ;;  %v1641_v62 = vor.u32 %v1826_v54, %v1638_v55 }
  0x66   : > { %1783 = vmatmul.msk.bf16.gmra.mxu2 %vm825_vm0, %v1585_v7  ;;  %v2135_v7 = vld [vmem:[%s2319_s2] ss:$0 sm:$0xff] }
  0x6c   : > { %902 = vmatmul.bf16.gmra.mxu0 %v1565_v14  ;;  %1031 = vmatmul.bf16.vlgmr.msrb.gmra.mxu3 %v1665_v15 }
  0x6d   : > { %991 = vmatmul.bf16.gmra.mxu1 %v1569_v16 }
  0x76   : > { %1784 = vmatmul.msk.bf16.gmra.mxu2 %vm825_vm0, %v1597_v19 }
  0x7c   : > { %907 = vmatmul.bf16.gmra.mxu0 %v1577_v26  ;;  %1036 = vmatmul.bf16.gmra.mxu3 %v1677_v27  ;;  %v1823_v26 = vld [vmem:[%s2013_s13 + $0xdc] sm:$0xf]  ;;  %v1626_v27 = vld [vmem:[%s2013_s13 + $0xe4] sm:$0xf0] }
  0x7d   : > { %996 = vmatmul.bf16.gmra.mxu1 %v1581_v28  ;;  %v1629_v35 = vor.u32 %v1823_v26, %v1626_v27 }
  0x86   : > { %1785 = vmatmul.msk.bf16.gmra.mxu2 %vm825_vm0, %v1609_v31  ;;  %v1705_v31 = vor.u32 %v1843_v25, %v1704_v24 }
  0x8c   : > { %912 = vmatmul.bf16.gmra.mxu0 %v1589_v38  ;;  %1041 = vmatmul.bf16.gmra.mxu3 %v1689_v39 }
  0x8d   : > { %1001 = vmatmul.bf16.gmra.mxu1 %v1593_v40 }
  0x96   : > { %1786 = vmatmul.msk.bf16.gmra.mxu2 %vm825_vm0, %v1621_v43  ;;  %v1831_v43 = vld [vmem:[%s2013_s13 + $0x118] sm:$0xf0] }
  0x97   : > { %v1657_v48 = vor.u32 %v1831_v43, %v1656_v42 }
  0x99   : > { %v1061_v52 = vpop.f32.mrf.mxu2 }
  0x9c   : > { %917 = vmatmul.bf16.gmra.mxu0 %v1601_v50  ;;  %1046 = vmatmul.bf16.gmra.mxu3 %v1701_v51 }
  0x9d   : > { %1006 = vmatmul.bf16.gmra.mxu1 %v1605_v53  ;;  %v1827_v53 = vld [vmem:[%s2013_s13 + $0xf8] sm:$0xf0] }
  0xa1   : > { %v1063_v56 = vpop.f32.mrf.mxu2 }
  0xa6   : > { %1787 = vmatmul.msk.bf16.gmra.mxu2 %vm825_vm0, %v1633_v57 }
  0xa9   : > { %v1066_v2 = vpop.f32.mrf.mxu2  ;;  %v883_v3 = vpop.f32.mrf.mxu0 }
  0xaa   : > { %v972_v5 = vpop.f32.mrf.mxu1 }
  0xab   : > { %v973_v6 = vadd.f32 %v972_v5, %v883_v3  ;;  %v1668_v5 = vld [vmem:[%s2013_s13 + $0x128] sm:$0xf] }
  0xac   : > { %922 = vmatmul.bf16.gmra.mxu0 %v1613_v0  ;;  %1792 = vmatmul.msk.bf16.vlgmr.msra.gmra.mxu3 %vm825_vm0, %v1693_v1 }
  0xad   : > { %v1062_v8 = vadd.f32 %v1061_v52, %v973_v6  ;;  %1011 = vmatmul.bf16.gmra.mxu1 %v1617_v4  ;;  %v1636_v52 = vld [vmem:[%s2013_s13 + $0xf0] sm:$0xf]  ;;  %v1834_v6 = vld [vmem:[%s2013_s13 + $0x130] sm:$0xf0] }
  0xae   : > { %v1637_v58 = vor.u32 %v1827_v53, %v1636_v52 }
  0xaf   : > { %v1244_v10 = vmul.f32 %v2135_v7, %v1062_v8  ;;  %v2145_v11 = vpop.f32.mrf.mxu3 }
  0xb1   : > { %v1280_v14 = vadd.f32 %v2141_v9, %v1244_v10  ;;  %v1068_v15 = vpop.f32.mrf.mxu2  ;;  %v885_v16 = vpop.f32.mrf.mxu0 }
  0xb2   : > { %v974_v17 = vpop.f32.mrf.mxu1 }
  0xb3   : > { %v1312_v19 = vmax.f32 %v1280_v14, 0.0  ;;  %v975_v20 = vadd.f32 %v974_v17, %v885_v16  ;;  %v1669_v14 = vor.u32 %v1834_v6, %v1668_v5 }
  0xb5   : > { %1344 = vst [vmem:[%s2153_s23] sm:$0xff] %v1312_v19  ;;  %v1064_v22 = vadd.f32 %v1063_v56, %v975_v20  ;;  %v1830_v19 = vld [vmem:[%s2013_s13 + $0x110] sm:$0xf0]  ;;  %v1829_v20 = vld [vmem:[%s2013_s13 + $0x10c] sm:$0xf] }
  0xb6   : > { %1788 = vmatmul.msk.bf16.gmra.mxu2 %vm825_vm0, %v1645_v18  ;;  %v1648_v18 = vld [vmem:[%s2013_s13 + $0x108] sm:$0xf] }
  0xb7   : > { %v1245_v28 = vmul.f32 %v2135_v7, %v1064_v22  ;;  %v2164_v29 = vpop.f32.mrf.mxu3  ;;  %v1649_v24 = vor.u32 %v1830_v19, %v1648_v18 }
  0xb9   : > { %v1281_v32 = vadd.f32 %v2141_v9, %v1245_v28  ;;  %v1071_v33 = vpop.f32.mrf.mxu2  ;;  %v888_v34 = vpop.f32.mrf.mxu0  ;;  %v1653_v28 = vor.u32 %v1829_v20, %v1650_v21 }
  0xba   : > { %v977_v36 = vpop.f32.mrf.mxu1 }
  0xbb   : > { %v1313_v37 = vmax.f32 %v1281_v32, 0.0  ;;  %v978_v38 = vadd.f32 %v977_v36, %v888_v34  ;;  %v1680_v36 = vld [vmem:[%s2013_s13 + $0x140] sm:$0xf] }
  0xbc   : > { %927 = vmatmul.bf16.gmra.mxu0 %v1625_v30  ;;  %1793 = vmatmul.msk.bf16.gmra.mxu3 %vm825_vm0, %v1705_v31 }
  0xbd   : > { %1345 = vst [vmem:[%s2153_s23 + $0x8] sm:$0xff] %v1313_v37  ;;  %v1067_v39 = vadd.f32 %v1066_v2, %v978_v38  ;;  %1016 = vmatmul.bf16.gmra.mxu1 %v1629_v35  ;;  %v1837_v37 = vld [vmem:[%s2013_s13 + $0x148] sm:$0xf0] }
  0xbe   : > { %v1681_v43 = vor.u32 %v1837_v37, %v1680_v36 }
  0xbf   : > { %v1246_v40 = vmul.f32 %v2135_v7, %v1067_v39  ;;  %v2170_v41 = vpop.f32.mrf.mxu3 }
  0xc1   : > { %v1282_v44 = vadd.f32 %v2141_v9, %v1246_v40  ;;  %v1073_v45 = vpop.f32.mrf.mxu2  ;;  %v890_v46 = vpop.f32.mrf.mxu0 }
  0xc2   : > { %v979_v47 = vpop.f32.mrf.mxu1 }
  0xc3   : > { %v1314_v49 = vmax.f32 %v1282_v44, 0.0  ;;  %v980_v50 = vadd.f32 %v979_v47, %v890_v46 }
  0xc5   : > { %1346 = vst [vmem:[%s2153_s23 + $0x10] sm:$0xff] %v1314_v49  ;;  %v1069_v51 = vadd.f32 %v1068_v15, %v980_v50 }
  0xc6   : > { %1789 = vmatmul.msk.bf16.gmra.mxu2 %vm825_vm0, %v1657_v48 }
  0xc7   : > { %v1247_v56 = vmul.f32 %v2135_v7, %v1069_v51  ;;  %v2182_v57 = vpop.f32.mrf.mxu3 }
  0xc9   : > { %v1283_v59 = vadd.f32 %v2141_v9, %v1247_v56  ;;  %v1076_v60 = vpop.f32.mrf.mxu2  ;;  %v893_v61 = vpop.f32.mrf.mxu0 }
  0xca   : > { %v982_v63 = vpop.f32.mrf.mxu1 }
  0xcb   : > { %v1315_v0 = vmax.f32 %v1283_v59, 0.0  ;;  %v983_v1 = vadd.f32 %v982_v63, %v893_v61 }
  0xcc   : > { %932 = vmatmul.bf16.gmra.mxu0 %v1637_v58 }
  0xcd   : > { %1347 = vst [vmem:[%s2153_s23 + $0x18] sm:$0xff] %v1315_v0  ;;  %v1072_v2 = vadd.f32 %v1071_v33, %v983_v1  ;;  %1021 = vmatmul.bf16.gmra.mxu1 %v1641_v62 }
  0xcf   : > { %v1248_v3 = vmul.f32 %v2135_v7, %v1072_v2  ;;  %v2187_v4 = vpop.f32.mrf.mxu3 }
  0xd1   : > { %v1284_v8 = vadd.f32 %v2141_v9, %v1248_v3  ;;  %v1078_v10 = vpop.f32.mrf.mxu2  ;;  %v895_v12 = vpop.f32.mrf.mxu0 }
  0xd2   : > { %v984_v13 = vpop.f32.mrf.mxu1 }
  0xd3   : > { %v1316_v15 = vmax.f32 %v1284_v8, 0.0  ;;  %v985_v16 = vadd.f32 %v984_v13, %v895_v12 }
  0xd5   : > { %1348 = vst [vmem:[%s2153_s23 + $0x20] sm:$0xff] %v1316_v15  ;;  %v1074_v17 = vadd.f32 %v1073_v45, %v985_v16 }
  0xd6   : > { %1790 = vmatmul.msk.bf16.gmra.mxu2 %vm825_vm0, %v1669_v14 }
  0xd7   : > { %v1249_v22 = vmul.f32 %v2135_v7, %v1074_v17  ;;  %v2199_v23 = vpop.f32.mrf.mxu3 }
  0xd9   : > { %v1285_v25 = vadd.f32 %v2141_v9, %v1249_v22  ;;  %v1081_v26 = vpop.f32.mrf.mxu2  ;;  %v898_v27 = vpop.f32.mrf.mxu0 }
  0xda   : > { %v987_v30 = vpop.f32.mrf.mxu1 }
  0xdb   : > { %v1317_v31 = vmax.f32 %v1285_v25, 0.0  ;;  %v988_v32 = vadd.f32 %v987_v30, %v898_v27 }
  0xdc   : > { %937 = vmatmul.bf16.gmra.mxu0 %v1649_v24 }
  0xdd   : > { %1349 = vst [vmem:[%s2153_s23 + $0x28] sm:$0xff] %v1317_v31  ;;  %v1077_v33 = vadd.f32 %v1076_v60, %v988_v32  ;;  %1026 = vmatmul.bf16.gmra.mxu1 %v1653_v28 }
  0xdf   : > { %v1250_v34 = vmul.f32 %v2135_v7, %v1077_v33  ;;  %v2204_v35 = vpop.f32.mrf.mxu3 }
  0xe1   : > { %v1286_v38 = vadd.f32 %v2141_v9, %v1250_v34  ;;  %v1083_v39 = vpop.f32.mrf.mxu2  ;;  %v900_v40 = vpop.f32.mrf.mxu0 }
  0xe2   : > { %v989_v42 = vpop.f32.mrf.mxu1 }
  0xe3   : > { %v1318_v44 = vmax.f32 %v1286_v38, 0.0  ;;  %v990_v45 = vadd.f32 %v989_v42, %v900_v40 }
  0xe5   : > { %1350 = vst [vmem:[%s2153_s23 + $0x30] sm:$0xff] %v1318_v44  ;;  %v1079_v46 = vadd.f32 %v1078_v10, %v990_v45 }
  0xe6   : > { %1791 = vmatmul.msk.bf16.gmra.mxu2 %vm825_vm0, %v1681_v43 }
  0xe7   : > { %v1251_v47 = vmul.f32 %v2135_v7, %v1079_v46  ;;  %v2212_v48 = vpop.f32.mrf.mxu3 }
  0xe9   : > { %v1287_v49 = vadd.f32 %v2141_v9, %v1251_v47  ;;  %v1086_v50 = vpop.f32.mrf.mxu2  ;;  %v903_v51 = vpop.f32.mrf.mxu0 }
  0xea   : > { %v992_v52 = vpop.f32.mrf.mxu1 }
  0xeb   : > { %v1319_v53 = vmax.f32 %v1287_v49, 0.0  ;;  %v993_v54 = vadd.f32 %v992_v52, %v903_v51 }
  0xed   : > { %1351 = vst [vmem:[%s2153_s23 + $0x38] sm:$0xff] %v1319_v53  ;;  %v1082_v55 = vadd.f32 %v1081_v26, %v993_v54 }
  0xef   : > { %v1252_v56 = vmul.f32 %v2135_v7, %v1082_v55  ;;  %v1032_v58 = vpop.f32.mrf.mxu3 }
  0xf0   : > { %v2218_v59 = vadd.f32 %v1032_v58, %v2145_v11 }
  0xf1   : > { %v1288_v60 = vadd.f32 %v2141_v9, %v1252_v56  ;;  %v1088_v61 = vpop.f32.mrf.mxu2  ;;  %v905_v62 = vpop.f32.mrf.mxu0 }
  0xf2   : > { %v994_v63 = vpop.f32.mrf.mxu1 }
  0xf3   : > { %v1320_v0 = vmax.f32 %v1288_v60, 0.0  ;;  %v995_v1 = vadd.f32 %v994_v63, %v905_v62 }
  0xf5   : > { %1352 = vst [vmem:[%s2153_s23 + $0x40] sm:$0xff] %v1320_v0  ;;  %v1084_v2 = vadd.f32 %v1083_v39, %v995_v1 }
  0xf7   : > { %v1253_v3 = vmul.f32 %v2135_v7, %v1084_v2  ;;  %v1034_v5 = vpop.f32.mrf.mxu3 }
  0xf8   : > { %v2224_v6 = vadd.f32 %v1034_v5, %v2164_v29 }
  0xf9   : > { %v1289_v8 = vadd.f32 %v2141_v9, %v1253_v3  ;;  %v1091_v11 = vpop.f32.mrf.mxu2  ;;  %v908_v10 = vpop.f32.mrf.mxu0 }
  0xfa   : > { %v997_v12 = vpop.f32.mrf.mxu1 }
  0xfb   : > { %v1321_v13 = vmax.f32 %v1289_v8, 0.0  ;;  %v998_v14 = vadd.f32 %v997_v12, %v908_v10 }
  0xfd   : > { %1353 = vst [vmem:[%s2153_s23 + $0x48] sm:$0xff] %v1321_v13  ;;  %v1087_v15 = vadd.f32 %v1086_v50, %v998_v14 }
  0xff   : > { %v1254_v16 = vmul.f32 %v2135_v7, %v1087_v15  ;;  %v1037_v17 = vpop.f32.mrf.mxu3 }
 0x100   : > { %v2230_v18 = vadd.f32 %v1037_v17, %v2170_v41 }
 0x101   : > { %v1290_v19 = vadd.f32 %v2141_v9, %v1254_v16  ;;  %v1093_v29 = vpop.f32.mrf.mxu2  ;;  %v910_v20 = vpop.f32.mrf.mxu0 }
 0x102   : > { %v999_v21 = vpop.f32.mrf.mxu1 }
 0x103   : > { %v1322_v22 = vmax.f32 %v1290_v19, 0.0  ;;  %v1000_v24 = vadd.f32 %v999_v21, %v910_v20 }
 0x105   : > { %1354 = vst [vmem:[%s2153_s23 + $0x50] sm:$0xff] %v1322_v22  ;;  %v1089_v25 = vadd.f32 %v1088_v61, %v1000_v24 }
 0x107   : > { %v1255_v26 = vmul.f32 %v2135_v7, %v1089_v25  ;;  %v1039_v27 = vpop.f32.mrf.mxu3 }
 0x108   : > { %v2236_v28 = vadd.f32 %v1039_v27, %v2182_v57 }
 0x109   : > { %v1291_v30 = vadd.f32 %v2141_v9, %v1255_v26  ;;  %v1096_v41 = vpop.f32.mrf.mxu2  ;;  %v913_v31 = vpop.f32.mrf.mxu0 }
 0x10a   : > { %v1002_v32 = vpop.f32.mrf.mxu1 }
 0x10b   : > { %v1323_v33 = vmax.f32 %v1291_v30, 0.0  ;;  %v1003_v34 = vadd.f32 %v1002_v32, %v913_v31 }
 0x10d   : > { %1355 = vst [vmem:[%s2153_s23 + $0x58] sm:$0xff] %v1323_v33  ;;  %v1092_v36 = vadd.f32 %v1091_v11, %v1003_v34 }
 0x10f   : > { %v1256_v37 = vmul.f32 %v2135_v7, %v1092_v36  ;;  %v1042_v38 = vpop.f32.mrf.mxu3 }
 0x110   : > { %v1043_v16 = vadd.f32 %v1042_v38, %v2187_v4 }
 0x111   : > { %v1292_v39 = vadd.f32 %v2141_v9, %v1256_v37  ;;  %v1098_v40 = vpop.f32.mrf.mxu2  ;;  %v915_v42 = vpop.f32.mrf.mxu0 }
 0x112   : > { %v1004_v57 = vpop.f32.mrf.mxu1 }
 0x113   : > { %v1324_v43 = vmax.f32 %v1292_v39, 0.0  ;;  %v1005_v44 = vadd.f32 %v1004_v57, %v915_v42 }
 0x115   : > { %1356 = vst [vmem:[%s2153_s23 + $0x60] sm:$0xff] %v1324_v43  ;;  %v1094_v45 = vadd.f32 %v1093_v29, %v1005_v44 }
 0x117   : > { %v1257_v46 = vmul.f32 %v2135_v7, %v1094_v45  ;;  %v1044_v47 = vpop.f32.mrf.mxu3 }
 0x118   : > { %v1045_v4 = vadd.f32 %v1044_v47, %v2199_v23 }
 0x119   : > { %v1293_v49 = vadd.f32 %v2141_v9, %v1257_v46  ;;  %v1101_v50 = vpop.f32.mrf.mxu2  ;;  %v918_v51 = vpop.f32.mrf.mxu0 }
 0x11a   : > { %v1007_v52 = vpop.f32.mrf.mxu1 }
 0x11b   : > { %v1325_v53 = vmax.f32 %v1293_v49, 0.0  ;;  %v1008_v54 = vadd.f32 %v1007_v52, %v918_v51 }
 0x11d   : > { %1357 = vst [vmem:[%s2153_s23 + $0x68] sm:$0xff] %v1325_v53  ;;  %v1097_v55 = vadd.f32 %v1096_v41, %v1008_v54 }
 0x11f   : > { %v1258_v56 = vmul.f32 %v2135_v7, %v1097_v55  ;;  %v1047_v58 = vpop.f32.mrf.mxu3 }
 0x120   : > { %v1048_v44 = vadd.f32 %v1047_v58, %v2204_v35 }
 0x121   : > { %v1294_v60 = vadd.f32 %v2141_v9, %v1258_v56  ;;  %v1103_v61 = vpop.f32.mrf.mxu2  ;;  %v920_v62 = vpop.f32.mrf.mxu0 }
 0x122   : > { %v1009_v63 = vpop.f32.mrf.mxu1 }
 0x123   : > { %v1326_v0 = vmax.f32 %v1294_v60, 0.0  ;;  %v1010_v1 = vadd.f32 %v1009_v63, %v920_v62 }
 0x125   : > { %1358 = vst [vmem:[%s2153_s23 + $0x70] sm:$0xff] %v1326_v0  ;;  %v1099_v2 = vadd.f32 %v1098_v40, %v1010_v1 }
 0x127   : > { %v1259_v3 = vmul.f32 %v2135_v7, %v1099_v2  ;;  %v1049_v5 = vpop.f32.mrf.mxu3 }
 0x128   : > { %v1050_v58 = vadd.f32 %v1049_v5, %v2212_v48 }
 0x129   : > { %v1295_v8 = vadd.f32 %v2141_v9, %v1259_v3  ;;  %v1106_v11 = vpop.f32.mrf.mxu2  ;;  %v923_v10 = vpop.f32.mrf.mxu0 }
 0x12a   : > { %v1012_v12 = vpop.f32.mrf.mxu1 }
 0x12b   : > { %v1327_v13 = vmax.f32 %v1295_v8, 0.0  ;;  %v1013_v14 = vadd.f32 %v1012_v12, %v923_v10 }
 0x12d   : > { %1359 = vst [vmem:[%s2153_s23 + $0x78] sm:$0xff] %v1327_v13  ;;  %v1102_v15 = vadd.f32 %v1101_v50, %v1013_v14 }
 0x12f   : > { %v1260_v17 = vmul.f32 %v2135_v7, %v1102_v15  ;;  %v1131_v19 = vpop.f32.mrf.mxu3 }
 0x130   : > { %v1132_v29 = vadd.f32 %v1131_v19, %v1043_v16 }
 0x131   : > { %v1296_v20 = vadd.f32 %v2141_v9, %v1260_v17  ;;  %v1108_v21 = vpop.f32.mrf.mxu2  ;;  %v925_v22 = vpop.f32.mrf.mxu0 }
 0x132   : > { %v1272_v24 = vmul.f32 %v2135_v7, %v1132_v29  ;;  %v1014_v25 = vpop.f32.mrf.mxu1 }
 0x133   : > { %v1328_v26 = vmax.f32 %v1296_v20, 0.0  ;;  %v1015_v27 = vadd.f32 %v1014_v25, %v925_v22 }
 0x134   : > { %v1308_v30 = vadd.f32 %v2141_v9, %v1272_v24 }
 0x135   : > { %1360 = vst [vmem:[%s2153_s23 + $0x80] sm:$0xff] %v1328_v26  ;;  %v1104_v41 = vadd.f32 %v1103_v61, %v1015_v27 }
 0x136   : > { %v1340_v31 = vmax.f32 %v1308_v30, 0.0 }
 0x137   : > { %v1261_v32 = vmul.f32 %v2135_v7, %v1104_v41  ;;  %v1133_v33 = vpop.f32.mrf.mxu3 }
 0x138   : > { %1372 = vst [vmem:[%s2153_s23 + $0xe0] sm:$0xff] %v1340_v31  ;;  %v1134_v34 = vadd.f32 %v1133_v33, %v1045_v4 }
 0x139   : > { %v1297_v36 = vadd.f32 %v2141_v9, %v1261_v32  ;;  %v1111_v37 = vpop.f32.mrf.mxu2  ;;  %v928_v38 = vpop.f32.mrf.mxu0 }
 0x13a   : > { %v1273_v39 = vmul.f32 %v2135_v7, %v1134_v34  ;;  %v1017_v40 = vpop.f32.mrf.mxu1 }
 0x13b   : > { %v1329_v42 = vmax.f32 %v1297_v36, 0.0  ;;  %v1018_v57 = vadd.f32 %v1017_v40, %v928_v38 }
 0x13c   : > { %v1309_v43 = vadd.f32 %v2141_v9, %v1273_v39 }
 0x13d   : > { %1361 = vst [vmem:[%s2153_s23 + $0x88] sm:$0xff] %v1329_v42  ;;  %v1107_v23 = vadd.f32 %v1106_v11, %v1018_v57 }
 0x13e   : > { %v1341_v45 = vmax.f32 %v1309_v43, 0.0 }
 0x13f   : > { %v1262_v46 = vmul.f32 %v2135_v7, %v1107_v23  ;;  %v1136_v47 = vpop.f32.mrf.mxu3 }
 0x140   : > { %1373 = vst [vmem:[%s2153_s23 + $0xe8] sm:$0xff] %v1341_v45  ;;  %v1137_v49 = vadd.f32 %v1136_v47, %v1048_v44 }
 0x141   : > { %v1298_v50 = vadd.f32 %v2141_v9, %v1262_v46  ;;  %v1113_v51 = vpop.f32.mrf.mxu2  ;;  %v930_v52 = vpop.f32.mrf.mxu0 }
 0x142   : > { %v1274_v53 = vmul.f32 %v2135_v7, %v1137_v49  ;;  %v1019_v54 = vpop.f32.mrf.mxu1 }
 0x143   : > { %v1330_v55 = vmax.f32 %v1298_v50, 0.0  ;;  %v1020_v56 = vadd.f32 %v1019_v54, %v930_v52 }
 0x144   : > { %v1310_v60 = vadd.f32 %v2141_v9, %v1274_v53 }
 0x145   : > { %1362 = vst [vmem:[%s2153_s23 + $0x90] sm:$0xff] %v1330_v55  ;;  %v1109_v35 = vadd.f32 %v1108_v21, %v1020_v56 }
 0x146   : > { %v1342_v61 = vmax.f32 %v1310_v60, 0.0 }
 0x147   : > { %v1263_v62 = vmul.f32 %v2135_v7, %v1109_v35  ;;  %v1138_v63 = vpop.f32.mrf.mxu3 }
 0x148   : > { %1374 = vst [vmem:[%s2153_s23 + $0xf0] sm:$0xff] %v1342_v61  ;;  %v1139_v0 = vadd.f32 %v1138_v63, %v1050_v58 }
 0x149   : > { %v1299_v1 = vadd.f32 %v2141_v9, %v1263_v62  ;;  %v1116_v2 = vpop.f32.mrf.mxu2  ;;  %v933_v3 = vpop.f32.mrf.mxu0 }
 0x14a   : > { %v1275_v8 = vmul.f32 %v2135_v7, %v1139_v0  ;;  %v1022_v11 = vpop.f32.mrf.mxu1 }
 0x14b   : > { %v1331_v10 = vmax.f32 %v1299_v1, 0.0  ;;  %v1023_v12 = vadd.f32 %v1022_v11, %v933_v3 }
 0x14c   : > { %v1311_v13 = vadd.f32 %v2141_v9, %v1275_v8 }
 0x14d   : > { %1363 = vst [vmem:[%s2153_s23 + $0x98] sm:$0xff] %v1331_v10  ;;  %v1112_v48 = vadd.f32 %v1111_v37, %v1023_v12 }
 0x14e   : > { %v1343_v5 = vmax.f32 %v1311_v13, 0.0 }
 0x14f   : > { %v1264_v14 = vmul.f32 %v2135_v7, %v1112_v48 }
 0x150   : > { %1375 = vst [vmem:[%s2153_s23 + $0xf8] sm:$0xff] %v1343_v5 }
 0x151   : > { %v1300_v15 = vadd.f32 %v2141_v9, %v1264_v14  ;;  %v1118_v16 = vpop.f32.mrf.mxu2  ;;  %v935_v17 = vpop.f32.mrf.mxu0 }
 0x152   : > { %v1024_v19 = vpop.f32.mrf.mxu1 }
 0x153   : > { %v1332_v29 = vmax.f32 %v1300_v15, 0.0  ;;  %v1025_v20 = vadd.f32 %v1024_v19, %v935_v17 }
 0x155   : > { %1364 = vst [vmem:[%s2153_s23 + $0xa0] sm:$0xff] %v1332_v29  ;;  %v1114_v21 = vadd.f32 %v1113_v51, %v1025_v20 }
 0x157   : > { %v1265_v22 = vmul.f32 %v2135_v7, %v1114_v21 }
 0x159   : > { %v1301_v24 = vadd.f32 %v2141_v9, %v1265_v22  ;;  %v1121_v25 = vpop.f32.mrf.mxu2  ;;  %v938_v26 = vpop.f32.mrf.mxu0 }
 0x15a   : > { %v1122_v27 = vadd.f32 %v1121_v25, %v2218_v59  ;;  %v1027_v30 = vpop.f32.mrf.mxu1 }
 0x15b   : > { %v1333_v41 = vmax.f32 %v1301_v24, 0.0  ;;  %v1028_v4 = vadd.f32 %v1027_v30, %v938_v26 }
 0x15c   : > { %v1268_v31 = vmul.f32 %v2135_v7, %v1122_v27 }
 0x15d   : > { %1365 = vst [vmem:[%s2153_s23 + $0xa8] sm:$0xff] %v1333_v41  ;;  %v1117_v32 = vadd.f32 %v1116_v2, %v1028_v4 }
 0x15e   : > { %v1304_v33 = vadd.f32 %v2141_v9, %v1268_v31 }
 0x15f   : > { %v1266_v34 = vmul.f32 %v2135_v7, %v1117_v32 }
 0x160   : > { %v1336_v36 = vmax.f32 %v1304_v33, 0.0 }
 0x161   : > { %v1302_v37 = vadd.f32 %v2141_v9, %v1266_v34  ;;  %v1123_v38 = vpop.f32.mrf.mxu2  ;;  %v940_v39 = vpop.f32.mrf.mxu0 }
 0x162   : > { %1368 = vst [vmem:[%s2153_s23 + $0xc0] sm:$0xff] %v1336_v36  ;;  %v1124_v59 = vadd.f32 %v1123_v38, %v2224_v6  ;;  %v1029_v40 = vpop.f32.mrf.mxu1 }
 0x163   : > { %v1334_v42 = vmax.f32 %v1302_v37, 0.0  ;;  %v1030_v57 = vadd.f32 %v1029_v40, %v940_v39 }
 0x164   : > { %v1269_v43 = vmul.f32 %v2135_v7, %v1124_v59 }
 0x165   : > { %1366 = vst [vmem:[%s2153_s23 + $0xb0] sm:$0xff] %v1334_v42  ;;  %v1119_v23 = vadd.f32 %v1118_v16, %v1030_v57 }
 0x166   : > { %v1305_v44 = vadd.f32 %v2141_v9, %v1269_v43 }
 0x167   : > { %v1267_v45 = vmul.f32 %v2135_v7, %v1119_v23 }
 0x168   : > { %v1337_v46 = vmax.f32 %v1305_v44, 0.0 }
 0x169   : > { %v1303_v47 = vadd.f32 %v2141_v9, %v1267_v45  ;;  %v1126_v49 = vpop.f32.mrf.mxu2 }
 0x16a   : > { %1369 = vst [vmem:[%s2153_s23 + $0xc8] sm:$0xff] %v1337_v46  ;;  %v1127_v6 = vadd.f32 %v1126_v49, %v2230_v18 }
 0x16b   : > { %v1335_v50 = vmax.f32 %v1303_v47, 0.0 }
 0x16c   : > { %v1270_v51 = vmul.f32 %v2135_v7, %v1127_v6 }
 0x16d   : > { %1367 = vst [vmem:[%s2153_s23 + $0xb8] sm:$0xff] %v1335_v50 }
 0x16e   : > { %v1306_v52 = vadd.f32 %v2141_v9, %v1270_v51 }
 0x170   : > { %v1338_v53 = vmax.f32 %v1306_v52, 0.0 }
 0x171   : > { %v1128_v54 = vpop.f32.mrf.mxu2 }
 0x172   : > { %1370 = vst [vmem:[%s2153_s23 + $0xd0] sm:$0xff] %v1338_v53  ;;  %v1129_v55 = vadd.f32 %v1128_v54, %v2236_v28 }
 0x174   : > { %v1271_v56 = vmul.f32 %v2135_v7, %v1129_v55 }
 0x176   : > { %v1307_v60 = vadd.f32 %v2141_v9, %v1271_v56 }
 0x178   : > { %v1339_v35 = vmax.f32 %v1307_v60, 0.0 }
 0x17a   : > { %1371 = vst [vmem:[%s2153_s23 + $0xd8] sm:$0xff] %v1339_v35 }
 0x17b PF: > { %s14_s17 = sadd.s32 1, %s1929_s17   ;;  %s2322_s15 = smov %s1925_s16 }
 0x17c   : > { %p11_p5 = scmp.ge.s32.totalorder %s14_s17, 4   ;;  %s2323_s16 = smov %s2325_s18 }
 0x17e   :  { %13 = sbr.rel (!%p11_p5) target bundleno = 2 (0x2), region = 83 }

// kernel: lift_forward.11
= control target key start
LH: loop header
LB: loop body
LE: loop exit
PB: predicated region body
PF: predicated region fallthrough
CT: control target
= control target key end

     0   :  { %vm212_vm0 = vcmask 261120   ;;  %s586_s1 = inlined_call_operand.vmem [shape: bf16[288,128], index: 1, kind: input, shape index: {}]   ;;  %s587_s0 = inlined_call_operand.vmem [shape: bf16[32,288], index: 0, kind: input, shape index: {}]   ;;  %s588_s2 = inlined_call_operand.vmem [shape: f32[1,128], index: 2, kind: input, shape index: {}]   ;;  %s589_s3 = inlined_call_operand.vmem [shape: f32[1,128], index: 3, kind: input, shape index: {}]   ;;  %s590_s4 = inlined_call_operand.vmem [shape: f32[32,128], index: 4, kind: output, shape index: {}]  }
   0x1   :  { %v430_v0 = vld [vmem:[%s586_s1 + $0x38] sm:$0xff]  ;;  %v429_v2 = vld [vmem:[%s586_s1 + $0x30] sm:$0xff]  ;;  %v440_v4 = vld [vmem:[%s586_s1 + $0x88] sm:$0xff] }
   0x2   :  { %v438_v1 = vld [vmem:[%s586_s1 + $0x78] sm:$0xff]  ;;  %219 = vmatpush.bf16.msra.mxu0 %v430_v0  ;;  %v437_v3 = vld [vmem:[%s586_s1 + $0x70] sm:$0xff]  ;;  %441 = vmatpush.bf16.msra.mxu3 %v430_v0  ;;  %v439_v5 = vld [vmem:[%s586_s1 + $0x80] sm:$0xff] }
   0x3   :  { %238 = vmatpush.bf16.msra.mxu1 %v438_v1  ;;  %263 = vmatpush.bf16.msra.mxu2 %v440_v4  ;;  %v329_v6 = vld [vmem:[%s587_s0 + $0x8] sm:$0xf]  ;;  %v419_v7 = vld [vmem:[%s587_s0 + $0x10] sm:$0xf0]  ;;  %v427_v11 = vld [vmem:[%s586_s1 + $0x20] sm:$0xff] }
   0x4   :  { %v428_v8 = vld [vmem:[%s586_s1 + $0x28] sm:$0xff]  ;;  %v330_v10 = vor.u32 %v419_v7, %v329_v6  ;;  %v435_v12 = vld [vmem:[%s586_s1 + $0x60] sm:$0xff]  ;;  %v426_v13 = vld [vmem:[%s586_s1 + $0x18] sm:$0xff] }
   0x5   :  { %v436_v9 = vld [vmem:[%s586_s1 + $0x68] sm:$0xff]  ;;  %v434_v14 = vld [vmem:[%s586_s1 + $0x58] sm:$0xff]  ;;  %v425_v15 = vld [vmem:[%s586_s1 + $0x10] sm:$0xff] }
   0x6   :  { %220 = vmatpush.bf16.msra.mxu0 %v429_v2  ;;  %442 = vmatpush.bf16.msra.mxu3 %v429_v2  ;;  %v433_v16 = vld [vmem:[%s586_s1 + $0x50] sm:$0xff]  ;;  %v341_v17 = vld [vmem:[%s587_s0 + $0x20] sm:$0xf]  ;;  %v422_v18 = vld [vmem:[%s587_s0 + $0x28] sm:$0xf0] }
   0x7   :  { %239 = vmatpush.bf16.msra.mxu1 %v437_v3  ;;  %264 = vmatpush.bf16.msra.mxu2 %v439_v5  ;;  %v424_v19 = vld [vmem:[%s586_s1 + $0x8] sm:$0xff]  ;;  %v342_v21 = vor.u32 %v422_v18, %v341_v17  ;;  %v423_v22 = vld [vmem:[%s586_s1] sm:$0xff]  ;;  %v323_v27 = vld [vmem:[%s587_s0 + $0xc] sm:$0xf0] }
   0x8   :  { %v432_v20 = vld [vmem:[%s586_s1 + $0x48] sm:$0xff]  ;;  %v431_v23 = vld [vmem:[%s586_s1 + $0x40] sm:$0xff]  ;;  %v333_v28 = vld [vmem:[%s587_s0 + $0x18] sm:$0xf] }
   0x9   :  { %v321_v24 = vld [vmem:[%s587_s0] sm:$0xf]  ;;  %v418_v25 = vld [vmem:[%s587_s0 + $0x8] sm:$0xf0]  ;;  %v417_v26 = vld [vmem:[%s587_s0 + $0x4] sm:$0xf] }
   0xa   :  { %221 = vmatpush.bf16.msra.mxu0 %v428_v8  ;;  %443 = vmatpush.bf16.msra.mxu3 %v428_v8  ;;  %v421_v29 = vld [vmem:[%s587_s0 + $0x20] sm:$0xf0]  ;;  %v322_v30 = vor.u32 %v418_v25, %v321_v24  ;;  %v326_v31 = vor.u32 %v417_v26, %v323_v27  ;;  %v420_v33 = vld [vmem:[%s587_s0 + $0x1c] sm:$0xf]  ;;  %v335_v34 = vld [vmem:[%s587_s0 + $0x24] sm:$0xf0] }
   0xb   :  { %240 = vmatpush.bf16.msra.mxu1 %v436_v9  ;;  %415 = vmatmul.msk.bf16.vlgmr.msra.gmra.mxu2 %vm212_vm0, %v330_v10  ;;  %v334_v32 = vor.u32 %v421_v29, %v333_v28  ;;  %v338_v35 = vor.u32 %v420_v33, %v335_v34  ;;  %v449_v40 = vld [vmem:[%s588_s2] ss:$0 sm:$0xff] }
   0xc   :  { %v450_v42 = vld [vmem:[%s589_s3] ss:$0 sm:$0xff] }
   0xe   :  { %222 = vmatpush.bf16.msra.mxu0 %v427_v11  ;;  %444 = vmatpush.bf16.msra.mxu3 %v427_v11 }
   0xf   :  { %241 = vmatpush.bf16.msra.mxu1 %v435_v12 }
  0x12   :  { %223 = vmatpush.bf16.msra.mxu0 %v426_v13  ;;  %445 = vmatpush.bf16.msra.mxu3 %v426_v13 }
  0x13   :  { %242 = vmatpush.bf16.msra.mxu1 %v434_v14 }
  0x16   :  { %224 = vmatpush.bf16.msra.mxu0 %v425_v15  ;;  %446 = vmatpush.bf16.msra.mxu3 %v425_v15 }
  0x17   :  { %243 = vmatpush.bf16.msra.mxu1 %v433_v16 }
  0x1a   :  { %225 = vmatpush.bf16.msra.mxu0 %v424_v19  ;;  %447 = vmatpush.bf16.msra.mxu3 %v424_v19 }
  0x1b   :  { %244 = vmatpush.bf16.msra.mxu1 %v432_v20  ;;  %416 = vmatmul.msk.bf16.gmra.mxu2 %vm212_vm0, %v342_v21 }
  0x1e   :  { %226 = vmatpush.bf16.msra.mxu0 %v423_v22  ;;  %448 = vmatpush.bf16.msra.mxu3 %v423_v22 }
  0x1f   :  { %245 = vmatpush.bf16.msra.mxu1 %v431_v23 }
  0x21   :  { %227 = vmatmul.bf16.vlgmr.msra.gmra.mxu0 %v322_v30  ;;  %232 = vmatmul.bf16.vlgmr.msra.gmra.mxu3 %v334_v32 }
  0x22   :  { %246 = vmatmul.bf16.vlgmr.msra.gmra.mxu1 %v326_v31 }
  0x32   :  { %251 = vmatmul.bf16.gmra.mxu1 %v338_v35 }
  0x8e   :  { %v266_v36 = vpop.f32.mrf.mxu2 }
  0x96   :  { %v268_v44 = vpop.f32.mrf.mxu2 }
  0x9e   :  { %v228_v37 = vpop.f32.mrf.mxu0  ;;  %v271_v54 = vpop.f32.mrf.mxu2 }
  0x9f   :  { %v247_v38 = vpop.f32.mrf.mxu1 }
  0xa0   :  { %v248_v39 = vadd.f32 %v247_v38, %v228_v37 }
  0xa2   :  { %v267_v41 = vadd.f32 %v266_v36, %v248_v39 }
  0xa4   :  { %v295_v43 = vmul.f32 %v449_v40, %v267_v41  ;;  %v233_v52 = vpop.f32.mrf.mxu3 }
  0xa6   :  { %v303_v45 = vadd.f32 %v450_v42, %v295_v43  ;;  %v230_v46 = vpop.f32.mrf.mxu0  ;;  %v273_v1 = vpop.f32.mrf.mxu2 }
  0xa7   :  { %v249_v47 = vpop.f32.mrf.mxu1 }
  0xa8   :  { %v307_v48 = vmax.f32 %v303_v45, 0.0  ;;  %v250_v49 = vadd.f32 %v249_v47, %v230_v46 }
  0xaa   :  { %311 = vst [vmem:[%s590_s4] sm:$0xff] %v307_v48  ;;  %v269_v50 = vadd.f32 %v268_v44, %v250_v49 }
  0xac   :  { %v296_v51 = vmul.f32 %v449_v40, %v269_v50  ;;  %v235_v61 = vpop.f32.mrf.mxu3 }
  0xae   :  { %v304_v53 = vadd.f32 %v450_v42, %v296_v51 }
  0xaf   :  { %v252_v55 = vpop.f32.mrf.mxu1 }
  0xb0   :  { %v308_v56 = vmax.f32 %v304_v53, 0.0  ;;  %v253_v57 = vadd.f32 %v252_v55, %v233_v52 }
  0xb2   :  { %312 = vst [vmem:[%s590_s4 + $0x8] sm:$0xff] %v308_v56  ;;  %v272_v58 = vadd.f32 %v271_v54, %v253_v57 }
  0xb4   :  { %v297_v59 = vmul.f32 %v449_v40, %v272_v58 }
  0xb6   :  { %v305_v60 = vadd.f32 %v450_v42, %v297_v59 }
  0xb7   :  { %v254_v62 = vpop.f32.mrf.mxu1 }
  0xb8   :  { %v309_v63 = vmax.f32 %v305_v60, 0.0  ;;  %v255_v0 = vadd.f32 %v254_v62, %v235_v61 }
  0xba   :  { %313 = vst [vmem:[%s590_s4 + $0x10] sm:$0xff] %v309_v63  ;;  %v274_v2 = vadd.f32 %v273_v1, %v255_v0 }
  0xbc   :  { %v298_v3 = vmul.f32 %v449_v40, %v274_v2 }
  0xbe   :  { %v306_v4 = vadd.f32 %v450_v42, %v298_v3 }
  0xc0   :  { %v310_v5 = vmax.f32 %v306_v4, 0.0 }
  0xc2   :  { %314 = vst [vmem:[%s590_s4 + $0x18] sm:$0xff] %v310_v5 }

// kernel: tile.8
= control target key start
LH: loop header
LB: loop body
LE: loop exit
PB: predicated region body
PF: predicated region fallthrough
CT: control target
= control target key end

     0   :  { %s22_s0 = inlined_call_operand.vmem [shape: f32[20], index: 0, kind: input, shape index: {}]   ;;  %s23_s1 = inlined_call_operand.vmem [shape: f32[4,20], index: 1, kind: output, shape index: {}]  }
   0x1   :  { %v4_v0 = vld [vmem:[%s22_s0] ss:$0 sm:$0xff] }
   0x2   :  { %5 = vst [vmem:[%s23_s1] sm:$0xf] %v4_v0 }

// kernel: tile.9
= control target key start
LH: loop header
LB: loop body
LE: loop exit
PB: predicated region body
PF: predicated region fallthrough
CT: control target
= control target key end

     0   :  { %s37_s8 = smov 20   ;;  %s38_s9 = smov 40   ;;  %vm7_vm0 = vcmask 162816   ;;  %vm13_vm1 = vcmask 654816   ;;  %vm19_vm2 = vcmask 490816   ;;  %vm25_vm3 = vcmask 326816   ;;  %s55_s0 = inlined_call_operand.vmem [shape: f32[4,20], index: 0, kind: input, shape index: {}]   ;;  %s56_s1 = inlined_call_operand.vmem [shape: f32[1,80], index: 1, kind: output, shape index: {}]  }
   0x1   :  { %v4_v0 = vld [vmem:[%s55_s0] sm:$0xf]  ;;  %s36_s0 = smov 60  }
   0x2   :  { %5 = vst [vmem:[#allocation1] sm:$0xf] %v4_v0 }
   0x9   :  { %v10_v1 = vld [vmem:[#allocation1 + $0x3] sm:$0x1]   ;;  %v22_v2 = vld [vmem:[#allocation1 + $0x1] sm:$0x1]   ;;  %v16_v3 = vld [vmem:[#allocation1 + $0x2] sm:$0x1]  }
   0xa   :  { %11 = vrot.lane.b32.xlu0 %v10_v1, %s36_s0  ;;  %23 = vrot.lane.b32.xlu1 %v22_v2, %s37_s8  ;;  %v6_v4 = vld [vmem:[#allocation1] sm:$0x1]  }
   0xb   :  { %8 = vst.msk [vmem:[#allocation0] sm:$0x1] %vm7_vm0, %v6_v4  }
  0x12   :  { %17 = vrot.lane.b32.xlu0 %v16_v3, %s38_s9 }
  0x7c   :  { %v12_v5 = vpop.permute.xlu0 %11   ;;  %v24_v6 = vpop.permute.xlu1 %23  }
  0x7d   :  { %14 = vst.msk [vmem:[#allocation0] sm:$0x1] %vm13_vm1, %v12_v5  }
  0x84   :  { %v18_v7 = vpop.permute.xlu0 %17  }
  0x85   :  { %20 = vst.msk [vmem:[#allocation0] sm:$0x1] %vm19_vm2, %v18_v7  }
  0x86   :  { %26 = vst.msk [vmem:[#allocation0] sm:$0x1] %vm25_vm3, %v24_v6  }
  0x8d   :  { %v29_v8 = vld [vmem:[#allocation0] sm:$0x1] }
  0x8e   :  { %32 = vst [vmem:[%s56_s1] sm:$0x1] %v29_v8 }

// kernel: lift_forward.12
= control target key start
LH: loop header
LB: loop body
LE: loop exit
PB: predicated region body
PF: predicated region fallthrough
CT: control target
= control target key end

     0   :  { %vm68_vm0 = vcmask 1043456   ;;  %vm61_vm1 = vcmask 326656   ;;  %s198_s1 = inlined_call_operand.vmem [shape: bf16[40,128], index: 1, kind: input, shape index: {}]   ;;  %s199_s2 = inlined_call_operand.vmem [shape: f32[1,128], index: 2, kind: input, shape index: {}]   ;;  %s200_s0 = inlined_call_operand.vmem [shape: bf16[32,40], index: 0, kind: input, shape index: {}]   ;;  %s201_s3 = inlined_call_operand.vmem [shape: f32[32,128], index: 3, kind: output, shape index: {}]  }
   0x1   :  { %v35_v0 = vld [vmem:[%s198_s1 + $0x10] sm:$0xf]  ;;  %v143_v4 = vld [vmem:[%s198_s1 + $0x8] sm:$0xff]  ;;  %v142_v5 = vld [vmem:[%s198_s1] sm:$0xff] }
   0x2   :  { %v55_v1 = vunpack.c.l.b16 %v35_v0  ;;  %v140_v6 = vld [vmem:[%s200_s0] sm:$0xff]  ;;  %v141_v7 = vld [vmem:[%s200_s0 + $0x8] sm:$0xff] }
   0x3   :  { %v147_v8 = vld [vmem:[%s199_s2] ss:$0 sm:$0xff] }
   0x4   :  { %v58_v2 = vpack.c.b16 %v55_v1, %v55_v1 }
   0x6   :  { %v70_v3 = vsel %vm68_vm0, %v58_v2, 0 }
   0x7   :  { %77 = vmatpush.bf16.msra.mxu0 %v70_v3  ;;  %144 = vmatpush.bf16.msra.mxu1 %v70_v3 }
   0xb   :  { %78 = vmatpush.bf16.msra.mxu0 %v143_v4  ;;  %145 = vmatpush.bf16.msra.mxu1 %v143_v4 }
   0xf   :  { %79 = vmatpush.bf16.msra.mxu0 %v142_v5  ;;  %146 = vmatpush.bf16.msra.mxu1 %v142_v5 }
  0x12   :  { %138 = vmatmul.msk.bf16.vlgmr.msra.gmra.mxu0 %vm61_vm1, %v140_v6  ;;  %139 = vmatmul.msk.bf16.vlgmr.msra.gmra.mxu1 %vm61_vm1, %v141_v7 }
  0x8f   :  { %v81_v9 = vpop.f32.mrf.mxu0  ;;  %v86_v10 = vpop.f32.mrf.mxu1 }
  0x90   :  { %v110_v11 = vadd.f32 %v147_v8, %v81_v9  ;;  %v112_v12 = vadd.f32 %v147_v8, %v86_v10 }
  0x92   :  { %114 = vst [vmem:[%s201_s3] sm:$0xff] %v110_v11 }
  0x93   :  { %116 = vst [vmem:[%s201_s3 + $0x10] sm:$0xff] %v112_v12 }
  0x97   :  { %v83_v13 = vpop.f32.mrf.mxu0  ;;  %v88_v14 = vpop.f32.mrf.mxu1 }
  0x98   :  { %v111_v15 = vadd.f32 %v147_v8, %v83_v13  ;;  %v113_v16 = vadd.f32 %v147_v8, %v88_v14 }
  0x9a   :  { %115 = vst [vmem:[%s201_s3 + $0x8] sm:$0xff] %v111_v15 }
  0x9b   :  { %117 = vst [vmem:[%s201_s3 + $0x18] sm:$0xff] %v113_v16 }

// kernel: lift_forward.13
= control target key start
LH: loop header
LB: loop body
LE: loop exit
PB: predicated region body
PF: predicated region fallthrough
CT: control target
= control target key end

     0   :  { %vm499_vm0 = vcmask 1041408   ;;  %vm474_vm1 = vcmask 687104   ;;  %s1546_s1 = inlined_call_operand.vmem [shape: bf16[468,128], index: 1, kind: input, shape index: {}]   ;;  %s1547_s0 = inlined_call_operand.vmem [shape: bf16[128,468], index: 0, kind: input, shape index: {}]   ;;  %s1548_s2 = inlined_call_operand.vmem [shape: f32[1,128], index: 2, kind: input, shape index: {}]   ;;  %s1549_s3 = inlined_call_operand.vmem [shape: f32[1,128], index: 3, kind: input, shape index: {}]   ;;  %s1550_s4 = inlined_call_operand.vmem [shape: f32[128,128], index: 4, kind: output, shape index: {}]  }
   0x1   :  { %v1117_v0 = vld [vmem:[%s1546_s1 + $0x38] sm:$0xff]  ;;  %v144_v3 = vld [vmem:[%s1546_s1 + $0xe8] sm:$0x3]  ;;  %v1116_v5 = vld [vmem:[%s1546_s1 + $0x30] sm:$0xff] }
   0x2   :  { %v1125_v1 = vld [vmem:[%s1546_s1 + $0x78] sm:$0xff]  ;;  %503 = vmatpush.bf16.msra.mxu0 %v1117_v0  ;;  %v414_v4 = vunpack.c.l.b16 %v144_v3  ;;  %v1124_v6 = vld [vmem:[%s1546_s1 + $0x70] sm:$0xff]  ;;  %v1115_v10 = vld [vmem:[%s1546_s1 + $0x28] sm:$0xff] }
   0x3   :  { %v1133_v2 = vld [vmem:[%s1546_s1 + $0xb8] sm:$0xff]  ;;  %552 = vmatpush.bf16.msra.mxu1 %v1125_v1  ;;  %v1132_v7 = vld [vmem:[%s1546_s1 + $0xb0] sm:$0xff]  ;;  %v1123_v11 = vld [vmem:[%s1546_s1 + $0x68] sm:$0xff] }
   0x4   :  { %601 = vmatpush.bf16.msra.mxu2 %v1133_v2  ;;  %v444_v8 = vpack.c.b16 %v414_v4, %v414_v4  ;;  %v1138_v12 = vld [vmem:[%s1546_s1 + $0xe0] sm:$0xff]  ;;  %v1131_v13 = vld [vmem:[%s1546_s1 + $0xa8] sm:$0xff]  ;;  %v1137_v16 = vld [vmem:[%s1546_s1 + $0xd8] sm:$0xff] }
   0x5   :  { %v1114_v14 = vld [vmem:[%s1546_s1 + $0x20] sm:$0xff]  ;;  %v1113_v18 = vld [vmem:[%s1546_s1 + $0x18] sm:$0xff]  ;;  %v1136_v20 = vld [vmem:[%s1546_s1 + $0xd0] sm:$0xff] }
   0x6   :  { %v501_v9 = vsel %vm499_vm0, %v444_v8, 0  ;;  %504 = vmatpush.bf16.msra.mxu0 %v1116_v5  ;;  %v1122_v15 = vld [vmem:[%s1546_s1 + $0x60] sm:$0xff]  ;;  %v1121_v19 = vld [vmem:[%s1546_s1 + $0x58] sm:$0xff]  ;;  %v1112_v22 = vld [vmem:[%s1546_s1 + $0x10] sm:$0xff] }
   0x7   :  { %553 = vmatpush.bf16.msra.mxu1 %v1124_v6  ;;  %652 = vmatpush.bf16.msra.mxu3 %v501_v9  ;;  %v1130_v17 = vld [vmem:[%s1546_s1 + $0xa0] sm:$0xff]  ;;  %v1129_v21 = vld [vmem:[%s1546_s1 + $0x98] sm:$0xff]  ;;  %v1120_v23 = vld [vmem:[%s1546_s1 + $0x50] sm:$0xff] }
   0x8   :  { %602 = vmatpush.bf16.msra.mxu2 %v1132_v7  ;;  %v1135_v24 = vld [vmem:[%s1546_s1 + $0xc8] sm:$0xff]  ;;  %v1128_v25 = vld [vmem:[%s1546_s1 + $0x90] sm:$0xff]  ;;  %v1134_v26 = vld [vmem:[%s1546_s1 + $0xc0] sm:$0xff] }
   0x9   :  { %v1111_v27 = vld [vmem:[%s1546_s1 + $0x8] sm:$0xff]  ;;  %v838_v31 = vld [vmem:[%s1547_s0 + $0x18] sm:$0xf0]  ;;  %v1110_v32 = vld [vmem:[%s1546_s1] sm:$0xff] }
   0xa   :  { %505 = vmatpush.bf16.msra.mxu0 %v1115_v10  ;;  %v1119_v28 = vld [vmem:[%s1546_s1 + $0x48] sm:$0xff]  ;;  %v1118_v33 = vld [vmem:[%s1546_s1 + $0x40] sm:$0xff]  ;;  %v1080_v37 = vld [vmem:[%s1547_s0 + $0xc] sm:$0xf0] }
   0xb   :  { %554 = vmatpush.bf16.msra.mxu1 %v1123_v11  ;;  %653 = vmatpush.bf16.msra.mxu3 %v1138_v12  ;;  %v1127_v29 = vld [vmem:[%s1546_s1 + $0x88] sm:$0xff]  ;;  %v1126_v34 = vld [vmem:[%s1546_s1 + $0x80] sm:$0xff]  ;;  %v830_v39 = vld [vmem:[%s1547_s0 + $0x10] sm:$0xf0] }
   0xc   :  { %603 = vmatpush.bf16.msra.mxu2 %v1131_v13  ;;  %v1079_v30 = vld [vmem:[%s1547_s0 + $0xc] sm:$0xf]  ;;  %v828_v36 = vld [vmem:[%s1547_s0] sm:$0xf]  ;;  %v1078_v38 = vld [vmem:[%s1547_s0 + $0x4] sm:$0xf] }
   0xd   :  { %v841_v35 = vor.u32 %v1079_v30, %v838_v31  ;;  %v836_v40 = vld [vmem:[%s1547_s0 + $0x8] sm:$0xf]  ;;  %v1081_v41 = vld [vmem:[%s1547_s0 + $0x14] sm:$0xf0]  ;;  %v829_v42 = vor.u32 %v1080_v37, %v828_v36  ;;  %v833_v43 = vor.u32 %v1078_v38, %v830_v39  ;;  %v1083_v45 = vld [vmem:[%s1547_s0 + $0x2c] sm:$0xf] }
   0xe   :  { %506 = vmatpush.bf16.msra.mxu0 %v1114_v14  ;;  %v837_v44 = vor.u32 %v1081_v41, %v836_v40  ;;  %v854_v46 = vld [vmem:[%s1547_s0 + $0x38] sm:$0xf0]  ;;  %v844_v48 = vld [vmem:[%s1547_s0 + $0x20] sm:$0xf]  ;;  %v1084_v49 = vld [vmem:[%s1547_s0 + $0x2c] sm:$0xf0] }
   0xf   :  { %555 = vmatpush.bf16.msra.mxu1 %v1122_v15  ;;  %654 = vmatpush.bf16.msra.mxu3 %v1137_v16  ;;  %v857_v47 = vor.u32 %v1083_v45, %v854_v46  ;;  %v1082_v50 = vld [vmem:[%s1547_s0 + $0x24] sm:$0xf]  ;;  %v846_v51 = vld [vmem:[%s1547_s0 + $0x30] sm:$0xf0]  ;;  %v852_v52 = vld [vmem:[%s1547_s0 + $0x28] sm:$0xf]  ;;  %v845_v54 = vor.u32 %v1084_v49, %v844_v48 }
  0x10   :  { %604 = vmatpush.bf16.msra.mxu2 %v1130_v17  ;;  %v1085_v53 = vld [vmem:[%s1547_s0 + $0x34] sm:$0xf0]  ;;  %v849_v55 = vor.u32 %v1082_v50, %v846_v51  ;;  %v1087_v57 = vld [vmem:[%s1547_s0 + $0x4c] sm:$0xf]  ;;  %v870_v58 = vld [vmem:[%s1547_s0 + $0x58] sm:$0xf0] }
  0x11   :  { %v853_v56 = vor.u32 %v1085_v53, %v852_v52  ;;  %v873_v59 = vor.u32 %v1087_v57, %v870_v58  ;;  %v860_v60 = vld [vmem:[%s1547_s0 + $0x40] sm:$0xf]  ;;  %v1088_v61 = vld [vmem:[%s1547_s0 + $0x4c] sm:$0xf0]  ;;  %v1086_v62 = vld [vmem:[%s1547_s0 + $0x44] sm:$0xf] }
  0x12   :  { %507 = vmatpush.bf16.msra.mxu0 %v1113_v18  ;;  %v862_v63 = vld [vmem:[%s1547_s0 + $0x50] sm:$0xf0]  ;;  %v868_v0 = vld [vmem:[%s1547_s0 + $0x48] sm:$0xf]  ;;  %v1089_v1 = vld [vmem:[%s1547_s0 + $0x54] sm:$0xf0]  ;;  %v861_v2 = vor.u32 %v1088_v61, %v860_v60 }
  0x13   :  { %556 = vmatpush.bf16.msra.mxu1 %v1121_v19  ;;  %655 = vmatpush.bf16.msra.mxu3 %v1136_v20  ;;  %v865_v3 = vor.u32 %v1086_v62, %v862_v63  ;;  %v869_v4 = vor.u32 %v1089_v1, %v868_v0  ;;  %v1091_v5 = vld [vmem:[%s1547_s0 + $0x6c] sm:$0xf]  ;;  %v886_v6 = vld [vmem:[%s1547_s0 + $0x78] sm:$0xf0]  ;;  %v876_v8 = vld [vmem:[%s1547_s0 + $0x60] sm:$0xf] }
  0x14   :  { %605 = vmatpush.bf16.msra.mxu2 %v1129_v21  ;;  %v889_v7 = vor.u32 %v1091_v5, %v886_v6  ;;  %v1092_v9 = vld [vmem:[%s1547_s0 + $0x6c] sm:$0xf0]  ;;  %v1090_v10 = vld [vmem:[%s1547_s0 + $0x64] sm:$0xf]  ;;  %v878_v11 = vld [vmem:[%s1547_s0 + $0x70] sm:$0xf0] }
  0x15   :  { %v884_v12 = vld [vmem:[%s1547_s0 + $0x68] sm:$0xf]  ;;  %v1093_v13 = vld [vmem:[%s1547_s0 + $0x74] sm:$0xf0]  ;;  %v877_v14 = vor.u32 %v1092_v9, %v876_v8  ;;  %v881_v15 = vor.u32 %v1090_v10, %v878_v11  ;;  %v1095_v17 = vld [vmem:[%s1547_s0 + $0x8c] sm:$0xf] }
  0x16   :  { %508 = vmatpush.bf16.msra.mxu0 %v1112_v22  ;;  %v885_v16 = vor.u32 %v1093_v13, %v884_v12  ;;  %v902_v18 = vld [vmem:[%s1547_s0 + $0x98] sm:$0xf0]  ;;  %v892_v20 = vld [vmem:[%s1547_s0 + $0x80] sm:$0xf]  ;;  %v1096_v21 = vld [vmem:[%s1547_s0 + $0x8c] sm:$0xf0] }
  0x17   :  { %557 = vmatpush.bf16.msra.mxu1 %v1120_v23  ;;  %656 = vmatpush.bf16.msra.mxu3 %v1135_v24  ;;  %v905_v19 = vor.u32 %v1095_v17, %v902_v18  ;;  %v1094_v22 = vld [vmem:[%s1547_s0 + $0x84] sm:$0xf]  ;;  %v894_v23 = vld [vmem:[%s1547_s0 + $0x90] sm:$0xf0]  ;;  %v900_v24 = vld [vmem:[%s1547_s0 + $0x88] sm:$0xf] }
  0x18   :  { %606 = vmatpush.bf16.msra.mxu2 %v1128_v25  ;;  %v1097_v25 = vld [vmem:[%s1547_s0 + $0x94] sm:$0xf0]  ;;  %v918_v30 = vld [vmem:[%s1547_s0 + $0xb8] sm:$0xf0]  ;;  %v916_v36 = vld [vmem:[%s1547_s0 + $0xa8] sm:$0xf] }
  0x19   :  { %v1101_v37 = vld [vmem:[%s1547_s0 + $0xb4] sm:$0xf0]  ;;  %v1103_v41 = vld [vmem:[%s1547_s0 + $0xcc] sm:$0xf]  ;;  %v1104_v45 = vld [vmem:[%s1547_s0 + $0xcc] sm:$0xf0] }
  0x1a   :  { %509 = vmatpush.bf16.msra.mxu0 %v1111_v27  ;;  %v897_v27 = vor.u32 %v1094_v22, %v894_v23  ;;  %v917_v40 = vor.u32 %v1101_v37, %v916_v36  ;;  %v1102_v46 = vld [vmem:[%s1547_s0 + $0xc4] sm:$0xf]  ;;  %v932_v48 = vld [vmem:[%s1547_s0 + $0xc8] sm:$0xf]  ;;  %v1105_v49 = vld [vmem:[%s1547_s0 + $0xd4] sm:$0xf0] }
  0x1b   :  { %558 = vmatpush.bf16.msra.mxu1 %v1119_v28  ;;  %657 = vmatpush.bf16.msra.mxu3 %v1134_v26  ;;  %v893_v26 = vor.u32 %v1096_v21, %v892_v20  ;;  %v901_v28 = vor.u32 %v1097_v25, %v900_v24  ;;  %v933_v52 = vor.u32 %v1105_v49, %v932_v48  ;;  %v1107_v53 = vld [vmem:[%s1547_s0 + $0xec] sm:$0xf]  ;;  %v1108_v57 = vld [vmem:[%s1547_s0 + $0xec] sm:$0xf0]  ;;  %v1106_v58 = vld [vmem:[%s1547_s0 + $0xe4] sm:$0xf] }
  0x1c   :  { %607 = vmatpush.bf16.msra.mxu2 %v1127_v29  ;;  %v1099_v29 = vld [vmem:[%s1547_s0 + $0xac] sm:$0xf]  ;;  %v948_v60 = vld [vmem:[%s1547_s0 + $0xe8] sm:$0xf]  ;;  %v1109_v61 = vld [vmem:[%s1547_s0 + $0xf4] sm:$0xf0] }
  0x1d   :  { %v921_v31 = vor.u32 %v1099_v29, %v918_v30  ;;  %v949_v0 = vor.u32 %v1109_v61, %v948_v60  ;;  %v1464_v11 = vld [vmem:[%s1549_s3] ss:$0 sm:$0xff] }
  0x1e   :  { %1070 = vmatmul.msk.bf16.vlgmr.msra.gmra.mxu3 %vm474_vm1, %v841_v35  ;;  %510 = vmatpush.bf16.msra.mxu0 %v1110_v32  ;;  %v908_v32 = vld [vmem:[%s1547_s0 + $0xa0] sm:$0xf]  ;;  %v910_v35 = vld [vmem:[%s1547_s0 + $0xb0] sm:$0xf0] }
  0x1f   :  { %559 = vmatpush.bf16.msra.mxu1 %v1118_v33  ;;  %v1100_v33 = vld [vmem:[%s1547_s0 + $0xac] sm:$0xf0] }
  0x20   :  { %608 = vmatpush.bf16.msra.mxu2 %v1126_v34  ;;  %v1098_v34 = vld [vmem:[%s1547_s0 + $0xa4] sm:$0xf]  ;;  %v909_v38 = vor.u32 %v1100_v33, %v908_v32 }
  0x21   :  { %511 = vmatmul.bf16.vlgmr.msra.gmra.mxu0 %v829_v42  ;;  %v913_v39 = vor.u32 %v1098_v34, %v910_v35  ;;  %v934_v42 = vld [vmem:[%s1547_s0 + $0xd8] sm:$0xf0] }
  0x22   :  { %560 = vmatmul.bf16.vlgmr.msra.gmra.mxu1 %v833_v43  ;;  %v937_v43 = vor.u32 %v1103_v41, %v934_v42 }
  0x23   :  { %609 = vmatmul.bf16.vlgmr.msra.gmra.mxu2 %v837_v44  ;;  %v924_v44 = vld [vmem:[%s1547_s0 + $0xc0] sm:$0xf] }
  0x24   :  { %v925_v50 = vor.u32 %v1104_v45, %v924_v44 }
  0x2e   :  { %1071 = vmatmul.msk.bf16.gmra.mxu3 %vm474_vm1, %v857_v47  ;;  %v926_v47 = vld [vmem:[%s1547_s0 + $0xd0] sm:$0xf0] }
  0x2f   :  { %v929_v51 = vor.u32 %v1102_v46, %v926_v47 }
  0x31   :  { %516 = vmatmul.bf16.gmra.mxu0 %v845_v54  ;;  %v950_v54 = vld [vmem:[%s1547_s0 + $0xf8] sm:$0xf0] }
  0x32   :  { %565 = vmatmul.bf16.gmra.mxu1 %v849_v55  ;;  %v953_v55 = vor.u32 %v1107_v53, %v950_v54 }
  0x33   :  { %614 = vmatmul.bf16.gmra.mxu2 %v853_v56  ;;  %v940_v56 = vld [vmem:[%s1547_s0 + $0xe0] sm:$0xf] }
  0x34   :  { %v941_v62 = vor.u32 %v1108_v57, %v940_v56 }
  0x3e   :  { %1072 = vmatmul.msk.bf16.gmra.mxu3 %vm474_vm1, %v873_v59  ;;  %v942_v59 = vld [vmem:[%s1547_s0 + $0xf0] sm:$0xf0] }
  0x3f   :  { %v945_v63 = vor.u32 %v1106_v58, %v942_v59 }
  0x41   :  { %521 = vmatmul.bf16.gmra.mxu0 %v861_v2 }
  0x42   :  { %570 = vmatmul.bf16.gmra.mxu1 %v865_v3 }
  0x43   :  { %619 = vmatmul.bf16.gmra.mxu2 %v869_v4 }
  0x4e   :  { %1073 = vmatmul.msk.bf16.gmra.mxu3 %vm474_vm1, %v889_v7  ;;  %v1459_v7 = vld [vmem:[%s1548_s2] ss:$0 sm:$0xff] }
  0x51   :  { %526 = vmatmul.bf16.gmra.mxu0 %v877_v14 }
  0x52   :  { %575 = vmatmul.bf16.gmra.mxu1 %v881_v15 }
  0x53   :  { %624 = vmatmul.bf16.gmra.mxu2 %v885_v16 }
  0x5e   :  { %1074 = vmatmul.msk.bf16.gmra.mxu3 %vm474_vm1, %v905_v19 }
  0x61   :  { %531 = vmatmul.bf16.gmra.mxu0 %v893_v26 }
  0x62   :  { %580 = vmatmul.bf16.gmra.mxu1 %v897_v27 }
  0x63   :  { %629 = vmatmul.bf16.gmra.mxu2 %v901_v28 }
  0x6e   :  { %1075 = vmatmul.msk.bf16.gmra.mxu3 %vm474_vm1, %v921_v31 }
  0x71   :  { %536 = vmatmul.bf16.gmra.mxu0 %v909_v38 }
  0x72   :  { %585 = vmatmul.bf16.gmra.mxu1 %v913_v39 }
  0x73   :  { %634 = vmatmul.bf16.gmra.mxu2 %v917_v40 }
  0x7e   :  { %1076 = vmatmul.msk.bf16.gmra.mxu3 %vm474_vm1, %v937_v43 }
  0x81   :  { %541 = vmatmul.bf16.gmra.mxu0 %v925_v50 }
  0x82   :  { %590 = vmatmul.bf16.gmra.mxu1 %v929_v51 }
  0x83   :  { %639 = vmatmul.bf16.gmra.mxu2 %v933_v52 }
  0x8e   :  { %1077 = vmatmul.msk.bf16.gmra.mxu3 %vm474_vm1, %v953_v55 }
  0x91   :  { %546 = vmatmul.bf16.gmra.mxu0 %v941_v62 }
  0x92   :  { %595 = vmatmul.bf16.gmra.mxu1 %v945_v63 }
  0x93   :  { %644 = vmatmul.bf16.gmra.mxu2 %v949_v0 }
  0x9e   :  { %v512_v1 = vpop.f32.mrf.mxu0 }
  0x9f   :  { %v561_v2 = vpop.f32.mrf.mxu1 }
  0xa0   :  { %v562_v4 = vadd.f32 %v561_v2, %v512_v1 }
  0xa1   :  { %v659_v3 = vpop.f32.mrf.mxu3 }
  0xa6   :  { %v610_v5 = vpop.f32.mrf.mxu2  ;;  %v514_v8 = vpop.f32.mrf.mxu0 }
  0xa7   :  { %v611_v6 = vadd.f32 %v610_v5, %v562_v4  ;;  %v563_v9 = vpop.f32.mrf.mxu1 }
  0xa8   :  { %v564_v15 = vadd.f32 %v563_v9, %v514_v8 }
  0xa9   :  { %v660_v10 = vadd.f32 %v659_v3, %v611_v6  ;;  %v661_v12 = vpop.f32.mrf.mxu3 }
  0xab   :  { %v754_v13 = vmul.f32 %v1459_v7, %v660_v10 }
  0xad   :  { %v774_v14 = vadd.f32 %v1464_v11, %v754_v13 }
  0xae   :  { %v612_v16 = vpop.f32.mrf.mxu2  ;;  %v517_v19 = vpop.f32.mrf.mxu0 }
  0xaf   :  { %v790_v17 = vmax.f32 %v774_v14, 0.0  ;;  %v613_v18 = vadd.f32 %v612_v16, %v564_v15  ;;  %v566_v20 = vpop.f32.mrf.mxu1 }
  0xb0   :  { %v567_v24 = vadd.f32 %v566_v20, %v517_v19 }
  0xb1   :  { %806 = vst [vmem:[%s1550_s4] sm:$0xff] %v790_v17  ;;  %v662_v21 = vadd.f32 %v661_v12, %v613_v18  ;;  %v664_v22 = vpop.f32.mrf.mxu3 }
  0xb3   :  { %v755_v23 = vmul.f32 %v1459_v7, %v662_v21 }
  0xb5   :  { %v775_v25 = vadd.f32 %v1464_v11, %v755_v23 }
  0xb6   :  { %v615_v26 = vpop.f32.mrf.mxu2  ;;  %v519_v29 = vpop.f32.mrf.mxu0 }
  0xb7   :  { %v791_v27 = vmax.f32 %v775_v25, 0.0  ;;  %v616_v28 = vadd.f32 %v615_v26, %v567_v24  ;;  %v568_v30 = vpop.f32.mrf.mxu1 }
  0xb8   :  { %v569_v35 = vadd.f32 %v568_v30, %v519_v29 }
  0xb9   :  { %807 = vst [vmem:[%s1550_s4 + $0x8] sm:$0xff] %v791_v27  ;;  %v665_v31 = vadd.f32 %v664_v22, %v616_v28  ;;  %v666_v32 = vpop.f32.mrf.mxu3 }
  0xbb   :  { %v756_v33 = vmul.f32 %v1459_v7, %v665_v31 }
  0xbd   :  { %v776_v34 = vadd.f32 %v1464_v11, %v756_v33 }
  0xbe   :  { %v617_v36 = vpop.f32.mrf.mxu2  ;;  %v522_v39 = vpop.f32.mrf.mxu0 }
  0xbf   :  { %v792_v37 = vmax.f32 %v776_v34, 0.0  ;;  %v618_v38 = vadd.f32 %v617_v36, %v569_v35  ;;  %v571_v40 = vpop.f32.mrf.mxu1 }
  0xc0   :  { %v572_v44 = vadd.f32 %v571_v40, %v522_v39 }
  0xc1   :  { %808 = vst [vmem:[%s1550_s4 + $0x10] sm:$0xff] %v792_v37  ;;  %v667_v41 = vadd.f32 %v666_v32, %v618_v38  ;;  %v669_v42 = vpop.f32.mrf.mxu3 }
  0xc3   :  { %v757_v43 = vmul.f32 %v1459_v7, %v667_v41 }
  0xc5   :  { %v777_v45 = vadd.f32 %v1464_v11, %v757_v43 }
  0xc6   :  { %v620_v46 = vpop.f32.mrf.mxu2  ;;  %v524_v49 = vpop.f32.mrf.mxu0 }
  0xc7   :  { %v793_v47 = vmax.f32 %v777_v45, 0.0  ;;  %v621_v48 = vadd.f32 %v620_v46, %v572_v44  ;;  %v573_v50 = vpop.f32.mrf.mxu1 }
  0xc8   :  { %v574_v55 = vadd.f32 %v573_v50, %v524_v49 }
  0xc9   :  { %809 = vst [vmem:[%s1550_s4 + $0x18] sm:$0xff] %v793_v47  ;;  %v670_v51 = vadd.f32 %v669_v42, %v621_v48  ;;  %v671_v52 = vpop.f32.mrf.mxu3 }
  0xcb   :  { %v758_v53 = vmul.f32 %v1459_v7, %v670_v51 }
  0xcd   :  { %v778_v54 = vadd.f32 %v1464_v11, %v758_v53 }
  0xce   :  { %v622_v56 = vpop.f32.mrf.mxu2  ;;  %v527_v59 = vpop.f32.mrf.mxu0 }
  0xcf   :  { %v794_v57 = vmax.f32 %v778_v54, 0.0  ;;  %v623_v58 = vadd.f32 %v622_v56, %v574_v55  ;;  %v576_v60 = vpop.f32.mrf.mxu1 }
  0xd0   :  { %v577_v0 = vadd.f32 %v576_v60, %v527_v59 }
  0xd1   :  { %810 = vst [vmem:[%s1550_s4 + $0x20] sm:$0xff] %v794_v57  ;;  %v672_v61 = vadd.f32 %v671_v52, %v623_v58  ;;  %v674_v62 = vpop.f32.mrf.mxu3 }
  0xd3   :  { %v759_v63 = vmul.f32 %v1459_v7, %v672_v61 }
  0xd5   :  { %v779_v1 = vadd.f32 %v1464_v11, %v759_v63 }
  0xd6   :  { %v625_v2 = vpop.f32.mrf.mxu2  ;;  %v529_v5 = vpop.f32.mrf.mxu0 }
  0xd7   :  { %v795_v3 = vmax.f32 %v779_v1, 0.0  ;;  %v626_v4 = vadd.f32 %v625_v2, %v577_v0  ;;  %v578_v6 = vpop.f32.mrf.mxu1 }
  0xd8   :  { %v579_v13 = vadd.f32 %v578_v6, %v529_v5 }
  0xd9   :  { %811 = vst [vmem:[%s1550_s4 + $0x28] sm:$0xff] %v795_v3  ;;  %v675_v8 = vadd.f32 %v674_v62, %v626_v4  ;;  %v676_v9 = vpop.f32.mrf.mxu3 }
  0xdb   :  { %v760_v10 = vmul.f32 %v1459_v7, %v675_v8 }
  0xdd   :  { %v780_v12 = vadd.f32 %v1464_v11, %v760_v10 }
  0xde   :  { %v627_v14 = vpop.f32.mrf.mxu2  ;;  %v532_v17 = vpop.f32.mrf.mxu0 }
  0xdf   :  { %v796_v15 = vmax.f32 %v780_v12, 0.0  ;;  %v628_v16 = vadd.f32 %v627_v14, %v579_v13  ;;  %v581_v18 = vpop.f32.mrf.mxu1 }
  0xe0   :  { %v582_v22 = vadd.f32 %v581_v18, %v532_v17 }
  0xe1   :  { %812 = vst [vmem:[%s1550_s4 + $0x30] sm:$0xff] %v796_v15  ;;  %v677_v19 = vadd.f32 %v676_v9, %v628_v16  ;;  %v679_v20 = vpop.f32.mrf.mxu3 }
  0xe3   :  { %v761_v21 = vmul.f32 %v1459_v7, %v677_v19 }
  0xe5   :  { %v781_v23 = vadd.f32 %v1464_v11, %v761_v21 }
  0xe6   :  { %v630_v24 = vpop.f32.mrf.mxu2  ;;  %v534_v27 = vpop.f32.mrf.mxu0 }
  0xe7   :  { %v797_v25 = vmax.f32 %v781_v23, 0.0  ;;  %v631_v26 = vadd.f32 %v630_v24, %v582_v22  ;;  %v583_v28 = vpop.f32.mrf.mxu1 }
  0xe8   :  { %v584_v33 = vadd.f32 %v583_v28, %v534_v27 }
  0xe9   :  { %813 = vst [vmem:[%s1550_s4 + $0x38] sm:$0xff] %v797_v25  ;;  %v680_v29 = vadd.f32 %v679_v20, %v631_v26  ;;  %v681_v30 = vpop.f32.mrf.mxu3 }
  0xeb   :  { %v762_v31 = vmul.f32 %v1459_v7, %v680_v29 }
  0xed   :  { %v782_v32 = vadd.f32 %v1464_v11, %v762_v31 }
  0xee   :  { %v632_v34 = vpop.f32.mrf.mxu2  ;;  %v537_v37 = vpop.f32.mrf.mxu0 }
  0xef   :  { %v798_v35 = vmax.f32 %v782_v32, 0.0  ;;  %v633_v36 = vadd.f32 %v632_v34, %v584_v33  ;;  %v586_v38 = vpop.f32.mrf.mxu1 }
  0xf0   :  { %v587_v42 = vadd.f32 %v586_v38, %v537_v37 }
  0xf1   :  { %814 = vst [vmem:[%s1550_s4 + $0x40] sm:$0xff] %v798_v35  ;;  %v682_v39 = vadd.f32 %v681_v30, %v633_v36  ;;  %v684_v40 = vpop.f32.mrf.mxu3 }
  0xf3   :  { %v763_v41 = vmul.f32 %v1459_v7, %v682_v39 }
  0xf5   :  { %v783_v43 = vadd.f32 %v1464_v11, %v763_v41 }
  0xf6   :  { %v635_v44 = vpop.f32.mrf.mxu2  ;;  %v539_v47 = vpop.f32.mrf.mxu0 }
  0xf7   :  { %v799_v45 = vmax.f32 %v783_v43, 0.0  ;;  %v636_v46 = vadd.f32 %v635_v44, %v587_v42  ;;  %v588_v48 = vpop.f32.mrf.mxu1 }
  0xf8   :  { %v589_v53 = vadd.f32 %v588_v48, %v539_v47 }
  0xf9   :  { %815 = vst [vmem:[%s1550_s4 + $0x48] sm:$0xff] %v799_v45  ;;  %v685_v49 = vadd.f32 %v684_v40, %v636_v46  ;;  %v686_v50 = vpop.f32.mrf.mxu3 }
  0xfb   :  { %v764_v51 = vmul.f32 %v1459_v7, %v685_v49 }
  0xfd   :  { %v784_v52 = vadd.f32 %v1464_v11, %v764_v51 }
  0xfe   :  { %v637_v54 = vpop.f32.mrf.mxu2  ;;  %v542_v57 = vpop.f32.mrf.mxu0 }
  0xff   :  { %v800_v55 = vmax.f32 %v784_v52, 0.0  ;;  %v638_v56 = vadd.f32 %v637_v54, %v589_v53  ;;  %v591_v58 = vpop.f32.mrf.mxu1 }
 0x100   :  { %v592_v62 = vadd.f32 %v591_v58, %v542_v57 }
 0x101   :  { %816 = vst [vmem:[%s1550_s4 + $0x50] sm:$0xff] %v800_v55  ;;  %v687_v59 = vadd.f32 %v686_v50, %v638_v56  ;;  %v689_v60 = vpop.f32.mrf.mxu3 }
 0x103   :  { %v765_v61 = vmul.f32 %v1459_v7, %v687_v59 }
 0x105   :  { %v785_v63 = vadd.f32 %v1464_v11, %v765_v61 }
 0x106   :  { %v640_v0 = vpop.f32.mrf.mxu2  ;;  %v544_v3 = vpop.f32.mrf.mxu0 }
 0x107   :  { %v801_v1 = vmax.f32 %v785_v63, 0.0  ;;  %v641_v2 = vadd.f32 %v640_v0, %v592_v62  ;;  %v593_v4 = vpop.f32.mrf.mxu1 }
 0x108   :  { %v594_v10 = vadd.f32 %v593_v4, %v544_v3 }
 0x109   :  { %817 = vst [vmem:[%s1550_s4 + $0x58] sm:$0xff] %v801_v1  ;;  %v690_v5 = vadd.f32 %v689_v60, %v641_v2  ;;  %v691_v8 = vpop.f32.mrf.mxu3 }
 0x10b   :  { %v766_v6 = vmul.f32 %v1459_v7, %v690_v5 }
 0x10d   :  { %v786_v9 = vadd.f32 %v1464_v11, %v766_v6 }
 0x10e   :  { %v642_v12 = vpop.f32.mrf.mxu2  ;;  %v547_v15 = vpop.f32.mrf.mxu0 }
 0x10f   :  { %v802_v13 = vmax.f32 %v786_v9, 0.0  ;;  %v643_v14 = vadd.f32 %v642_v12, %v594_v10  ;;  %v596_v16 = vpop.f32.mrf.mxu1 }
 0x110   :  { %v597_v19 = vadd.f32 %v596_v16, %v547_v15 }
 0x111   :  { %818 = vst [vmem:[%s1550_s4 + $0x60] sm:$0xff] %v802_v13  ;;  %v692_v17 = vadd.f32 %v691_v8, %v643_v14  ;;  %v694_v21 = vpop.f32.mrf.mxu3 }
 0x113   :  { %v767_v18 = vmul.f32 %v1459_v7, %v692_v17 }
 0x115   :  { %v787_v20 = vadd.f32 %v1464_v11, %v767_v18 }
 0x116   :  { %v645_v22 = vpop.f32.mrf.mxu2  ;;  %v549_v26 = vpop.f32.mrf.mxu0 }
 0x117   :  { %v803_v23 = vmax.f32 %v787_v20, 0.0  ;;  %v646_v24 = vadd.f32 %v645_v22, %v597_v19  ;;  %v598_v27 = vpop.f32.mrf.mxu1 }
 0x118   :  { %v599_v30 = vadd.f32 %v598_v27, %v549_v26 }
 0x119   :  { %819 = vst [vmem:[%s1550_s4 + $0x68] sm:$0xff] %v803_v23  ;;  %v695_v25 = vadd.f32 %v694_v21, %v646_v24  ;;  %v696_v34 = vpop.f32.mrf.mxu3 }
 0x11b   :  { %v768_v28 = vmul.f32 %v1459_v7, %v695_v25 }
 0x11d   :  { %v788_v29 = vadd.f32 %v1464_v11, %v768_v28 }
 0x11e   :  { %v647_v31 = vpop.f32.mrf.mxu2 }
 0x11f   :  { %v804_v32 = vmax.f32 %v788_v29, 0.0  ;;  %v648_v33 = vadd.f32 %v647_v31, %v599_v30 }
 0x121   :  { %820 = vst [vmem:[%s1550_s4 + $0x70] sm:$0xff] %v804_v32  ;;  %v697_v35 = vadd.f32 %v696_v34, %v648_v33 }
 0x123   :  { %v769_v36 = vmul.f32 %v1459_v7, %v697_v35 }
 0x125   :  { %v789_v37 = vadd.f32 %v1464_v11, %v769_v36 }
 0x127   :  { %v805_v38 = vmax.f32 %v789_v37, 0.0 }
 0x129   :  { %821 = vst [vmem:[%s1550_s4 + $0x78] sm:$0xff] %v805_v38 }

// kernel: lift_forward.14
= control target key start
LH: loop header
LB: loop body
LE: loop exit
PB: predicated region body
PF: predicated region fallthrough
CT: control target
= control target key end

     0   :  { %vm155_vm0 = vcmask 1041408   ;;  %vm130_vm1 = vcmask 293888   ;;  %s560_s1 = inlined_call_operand.vmem [shape: bf16[36,128], index: 1, kind: input, shape index: {}]   ;;  %s561_s2 = inlined_call_operand.vmem [shape: f32[1,128], index: 2, kind: input, shape index: {}]   ;;  %s562_s3 = inlined_call_operand.vmem [shape: f32[1,128], index: 3, kind: input, shape index: {}]   ;;  %s563_s0 = inlined_call_operand.vmem [shape: bf16[128,36], index: 0, kind: input, shape index: {}]   ;;  %s564_s4 = inlined_call_operand.vmem [shape: f32[128,128], index: 4, kind: output, shape index: {}]  }
   0x1   :  { %v74_v0 = vld [vmem:[%s560_s1 + $0x10] sm:$0x3]  ;;  %v392_v4 = vld [vmem:[%s560_s1 + $0x8] sm:$0xff]  ;;  %v391_v5 = vld [vmem:[%s560_s1] sm:$0xff] }
   0x2   :  { %v124_v1 = vunpack.c.l.b16 %v74_v0  ;;  %v383_v6 = vld [vmem:[%s563_s0] sm:$0xff]  ;;  %v385_v7 = vld [vmem:[%s563_s0 + $0x10] sm:$0xff]  ;;  %v384_v10 = vld [vmem:[%s563_s0 + $0x8] sm:$0xff] }
   0x3   :  { %v387_v8 = vld [vmem:[%s563_s0 + $0x20] sm:$0xff]  ;;  %v389_v9 = vld [vmem:[%s563_s0 + $0x30] sm:$0xff]  ;;  %v386_v11 = vld [vmem:[%s563_s0 + $0x18] sm:$0xff] }
   0x4   :  { %v127_v2 = vpack.c.b16 %v124_v1, %v124_v1  ;;  %v388_v12 = vld [vmem:[%s563_s0 + $0x28] sm:$0xff]  ;;  %v390_v13 = vld [vmem:[%s563_s0 + $0x38] sm:$0xff]  ;;  %v473_v14 = vld [vmem:[%s561_s2] ss:$0 sm:$0xff] }
   0x5   :  { %v478_v15 = vld [vmem:[%s562_s3] ss:$0 sm:$0xff] }
   0x6   :  { %v157_v3 = vsel %vm155_vm0, %v127_v2, 0 }
   0x7   :  { %164 = vmatpush.bf16.msra.mxu0 %v157_v3  ;;  %393 = vmatpush.bf16.msra.mxu1 %v157_v3 }
   0x8   :  { %394 = vmatpush.bf16.msra.mxu2 %v157_v3  ;;  %395 = vmatpush.bf16.msra.mxu3 %v157_v3 }
   0xb   :  { %165 = vmatpush.bf16.msra.mxu0 %v392_v4  ;;  %396 = vmatpush.bf16.msra.mxu1 %v392_v4 }
   0xc   :  { %397 = vmatpush.bf16.msra.mxu2 %v392_v4  ;;  %398 = vmatpush.bf16.msra.mxu3 %v392_v4 }
   0xf   :  { %166 = vmatpush.bf16.msra.mxu0 %v391_v5  ;;  %399 = vmatpush.bf16.msra.mxu1 %v391_v5 }
  0x10   :  { %400 = vmatpush.bf16.msra.mxu2 %v391_v5  ;;  %401 = vmatpush.bf16.msra.mxu3 %v391_v5 }
  0x12   :  { %375 = vmatmul.msk.bf16.vlgmr.msra.gmra.mxu0 %vm130_vm1, %v383_v6  ;;  %377 = vmatmul.msk.bf16.vlgmr.msra.gmra.mxu1 %vm130_vm1, %v385_v7 }
  0x13   :  { %379 = vmatmul.msk.bf16.vlgmr.msra.gmra.mxu2 %vm130_vm1, %v387_v8  ;;  %381 = vmatmul.msk.bf16.vlgmr.msra.gmra.mxu3 %vm130_vm1, %v389_v9 }
  0x22   :  { %376 = vmatmul.msk.bf16.gmra.mxu0 %vm130_vm1, %v384_v10  ;;  %378 = vmatmul.msk.bf16.gmra.mxu1 %vm130_vm1, %v386_v11 }
  0x23   :  { %380 = vmatmul.msk.bf16.gmra.mxu2 %vm130_vm1, %v388_v12  ;;  %382 = vmatmul.msk.bf16.gmra.mxu3 %vm130_vm1, %v390_v13 }
  0x8f   :  { %v168_v16 = vpop.f32.mrf.mxu0  ;;  %v178_v17 = vpop.f32.mrf.mxu1 }
  0x90   :  { %v263_v18 = vmul.f32 %v473_v14, %v168_v16  ;;  %v267_v19 = vmul.f32 %v473_v14, %v178_v17 }
  0x92   :  { %v283_v20 = vadd.f32 %v478_v15, %v263_v18  ;;  %v287_v21 = vadd.f32 %v478_v15, %v267_v19 }
  0x94   :  { %v299_v22 = vmax.f32 %v283_v20, 0.0  ;;  %v303_v23 = vmax.f32 %v287_v21, 0.0 }
  0x96   :  { %315 = vst [vmem:[%s564_s4] sm:$0xff] %v299_v22  ;;  %v188_v24 = vpop.f32.mrf.mxu2  ;;  %v198_v25 = vpop.f32.mrf.mxu3 }
  0x97   :  { %319 = vst [vmem:[%s564_s4 + $0x20] sm:$0xff] %v303_v23  ;;  %v271_v26 = vmul.f32 %v473_v14, %v188_v24  ;;  %v275_v27 = vmul.f32 %v473_v14, %v198_v25  ;;  %v170_v28 = vpop.f32.mrf.mxu0  ;;  %v180_v29 = vpop.f32.mrf.mxu1 }
  0x98   :  { %v264_v30 = vmul.f32 %v473_v14, %v170_v28  ;;  %v268_v31 = vmul.f32 %v473_v14, %v180_v29 }
  0x99   :  { %v291_v32 = vadd.f32 %v478_v15, %v271_v26  ;;  %v295_v33 = vadd.f32 %v478_v15, %v275_v27 }
  0x9a   :  { %v284_v34 = vadd.f32 %v478_v15, %v264_v30  ;;  %v288_v35 = vadd.f32 %v478_v15, %v268_v31 }
  0x9b   :  { %v307_v36 = vmax.f32 %v291_v32, 0.0  ;;  %v311_v37 = vmax.f32 %v295_v33, 0.0 }
  0x9c   :  { %v300_v38 = vmax.f32 %v284_v34, 0.0  ;;  %v304_v39 = vmax.f32 %v288_v35, 0.0 }
  0x9d   :  { %323 = vst [vmem:[%s564_s4 + $0x40] sm:$0xff] %v307_v36 }
  0x9e   :  { %327 = vst [vmem:[%s564_s4 + $0x60] sm:$0xff] %v311_v37  ;;  %v190_v40 = vpop.f32.mrf.mxu2  ;;  %v200_v41 = vpop.f32.mrf.mxu3 }
  0x9f   :  { %316 = vst [vmem:[%s564_s4 + $0x8] sm:$0xff] %v300_v38  ;;  %v272_v42 = vmul.f32 %v473_v14, %v190_v40  ;;  %v276_v43 = vmul.f32 %v473_v14, %v200_v41  ;;  %v173_v44 = vpop.f32.mrf.mxu0  ;;  %v183_v45 = vpop.f32.mrf.mxu1 }
  0xa0   :  { %320 = vst [vmem:[%s564_s4 + $0x28] sm:$0xff] %v304_v39  ;;  %v265_v46 = vmul.f32 %v473_v14, %v173_v44  ;;  %v269_v47 = vmul.f32 %v473_v14, %v183_v45 }
  0xa1   :  { %v292_v48 = vadd.f32 %v478_v15, %v272_v42  ;;  %v296_v49 = vadd.f32 %v478_v15, %v276_v43 }
  0xa2   :  { %v285_v50 = vadd.f32 %v478_v15, %v265_v46  ;;  %v289_v51 = vadd.f32 %v478_v15, %v269_v47 }
  0xa3   :  { %v308_v52 = vmax.f32 %v292_v48, 0.0  ;;  %v312_v53 = vmax.f32 %v296_v49, 0.0 }
  0xa4   :  { %v301_v54 = vmax.f32 %v285_v50, 0.0  ;;  %v305_v55 = vmax.f32 %v289_v51, 0.0 }
  0xa5   :  { %324 = vst [vmem:[%s564_s4 + $0x48] sm:$0xff] %v308_v52 }
  0xa6   :  { %328 = vst [vmem:[%s564_s4 + $0x68] sm:$0xff] %v312_v53  ;;  %v193_v56 = vpop.f32.mrf.mxu2  ;;  %v203_v57 = vpop.f32.mrf.mxu3 }
  0xa7   :  { %317 = vst [vmem:[%s564_s4 + $0x10] sm:$0xff] %v301_v54  ;;  %v273_v58 = vmul.f32 %v473_v14, %v193_v56  ;;  %v277_v59 = vmul.f32 %v473_v14, %v203_v57  ;;  %v175_v60 = vpop.f32.mrf.mxu0  ;;  %v185_v61 = vpop.f32.mrf.mxu1 }
  0xa8   :  { %321 = vst [vmem:[%s564_s4 + $0x30] sm:$0xff] %v305_v55  ;;  %v266_v62 = vmul.f32 %v473_v14, %v175_v60  ;;  %v270_v63 = vmul.f32 %v473_v14, %v185_v61 }
  0xa9   :  { %v293_v0 = vadd.f32 %v478_v15, %v273_v58  ;;  %v297_v1 = vadd.f32 %v478_v15, %v277_v59 }
  0xaa   :  { %v286_v2 = vadd.f32 %v478_v15, %v266_v62  ;;  %v290_v3 = vadd.f32 %v478_v15, %v270_v63 }
  0xab   :  { %v309_v4 = vmax.f32 %v293_v0, 0.0  ;;  %v313_v5 = vmax.f32 %v297_v1, 0.0 }
  0xac   :  { %v302_v6 = vmax.f32 %v286_v2, 0.0  ;;  %v306_v7 = vmax.f32 %v290_v3, 0.0 }
  0xad   :  { %325 = vst [vmem:[%s564_s4 + $0x50] sm:$0xff] %v309_v4 }
  0xae   :  { %329 = vst [vmem:[%s564_s4 + $0x70] sm:$0xff] %v313_v5  ;;  %v195_v8 = vpop.f32.mrf.mxu2  ;;  %v205_v9 = vpop.f32.mrf.mxu3 }
  0xaf   :  { %318 = vst [vmem:[%s564_s4 + $0x18] sm:$0xff] %v302_v6  ;;  %v274_v10 = vmul.f32 %v473_v14, %v195_v8  ;;  %v278_v11 = vmul.f32 %v473_v14, %v205_v9 }
  0xb0   :  { %322 = vst [vmem:[%s564_s4 + $0x38] sm:$0xff] %v306_v7 }
  0xb1   :  { %v294_v12 = vadd.f32 %v478_v15, %v274_v10  ;;  %v298_v13 = vadd.f32 %v478_v15, %v278_v11 }
  0xb3   :  { %v310_v16 = vmax.f32 %v294_v12, 0.0  ;;  %v314_v17 = vmax.f32 %v298_v13, 0.0 }
  0xb5   :  { %326 = vst [vmem:[%s564_s4 + $0x58] sm:$0xff] %v310_v16 }
  0xb6   :  { %330 = vst [vmem:[%s564_s4 + $0x78] sm:$0xff] %v314_v17 }

// kernel: lift_forward.15
= control target key start
LH: loop header
LB: loop body
LE: loop exit
PB: predicated region body
PF: predicated region fallthrough
CT: control target
= control target key end

     0   :  { %vm133_vm0 = vcmask 1041408   ;;  %vm108_vm1 = vcmask 31744   ;;  %s435_s1 = inlined_call_operand.vmem [shape: bf16[4,128], index: 1, kind: input, shape index: {}]   ;;  %s436_s0 = inlined_call_operand.vmem [shape: bf16[128,4], index: 0, kind: input, shape index: {}]   ;;  %s437_s2 = inlined_call_operand.vmem [shape: f32[1,128], index: 2, kind: input, shape index: {}]   ;;  %s438_s3 = inlined_call_operand.vmem [shape: f32[128,128], index: 3, kind: output, shape index: {}]  }
   0x1   :  { %v67_v0 = vld [vmem:[%s435_s1] sm:$0x3]  ;;  %v319_v3 = vld [vmem:[%s436_s0 + $0x10] sm:$0xff]  ;;  %v318_v6 = vld [vmem:[%s436_s0 + $0x8] sm:$0xff] }
   0x2   :  { %v135_v1 = vsel %vm133_vm0, %v67_v0, 0  ;;  %v317_v2 = vld [vmem:[%s436_s0] sm:$0xff]  ;;  %v323_v5 = vld [vmem:[%s436_s0 + $0x30] sm:$0xff]  ;;  %v320_v7 = vld [vmem:[%s436_s0 + $0x18] sm:$0xff] }
   0x3   :  { %144 = vmatpush.bf16.msra.mxu0 %v135_v1  ;;  %325 = vmatpush.bf16.msra.mxu1 %v135_v1  ;;  %v321_v4 = vld [vmem:[%s436_s0 + $0x20] sm:$0xff]  ;;  %v322_v8 = vld [vmem:[%s436_s0 + $0x28] sm:$0xff]  ;;  %v324_v9 = vld [vmem:[%s436_s0 + $0x38] sm:$0xff] }
   0x4   :  { %326 = vmatpush.bf16.msra.mxu2 %v135_v1  ;;  %327 = vmatpush.bf16.msra.mxu3 %v135_v1  ;;  %v328_v10 = vld [vmem:[%s437_s2] ss:$0 sm:$0xff] }
   0x6   :  { %309 = vmatmul.msk.bf16.vlgmr.msra.gmra.mxu0 %vm108_vm1, %v317_v2  ;;  %311 = vmatmul.msk.bf16.vlgmr.msra.gmra.mxu1 %vm108_vm1, %v319_v3 }
   0x7   :  { %313 = vmatmul.msk.bf16.vlgmr.msra.gmra.mxu2 %vm108_vm1, %v321_v4  ;;  %315 = vmatmul.msk.bf16.vlgmr.msra.gmra.mxu3 %vm108_vm1, %v323_v5 }
  0x16   :  { %310 = vmatmul.msk.bf16.gmra.mxu0 %vm108_vm1, %v318_v6  ;;  %312 = vmatmul.msk.bf16.gmra.mxu1 %vm108_vm1, %v320_v7 }
  0x17   :  { %314 = vmatmul.msk.bf16.gmra.mxu2 %vm108_vm1, %v322_v8  ;;  %316 = vmatmul.msk.bf16.gmra.mxu3 %vm108_vm1, %v324_v9 }
  0x83   :  { %v146_v11 = vpop.f32.mrf.mxu0  ;;  %v156_v12 = vpop.f32.mrf.mxu1 }
  0x84   :  { %v241_v13 = vadd.f32 %v328_v10, %v146_v11  ;;  %v245_v14 = vadd.f32 %v328_v10, %v156_v12 }
  0x86   :  { %257 = vst [vmem:[%s438_s3] sm:$0xff] %v241_v13 }
  0x87   :  { %261 = vst [vmem:[%s438_s3 + $0x20] sm:$0xff] %v245_v14 }
  0x8a   :  { %v166_v15 = vpop.f32.mrf.mxu2  ;;  %v176_v16 = vpop.f32.mrf.mxu3 }
  0x8b   :  { %v249_v17 = vadd.f32 %v328_v10, %v166_v15  ;;  %v253_v18 = vadd.f32 %v328_v10, %v176_v16  ;;  %v148_v19 = vpop.f32.mrf.mxu0  ;;  %v158_v20 = vpop.f32.mrf.mxu1 }
  0x8c   :  { %v242_v21 = vadd.f32 %v328_v10, %v148_v19  ;;  %v246_v22 = vadd.f32 %v328_v10, %v158_v20 }
  0x8d   :  { %265 = vst [vmem:[%s438_s3 + $0x40] sm:$0xff] %v249_v17 }
  0x8e   :  { %269 = vst [vmem:[%s438_s3 + $0x60] sm:$0xff] %v253_v18 }
  0x8f   :  { %258 = vst [vmem:[%s438_s3 + $0x8] sm:$0xff] %v242_v21 }
  0x90   :  { %262 = vst [vmem:[%s438_s3 + $0x28] sm:$0xff] %v246_v22 }
  0x92   :  { %v168_v23 = vpop.f32.mrf.mxu2  ;;  %v178_v24 = vpop.f32.mrf.mxu3 }
  0x93   :  { %v250_v25 = vadd.f32 %v328_v10, %v168_v23  ;;  %v254_v26 = vadd.f32 %v328_v10, %v178_v24  ;;  %v151_v27 = vpop.f32.mrf.mxu0  ;;  %v161_v28 = vpop.f32.mrf.mxu1 }
  0x94   :  { %v243_v29 = vadd.f32 %v328_v10, %v151_v27  ;;  %v247_v30 = vadd.f32 %v328_v10, %v161_v28 }
  0x95   :  { %266 = vst [vmem:[%s438_s3 + $0x48] sm:$0xff] %v250_v25 }
  0x96   :  { %270 = vst [vmem:[%s438_s3 + $0x68] sm:$0xff] %v254_v26 }
  0x97   :  { %259 = vst [vmem:[%s438_s3 + $0x10] sm:$0xff] %v243_v29 }
  0x98   :  { %263 = vst [vmem:[%s438_s3 + $0x30] sm:$0xff] %v247_v30 }
  0x9a   :  { %v171_v31 = vpop.f32.mrf.mxu2  ;;  %v181_v32 = vpop.f32.mrf.mxu3 }
  0x9b   :  { %v251_v33 = vadd.f32 %v328_v10, %v171_v31  ;;  %v255_v34 = vadd.f32 %v328_v10, %v181_v32  ;;  %v153_v35 = vpop.f32.mrf.mxu0  ;;  %v163_v36 = vpop.f32.mrf.mxu1 }
  0x9c   :  { %v244_v37 = vadd.f32 %v328_v10, %v153_v35  ;;  %v248_v38 = vadd.f32 %v328_v10, %v163_v36 }
  0x9d   :  { %267 = vst [vmem:[%s438_s3 + $0x50] sm:$0xff] %v251_v33 }
  0x9e   :  { %271 = vst [vmem:[%s438_s3 + $0x70] sm:$0xff] %v255_v34 }
  0x9f   :  { %260 = vst [vmem:[%s438_s3 + $0x18] sm:$0xff] %v244_v37 }
  0xa0   :  { %264 = vst [vmem:[%s438_s3 + $0x38] sm:$0xff] %v248_v38 }
  0xa2   :  { %v173_v39 = vpop.f32.mrf.mxu2  ;;  %v183_v40 = vpop.f32.mrf.mxu3 }
  0xa3   :  { %v252_v41 = vadd.f32 %v328_v10, %v173_v39  ;;  %v256_v42 = vadd.f32 %v328_v10, %v183_v40 }
  0xa5   :  { %268 = vst [vmem:[%s438_s3 + $0x58] sm:$0xff] %v252_v41 }
  0xa6   :  { %272 = vst [vmem:[%s438_s3 + $0x78] sm:$0xff] %v256_v42 }

</bundles_post_ra>
